<compile_context>
chip_gen: v7x
topology: tpu7x:2x2x1
jax: 0.10.0
libtpu: 0.0.40
codegen_flags: <defaults>
</compile_context>

<pallas_src>
import functools
import math

import jax
import jax.numpy as jnp
from jax.experimental import pallas as pl
from jax.experimental.pallas import tpu as pltpu

VMEM = pltpu.MemorySpace.VMEM
SMEM = pltpu.MemorySpace.SMEM

_MXU_DTYPE = jnp.bfloat16            # operand dtype at the MXU boundary
_VMEM_LIMIT = 48 * 1024 * 1024       # <= v7x 64 MiB/TC; raise to ~96 MiB on v5e/v6e


def _round_up(x, m):
    return ((x + m - 1) // m) * m


def _pick_tile(dim, pref, align):
    """Largest tile <= pref that is a multiple of `align` and divides `dim`;
    falls back to the full dimension (always a legal block shape)."""
    if dim <= pref:
        return dim
    t = (pref // align) * align
    while t >= align:
        if dim % t == 0:
            return t
        t -= align
    return dim


# ----------------------------- Pallas kernels -------------------------------


def _linear_kernel(*refs, gk, act, has_bias, has_ln, has_add, acc_in_out, eps):
    x_ref, w_ref = refs[0], refs[1]
    idx = 2
    if has_ln:
        g_ref, bln_ref = refs[idx], refs[idx + 1]
        idx += 2
    if has_bias:
        bias_ref = refs[idx]
        idx += 1
    if has_add:
        add_ref = refs[idx]
        idx += 1
    o_ref = refs[idx]
    idx += 1
    acc_ref = refs[idx] if (gk > 1 and not acc_in_out) else None

    xv = x_ref[...]
    if has_ln:  # fused LayerNorm prologue (full K resides in this block)
        x = xv.astype(jnp.float32)
        mu = jnp.mean(x, axis=-1, keepdims=True)
        var = jnp.mean(jnp.square(x - mu), axis=-1, keepdims=True)
        x = (x - mu) * jax.lax.rsqrt(var + eps)
        x = x * g_ref[...] + bln_ref[...]
        xm = x.astype(_MXU_DTYPE)
    else:
        xm = xv.astype(_MXU_DTYPE)

    part = jnp.dot(xm, w_ref[...].astype(_MXU_DTYPE),
                   preferred_element_type=jnp.float32)

    def epilogue(y):
        if has_bias:
            y = y + bias_ref[...].astype(jnp.float32)
        if act == "quickgelu":          # CLIP QuickGELU: x * sigmoid(1.702 x)
            y = y * jax.nn.sigmoid(1.702 * y)
        elif act == "relu":
            y = jnp.maximum(y, 0.0)
        if has_add:                      # fused residual add
            y = y + add_ref[...].astype(jnp.float32)
        o_ref[...] = y.astype(o_ref.dtype)

    if gk == 1:
        epilogue(part)
    elif acc_in_out:                     # accumulate straight into the f32 output
        k = pl.program_id(2)

        @pl.when(k == 0)
        def _():
            o_ref[...] = jnp.zeros_like(o_ref)

        o_ref[...] += part

        @pl.when(k == gk - 1)
        def _():
            epilogue(o_ref[...])
    else:                                # bf16 output: f32 VMEM accumulator
        k = pl.program_id(2)

        @pl.when(k == 0)
        def _():
            acc_ref[...] = jnp.zeros_like(acc_ref)

        acc_ref[...] += part

        @pl.when(k == gk - 1)
        def _():
            epilogue(acc_ref[...])


def pallas_linear(x, w, b=None, act="none", ln=None, add=None, eps=1e-5,
                  out_dtype=jnp.float32, tm=256, tn=1024, tk=1024):
    """x: (M, K), w: (K, N) bf16, optional bias (N,), optional fused LayerNorm
    (gamma, beta) prologue, optional activation epilogue, optional fused
    residual `add` (M, N) added before the store.  Output dtype selectable."""
    M, K = x.shape
    N = w.shape[1]
    has_ln = ln is not None
    has_bias = b is not None
    has_add = add is not None

    # --- M tiling: 128-aligned tile, pad M instead of one huge full block ---
    if M >= tm:
        tm_ = tm
        M_pad = _round_up(M, tm_)
    else:
        tm_ = M
        M_pad = M
    if M_pad != M:
        x = jnp.pad(x, ((0, M_pad - M), (0, 0)))
        if has_add:
            add = jnp.pad(add, ((0, M_pad - M), (0, 0)))

    tn_ = _pick_tile(N, tn, 128)
    tk_ = K if has_ln else _pick_tile(K, tk, 128)   # LN needs the full row
    gm, gn, gk = M_pad // tm_, N // tn_, K // tk_
    acc_in_out = (gk > 1) and (out_dtype == jnp.float32)

    in_specs = [pl.BlockSpec((tm_, tk_), lambda i, j, k: (i, k)),
                pl.BlockSpec((tk_, tn_), lambda i, j, k: (k, j))]
    args = [x, w]
    if has_ln:
        g, beta = ln
        in_specs += [pl.BlockSpec((1, K), lambda i, j, k: (0, 0)),
                     pl.BlockSpec((1, K), lambda i, j, k: (0, 0))]
        args += [g.reshape(1, K).astype(jnp.float32),
                 beta.reshape(1, K).astype(jnp.float32)]
    if has_bias:
        in_specs.append(pl.BlockSpec((1, tn_), lambda i, j, k: (0, j)))
        args.append(b.reshape(1, N).astype(jnp.float32))
    if has_add:
        in_specs.append(pl.BlockSpec((tm_, tn_), lambda i, j, k: (i, j)))
        args.append(add)

    scratch = ([pltpu.VMEM((tm_, tn_), jnp.float32)]
               if (gk > 1 and not acc_in_out) else [])

    out = pl.pallas_call(
        functools.partial(_linear_kernel, gk=gk, act=act, has_bias=has_bias,
                          has_ln=has_ln, has_add=has_add,
                          acc_in_out=acc_in_out, eps=eps),
        out_shape=jax.ShapeDtypeStruct((M_pad, N), out_dtype),
        grid=(gm, gn, gk),
        in_specs=in_specs,
        out_specs=pl.BlockSpec((tm_, tn_), lambda i, j, k: (i, j)),
        scratch_shapes=scratch,
        compiler_params=pltpu.CompilerParams(
            dimension_semantics=("parallel", "parallel", "arbitrary"),
            vmem_limit_bytes=_VMEM_LIMIT),
    )(*args)
    return out[:M] if M_pad != M else out


def _layernorm_kernel(x_ref, g_ref, b_ref, o_ref, *, eps):
    x = x_ref[...].astype(jnp.float32)
    mu = jnp.mean(x, axis=-1, keepdims=True)
    var = jnp.mean(jnp.square(x - mu), axis=-1, keepdims=True)
    y = (x - mu) * jax.lax.rsqrt(var + eps)
    o_ref[...] = (y * g_ref[...] + b_ref[...]).astype(o_ref.dtype)


def pallas_layernorm(x, gamma, beta, eps=1e-5, tm=512):
    """Standalone LayerNorm (used only where no linear follows directly)."""
    M, D = x.shape
    tm_ = _pick_tile(M, tm, 8)
    return pl.pallas_call(
        functools.partial(_layernorm_kernel, eps=eps),
        out_shape=jax.ShapeDtypeStruct((M, D), x.dtype),
        grid=(M // tm_,),
        in_specs=[pl.BlockSpec((tm_, D), lambda i: (i, 0)),
                  pl.BlockSpec((1, D), lambda i: (0, 0)),
                  pl.BlockSpec((1, D), lambda i: (0, 0))],
        out_specs=pl.BlockSpec((tm_, D), lambda i: (i, 0)),
        compiler_params=pltpu.CompilerParams(
            dimension_semantics=("parallel",),
            vmem_limit_bytes=_VMEM_LIMIT),
    )(x, gamma.reshape(1, D), beta.reshape(1, D))


def _attn_kernel(qkv_ref, wo_ref, bo_ref, res_ref, o_ref, *,
                 n_heads, causal, scale):
    qkv = qkv_ref[0]                                   # (L, 3D), bf16
    L = qkv.shape[0]
    D = qkv.shape[1] // 3
    dh = D // n_heads

    if causal:
        qi = jax.lax.broadcasted_iota(jnp.int32, (L, L), 0)
        ki = jax.lax.broadcasted_iota(jnp.int32, (L, L), 1)
        keep = ki <= qi

    # fused residual + out-proj bias seed the accumulator
    y = res_ref[0].astype(jnp.float32) + bo_ref[...].astype(jnp.float32)

    for h in range(n_heads):                           # static head loop
        qh = qkv[:, h * dh:(h + 1) * dh].astype(_MXU_DTYPE)
        kh = qkv[:, D + h * dh:D + (h + 1) * dh].astype(_MXU_DTYPE)
        vh = qkv[:, 2 * D + h * dh:2 * D + (h + 1) * dh].astype(_MXU_DTYPE)
        s = jax.lax.dot_general(
            qh, kh, (((1,), (1,)), ((), ())),
            preferred_element_type=jnp.float32) * scale
        if causal:
            s = jnp.where(keep, s, -1e30)
        m = jnp.max(s, axis=-1, keepdims=True)
        p = jnp.exp(s - m)
        p = p * pl.reciprocal(jnp.sum(p, axis=-1, keepdims=True), approx=True)
        oh = jnp.dot(p.astype(_MXU_DTYPE), vh,
                     preferred_element_type=jnp.float32)          # (L, dh)
        # per-head output projection accumulation: full-D lanes, no concat
        y = y + jnp.dot(oh.astype(_MXU_DTYPE),
                        wo_ref[h * dh:(h + 1) * dh, :].astype(_MXU_DTYPE),
                        preferred_element_type=jnp.float32)

    o_ref[0] = y.astype(o_ref.dtype)


def pallas_attention(qkv, w_out, b_out, residual, *, n_heads, causal):
    """qkv: (B, L, 3D) packed projections (bf16).  Splits heads in-kernel,
    accumulates the output projection per head, and fuses bias + residual.
    Returns (B, L, D) f32 = residual + out_proj(attention(qkv))."""
    B, L, D3 = qkv.shape
    D = D3 // 3
    scale = 1.0 / math.sqrt(D // n_heads)
    return pl.pallas_call(
        functools.partial(_attn_kernel, n_heads=n_heads,
                          causal=causal, scale=scale),
        out_shape=jax.ShapeDtypeStruct((B, L, D), jnp.float32),
        grid=(B,),
        in_specs=[pl.BlockSpec((1, L, D3), lambda b: (b, 0, 0)),
                  pl.BlockSpec((D, D), lambda b: (0, 0)),
                  pl.BlockSpec((1, D), lambda b: (0, 0)),
                  pl.BlockSpec((1, L, D), lambda b: (b, 0, 0))],
        out_specs=pl.BlockSpec((1, L, D), lambda b: (b, 0, 0)),
        compiler_params=pltpu.CompilerParams(
            dimension_semantics=("parallel",),
            vmem_limit_bytes=_VMEM_LIMIT),
    )(qkv, w_out, b_out.reshape(1, D).astype(jnp.float32), residual)


def _logits_kernel(img_ref, txt_ref, scale_ref, o_ref):
    img = img_ref[...].astype(jnp.float32)
    txt = txt_ref[...].astype(jnp.float32)
    img_n = img * jax.lax.rsqrt(
        jnp.maximum(jnp.sum(img * img, axis=-1, keepdims=True), 1e-12))
    txt_n = txt * jax.lax.rsqrt(
        jnp.maximum(jnp.sum(txt * txt, axis=-1, keepdims=True), 1e-12))
    # contract on the shared feature axis (no in-kernel transpose); bf16
    # operands after normalization keep the MXU on its fast path.
    s = jax.lax.dot_general(img_n.astype(_MXU_DTYPE), txt_n.astype(_MXU_DTYPE),
                            (((1,), (1,)), ((), ())),
                            preferred_element_type=jnp.float32)
    o_ref[...] = (jnp.exp(scale_ref[0]) * s).astype(o_ref.dtype)


def pallas_clip_logits(img_feat, txt_feat, logit_scale):
    """Fused L2-normalize(both) + exp(logit_scale) * img @ txt.T."""
    B = img_feat.shape[0]
    C = txt_feat.shape[0]
    return pl.pallas_call(
        _logits_kernel,
        out_shape=jax.ShapeDtypeStruct((B, C), jnp.float32),
        in_specs=[pl.BlockSpec(memory_space=VMEM),
                  pl.BlockSpec(memory_space=VMEM),
                  pl.BlockSpec(memory_space=SMEM)],
        out_specs=pl.BlockSpec(memory_space=VMEM),
    )(img_feat, txt_feat, logit_scale.reshape(1).astype(jnp.float32))


# ---------------------------- model building blocks -------------------------


def residual_attention_block(x, p, n_heads, causal):
    """CLIP ResidualAttentionBlock with fused LN+QKV (bf16 out), attention with
    fused out-proj + residual, LN+fc1+QuickGELU (bf16 out), fc2 + residual."""
    B, L, D = x.shape
    x2 = x.reshape(B * L, D)

    # LN1 fused into the QKV projection; emit bf16 (consumer is the MXU)
    qkv = pallas_linear(x2, p["w_qkv"], p["b_qkv"],
                        ln=(p["ln1_g"], p["ln1_b"]),
                        out_dtype=_MXU_DTYPE)                    # (B*L, 3D)
    # attention + output projection + residual, all in-kernel
    x = pallas_attention(qkv.reshape(B, L, 3 * D), p["w_out"], p["b_out"], x,
                         n_heads=n_heads, causal=causal)          # (B, L, D)
    x2 = x.reshape(B * L, D)

    # LN2 fused into fc1 (+ QuickGELU, bf16 out), fc2 with fused residual add
    h = pallas_linear(x2, p["w_fc1"], p["b_fc1"], act="quickgelu",
                      ln=(p["ln2_g"], p["ln2_b"]), out_dtype=_MXU_DTYPE)
    x2 = pallas_linear(h, p["w_fc2"], p["b_fc2"], add=x2)
    return x2.reshape(B, L, D)


def encode_image(image, p, cfg):
    """CLIP ViT image encoder.  image: (B, C, H, W) NCHW."""
    B, C, H, W = image.shape
    P = cfg["patch"]
    Hp, Wp = H // P, W // P
    Npatch = Hp * Wp
    Dv = p["conv_w"].shape[1]

    # Non-overlapping patch extraction == Conv2d(kernel=stride=patch, no bias)
    # TODO(synk): fold the NCHW patchify gather + pos_emb add into the patch
    # embedding kernel (Element-spec gather) to avoid this XLA relayout pass.
    patches = image.reshape(B, C, Hp, P, Wp, P)
    patches = patches.transpose(0, 2, 4, 1, 3, 5).reshape(B * Npatch, C * P * P)
    x = pallas_linear(patches, p["conv_w"]).reshape(B, Npatch, Dv)

    cls = jnp.broadcast_to(p["class_emb"].reshape(1, 1, Dv), (B, 1, Dv))
    x = jnp.concatenate([cls, x], axis=1) + p["pos_emb"][None]
    L = Npatch + 1

    x = pallas_layernorm(x.reshape(B * L, Dv),
                         p["ln_pre_g"], p["ln_pre_b"]).reshape(B, L, Dv)
    for blk in p["blocks"]:
        x = residual_attention_block(x, blk, cfg["vis_heads"], causal=False)

    # ln_post fused into the output projection (CLS token only)
    return pallas_linear(x[:, 0, :], p["proj"],
                         ln=(p["ln_post_g"], p["ln_post_b"]))    # (B, EMBED)


def prompt_learner_forward(p):
    """PromptLearner.forward with class_token_position == 'end'."""
    ctx = p["ctx"]                                               # (n_ctx, D)
    n_cls = p["token_prefix"].shape[0]
    ctx = jnp.broadcast_to(ctx[None], (n_cls,) + ctx.shape)
    return jnp.concatenate([p["token_prefix"], ctx, p["token_suffix"]], axis=1)


def encode_text(prompts, tokenized_prompts, p, n_heads):
    """TextEncoder.forward.  prompts: (n_cls, L, D)."""
    n_cls, L, D = prompts.shape
    x = prompts + p["pos_emb"][None]
    # torch permutes to (L, B, D) only for nn.MultiheadAttention; batch-first
    # here is semantically identical.  Causal mask is built inside the kernel.
    for blk in p["blocks"]:
        x = residual_attention_block(x, blk, n_heads, causal=True)
    eot = jnp.argmax(tokenized_prompts, axis=-1)                 # EOT position
    feats = x[jnp.arange(n_cls), eot]                            # (n_cls, D)
    # ln_final is per-row, so it commutes with the EOT gather: fuse into proj
    return pallas_linear(feats, p["text_projection"],
                         ln=(p["ln_final_g"], p["ln_final_b"]))  # (n_cls, EMBED)


def custom_clip_forward(params, image, cfg, pseudo_feat=None):
    image_features = encode_image(image, params["visual"], cfg)
    prompts = prompt_learner_forward(params["prompt"])
    text_features = encode_text(prompts, params["prompt"]["tokenized_prompts"],
                                params["text"], cfg["txt_heads"])
    logits = pallas_clip_logits(image_features, text_features,
                                params["logit_scale"])
    if pseudo_feat is not None:
        # torch casts pseudo_feat to fp16 (.half()); emulate the precision drop
        pseudo_feat = pseudo_feat.astype(jnp.float16).astype(jnp.float32)
        logits_pseudo = pallas_clip_logits(pseudo_feat, text_features,
                                           params["logit_scale"])
        return logits, logits_pseudo
    return logits


# ------------------------------ parameter init ------------------------------


def _init_block(key, d):
    ks = jax.random.split(key, 4)
    s = 0.02
    return {
        "ln1_g": jnp.ones((d,), jnp.float32),
        "ln1_b": jnp.zeros((d,), jnp.float32),
        "w_qkv": (jax.random.normal(ks[0], (d, 3 * d)) * s).astype(_MXU_DTYPE),
        "b_qkv": jnp.zeros((3 * d,), jnp.float32),
        "w_out": (jax.random.normal(ks[1], (d, d)) * s).astype(_MXU_DTYPE),
        "b_out": jnp.zeros((d,), jnp.float32),
        "ln2_g": jnp.ones((d,), jnp.float32),
        "ln2_b": jnp.zeros((d,), jnp.float32),
        "w_fc1": (jax.random.normal(ks[2], (d, 4 * d)) * s).astype(_MXU_DTYPE),
        "b_fc1": jnp.zeros((4 * d,), jnp.float32),
        "w_fc2": (jax.random.normal(ks[3], (4 * d, d)) * s).astype(_MXU_DTYPE),
        "b_fc2": jnp.zeros((d,), jnp.float32),
    }


def init_params(key, *, img_size=16, patch=8, in_chans=3, vis_width=64,
                vis_heads=2, vis_layers=2, embed_dim=64, ctx_dim=64,
                txt_len=16, txt_heads=2, txt_layers=2, n_cls=3, n_ctx=4,
                name_len=1):
    keys = jax.random.split(key, 16)
    s = 0.02
    n_patches = (img_size // patch) ** 2
    vis_seq = n_patches + 1

    visual = {
        "conv_w": (jax.random.normal(keys[0], (in_chans * patch * patch, vis_width)) * s
                   ).astype(_MXU_DTYPE),
        "class_emb": (jax.random.normal(keys[1], (vis_width,)) * s).astype(jnp.float32),
        "pos_emb": (jax.random.normal(keys[2], (vis_seq, vis_width)) * s).astype(jnp.float32),
        "ln_pre_g": jnp.ones((vis_width,), jnp.float32),
        "ln_pre_b": jnp.zeros((vis_width,), jnp.float32),
        "ln_post_g": jnp.ones((vis_width,), jnp.float32),
        "ln_post_b": jnp.zeros((vis_width,), jnp.float32),
        "proj": (jax.random.normal(keys[3], (vis_width, embed_dim)) * s).astype(_MXU_DTYPE),
        "blocks": [_init_block(k, vis_width)
                   for k in jax.random.split(keys[4], vis_layers)],
    }

    text = {
        "pos_emb": (jax.random.normal(keys[5], (txt_len, ctx_dim)) * s).astype(jnp.float32),
        "ln_final_g": jnp.ones((ctx_dim,), jnp.float32),
        "ln_final_b": jnp.zeros((ctx_dim,), jnp.float32),
        "text_projection": (jax.random.normal(keys[6], (ctx_dim, embed_dim)) * s
                            ).astype(_MXU_DTYPE),
        "blocks": [_init_block(k, ctx_dim)
                   for k in jax.random.split(keys[7], txt_layers)],
    }

    # PromptLearner buffers (synthetic token embeddings instead of CLIP tokenizer).
    suffix_len = txt_len - 1 - n_ctx
    tokenized = jnp.zeros((n_cls, txt_len), jnp.int32)
    tokenized = tokenized.at[:, 0].set(49406)                    # SOT
    for i in range(n_cls):
        tokenized = tokenized.at[i, 1 + n_ctx:1 + n_ctx + name_len].set(1000 + i)
        tokenized = tokenized.at[i, 1 + n_ctx + name_len].set(49407)  # EOT (argmax)

    prompt = {
        "ctx": (jax.random.normal(keys[8], (n_ctx, ctx_dim)) * s).astype(jnp.float32),
        "token_prefix": (jax.random.normal(keys[9], (n_cls, 1, ctx_dim)) * s
                         ).astype(jnp.float32),
        "token_suffix": (jax.random.normal(keys[10], (n_cls, suffix_len, ctx_dim)) * s
                         ).astype(jnp.float32),
        "tokenized_prompts": tokenized,
    }

    params = {
        "visual": visual,
        "text": text,
        "prompt": prompt,
        "logit_scale": jnp.array(math.log(1.0 / 0.07), jnp.float32),
    }
    # Static (Python-int) configuration kept OUT of the jitted pytree.
    cfg = {"patch": patch, "vis_heads": vis_heads, "txt_heads": txt_heads}
    return params, cfg


# ----------------------------------- main ------------------------------------

if __name__ == "__main__":
    key = jax.random.PRNGKey(0)
    k_params, k_img = jax.random.split(key)

    params, cfg = init_params(k_params)
    image = jax.random.normal(k_img, (2, 3, 16, 16), jnp.float32)   # NCHW

    fwd = jax.jit(functools.partial(custom_clip_forward, cfg=cfg))
    logits = jax.block_until_ready(fwd(params, image))

    assert logits.shape == (2, 3), logits.shape
    assert bool(jnp.all(jnp.isfinite(logits)))
    print("KERNEL_OK")
</pallas_src>

<mosaic_0001>
module attributes {stable_mosaic.version = 11 : i64} {
  func.func @_linear_kernel(%arg0: i32, %arg1: i32, %arg2: i32, %arg3: memref<8x192xf32, #tpu.memory_space<vmem>>, %arg4: memref<192x64xbf16, #tpu.memory_space<vmem>>, %arg5: memref<8x64xf32, #tpu.memory_space<vmem>>) attributes {dimension_semantics = [#tpu.dimension_semantics<parallel>, #tpu.dimension_semantics<parallel>, #tpu.dimension_semantics<arbitrary>], iteration_bounds = array<i64: 1, 1, 1>, scalar_prefetch = 0 : i64, scratch_operands = 0 : i64, tpu.core_type = #tpu.core_type<tc>, window_params = [{transform_indices = @transform_0, window_bounds = array<i64: 8, 192>}, {transform_indices = @transform_1, window_bounds = array<i64: 192, 64>}, {transform_indices = @transform_2, window_bounds = array<i64: 8, 64>}]} {
    %c0 = arith.constant 0 : index
    %c0_0 = arith.constant 0 : index
    %0 = vector.load %arg3[%c0, %c0_0] : memref<8x192xf32, #tpu.memory_space<vmem>>, vector<8x192xf32>
    %1 = arith.truncf %0 : vector<8x192xf32> to vector<8x192xbf16>
    %c0_1 = arith.constant 0 : index
    %c0_2 = arith.constant 0 : index
    %2 = vector.load %arg4[%c0_1, %c0_2] : memref<192x64xbf16, #tpu.memory_space<vmem>>, vector<192x64xbf16>
    %cst = arith.constant dense<0.000000e+00> : vector<8x64xf32>
    %3 = tpu.matmul %1, %2, %cst {dimension_numbers = #tpu.dot_dimension_numbers<[1], [0], [0], [1], [0, 0, 1, 1], [], []>} : vector<8x192xbf16>, vector<192x64xbf16>, vector<8x64xf32> -> vector<8x64xf32>
    %c0_3 = arith.constant 0 : index
    %c0_4 = arith.constant 0 : index
    %4 = vector.load %arg5[%c0_3, %c0_4] : memref<8x64xf32, #tpu.memory_space<vmem>>, vector<8x64xf32>
    tpu.vector_store %arg5[%c0_3, %c0_4], %3 {strides = array<i32>} : memref<8x64xf32, #tpu.memory_space<vmem>>, vector<8x64xf32>,
    return
  }
  func.func @transform_0(%arg0: i32, %arg1: i32, %arg2: i32) -> (i32, i32) {
    %c0_i32 = arith.constant 0 : i32
    return %arg0, %arg2 : i32, i32
  }
  func.func @transform_1(%arg0: i32, %arg1: i32, %arg2: i32) -> (i32, i32) {
    %c0_i32 = arith.constant 0 : i32
    return %arg2, %arg1 : i32, i32
  }
  func.func @transform_2(%arg0: i32, %arg1: i32, %arg2: i32) -> (i32, i32) {
    %c0_i32 = arith.constant 0 : i32
    return %arg0, %arg1 : i32, i32
  }
}

module attributes {stable_mosaic.version = 11 : i64} {
  func.func @_layernorm_kernel(%arg0: i32, %arg1: memref<10x64xf32, #tpu.memory_space<vmem>>, %arg2: memref<1x64xf32, #tpu.memory_space<vmem>>, %arg3: memref<1x64xf32, #tpu.memory_space<vmem>>, %arg4: memref<10x64xf32, #tpu.memory_space<vmem>>) attributes {dimension_semantics = [#tpu.dimension_semantics<parallel>], iteration_bounds = array<i64: 1>, scalar_prefetch = 0 : i64, scratch_operands = 0 : i64, tpu.core_type = #tpu.core_type<tc>, window_params = [{transform_indices = @transform_0, window_bounds = array<i64: 10, 64>}, {pipeline_mode = #tpu.pipeline_mode<synchronous>, transform_indices = @transform_1, window_bounds = array<i64: 1, 64>}, {pipeline_mode = #tpu.pipeline_mode<synchronous>, transform_indices = @transform_2, window_bounds = array<i64: 1, 64>}, {transform_indices = @transform_3, window_bounds = array<i64: 10, 64>}]} {
    %c0 = arith.constant 0 : index
    %c0_0 = arith.constant 0 : index
    %0 = vector.load %arg1[%c0, %c0_0] : memref<10x64xf32, #tpu.memory_space<vmem>>, vector<10x64xf32>
    %cst = arith.constant dense<0.000000e+00> : vector<10xf32>
    %1 = vector.multi_reduction <add>, %0, %cst [1] : vector<10x64xf32> to vector<10xf32>
    %2 = vector.shape_cast %1 : vector<10xf32> to vector<10x1xf32>
    %cst_1 = arith.constant 6.400000e+01 : f32
    %3 = vector.broadcast %cst_1 : f32 to vector<10x1xf32>
    %4 = arith.divf %2, %3 : vector<10x1xf32>
    %5 = vector.broadcast %4 : vector<10x1xf32> to vector<10x64xf32>
    %6 = arith.subf %0, %5 : vector<10x64xf32>
    %7 = arith.mulf %6, %6 : vector<10x64xf32>
    %cst_2 = arith.constant dense<0.000000e+00> : vector<10xf32>
    %8 = vector.multi_reduction <add>, %7, %cst_2 [1] : vector<10x64xf32> to vector<10xf32>
    %9 = vector.shape_cast %8 : vector<10xf32> to vector<10x1xf32>
    %cst_3 = arith.constant 6.400000e+01 : f32
    %10 = vector.broadcast %cst_3 : f32 to vector<10x1xf32>
    %11 = arith.divf %9, %10 : vector<10x1xf32>
    %12 = vector.broadcast %4 : vector<10x1xf32> to vector<10x64xf32>
    %13 = arith.subf %0, %12 : vector<10x64xf32>
    %cst_4 = arith.constant 9.99999974E-6 : f32
    %14 = vector.broadcast %cst_4 : f32 to vector<10x1xf32>
    %15 = arith.addf %11, %14 : vector<10x1xf32>
    %16 = math.rsqrt %15 : vector<10x1xf32>
    %17 = vector.broadcast %16 : vector<10x1xf32> to vector<10x64xf32>
    %18 = arith.mulf %13, %17 : vector<10x64xf32>
    %c0_5 = arith.constant 0 : index
    %c0_6 = arith.constant 0 : index
    %19 = vector.load %arg2[%c0_5, %c0_6] : memref<1x64xf32, #tpu.memory_space<vmem>>, vector<1x64xf32>
    %20 = vector.broadcast %19 : vector<1x64xf32> to vector<10x64xf32>
    %21 = arith.mulf %18, %20 : vector<10x64xf32>
    %c0_7 = arith.constant 0 : index
    %c0_8 = arith.constant 0 : index
    %22 = vector.load %arg3[%c0_7, %c0_8] : memref<1x64xf32, #tpu.memory_space<vmem>>, vector<1x64xf32>
    %23 = vector.broadcast %22 : vector<1x64xf32> to vector<10x64xf32>
    %24 = arith.addf %21, %23 : vector<10x64xf32>
    %c0_9 = arith.constant 0 : index
    %c0_10 = arith.constant 0 : index
    %25 = vector.load %arg4[%c0_9, %c0_10] : memref<10x64xf32, #tpu.memory_space<vmem>>, vector<10x64xf32>
    tpu.vector_store %arg4[%c0_9, %c0_10], %24 {strides = array<i32>} : memref<10x64xf32, #tpu.memory_space<vmem>>, vector<10x64xf32>,
    return
  }
  func.func @transform_0(%arg0: i32) -> (i32, i32) {
    %c0_i32 = arith.constant 0 : i32
    %c0_i32_0 = arith.constant 0 : i32
    return %arg0, %c0_i32 : i32, i32
  }
  func.func @transform_1(%arg0: i32) -> (i32, i32) {
    %c0_i32 = arith.constant 0 : i32
    %c0_i32_0 = arith.constant 0 : i32
    %c0_i32_1 = arith.constant 0 : i32
    return %c0_i32, %c0_i32_0 : i32, i32
  }
  func.func @transform_2(%arg0: i32) -> (i32, i32) {
    %c0_i32 = arith.constant 0 : i32
    %c0_i32_0 = arith.constant 0 : i32
    %c0_i32_1 = arith.constant 0 : i32
    return %c0_i32, %c0_i32_0 : i32, i32
  }
  func.func @transform_3(%arg0: i32) -> (i32, i32) {
    %c0_i32 = arith.constant 0 : i32
    %c0_i32_0 = arith.constant 0 : i32
    return %arg0, %c0_i32 : i32, i32
  }
}

module attributes {stable_mosaic.version = 11 : i64} {
  func.func @_linear_kernel(%arg0: i32, %arg1: i32, %arg2: i32, %arg3: memref<10x64xf32, #tpu.memory_space<vmem>>, %arg4: memref<64x192xbf16, #tpu.memory_space<vmem>>, %arg5: memref<1x64xf32, #tpu.memory_space<vmem>>, %arg6: memref<1x64xf32, #tpu.memory_space<vmem>>, %arg7: memref<1x192xf32, #tpu.memory_space<vmem>>, %arg8: memref<10x192xbf16, #tpu.memory_space<vmem>>) attributes {dimension_semantics = [#tpu.dimension_semantics<parallel>, #tpu.dimension_semantics<parallel>, #tpu.dimension_semantics<arbitrary>], iteration_bounds = array<i64: 1, 1, 1>, scalar_prefetch = 0 : i64, scratch_operands = 0 : i64, tpu.core_type = #tpu.core_type<tc>, window_params = [{transform_indices = @transform_0, window_bounds = array<i64: 10, 64>}, {transform_indices = @transform_1, window_bounds = array<i64: 64, 192>}, {pipeline_mode = #tpu.pipeline_mode<synchronous>, transform_indices = @transform_2, window_bounds = array<i64: 1, 64>}, {pipeline_mode = #tpu.pipeline_mode<synchronous>, transform_indices = @transform_3, window_bounds = array<i64: 1, 64>}, {transform_indices = @transform_4, window_bounds = array<i64: 1, 192>}, {transform_indices = @transform_5, window_bounds = array<i64: 10, 192>}]} {
    %c0 = arith.constant 0 : index
    %c0_0 = arith.constant 0 : index
    %0 = vector.load %arg3[%c0, %c0_0] : memref<10x64xf32, #tpu.memory_space<vmem>>, vector<10x64xf32>
    %cst = arith.constant dense<0.000000e+00> : vector<10xf32>
    %1 = vector.multi_reduction <add>, %0, %cst [1] : vector<10x64xf32> to vector<10xf32>
    %2 = vector.shape_cast %1 : vector<10xf32> to vector<10x1xf32>
    %cst_1 = arith.constant 6.400000e+01 : f32
    %3 = vector.broadcast %cst_1 : f32 to vector<10x1xf32>
    %4 = arith.divf %2, %3 : vector<10x1xf32>
    %5 = vector.broadcast %4 : vector<10x1xf32> to vector<10x64xf32>
    %6 = arith.subf %0, %5 : vector<10x64xf32>
    %7 = arith.mulf %6, %6 : vector<10x64xf32>
    %cst_2 = arith.constant dense<0.000000e+00> : vector<10xf32>
    %8 = vector.multi_reduction <add>, %7, %cst_2 [1] : vector<10x64xf32> to vector<10xf32>
    %9 = vector.shape_cast %8 : vector<10xf32> to vector<10x1xf32>
    %cst_3 = arith.constant 6.400000e+01 : f32
    %10 = vector.broadcast %cst_3 : f32 to vector<10x1xf32>
    %11 = arith.divf %9, %10 : vector<10x1xf32>
    %12 = vector.broadcast %4 : vector<10x1xf32> to vector<10x64xf32>
    %13 = arith.subf %0, %12 : vector<10x64xf32>
    %cst_4 = arith.constant 9.99999974E-6 : f32
    %14 = vector.broadcast %cst_4 : f32 to vector<10x1xf32>
    %15 = arith.addf %11, %14 : vector<10x1xf32>
    %16 = math.rsqrt %15 : vector<10x1xf32>
    %17 = vector.broadcast %16 : vector<10x1xf32> to vector<10x64xf32>
    %18 = arith.mulf %13, %17 : vector<10x64xf32>
    %c0_5 = arith.constant 0 : index
    %c0_6 = arith.constant 0 : index
    %19 = vector.load %arg5[%c0_5, %c0_6] : memref<1x64xf32, #tpu.memory_space<vmem>>, vector<1x64xf32>
    %20 = vector.broadcast %19 : vector<1x64xf32> to vector<10x64xf32>
    %21 = arith.mulf %18, %20 : vector<10x64xf32>
    %c0_7 = arith.constant 0 : index
    %c0_8 = arith.constant 0 : index
    %22 = vector.load %arg6[%c0_7, %c0_8] : memref<1x64xf32, #tpu.memory_space<vmem>>, vector<1x64xf32>
    %23 = vector.broadcast %22 : vector<1x64xf32> to vector<10x64xf32>
    %24 = arith.addf %21, %23 : vector<10x64xf32>
    %25 = arith.truncf %24 : vector<10x64xf32> to vector<10x64xbf16>
    %c0_9 = arith.constant 0 : index
    %c0_10 = arith.constant 0 : index
    %26 = vector.load %arg4[%c0_9, %c0_10] : memref<64x192xbf16, #tpu.memory_space<vmem>>, vector<64x192xbf16>
    %cst_11 = arith.constant dense<0.000000e+00> : vector<10x192xf32>
    %27 = tpu.matmul %25, %26, %cst_11 {dimension_numbers = #tpu.dot_dimension_numbers<[1], [0], [0], [1], [0, 0, 1, 1], [], []>} : vector<10x64xbf16>, vector<64x192xbf16>, vector<10x192xf32> -> vector<10x192xf32>
    %c0_12 = arith.constant 0 : index
    %c0_13 = arith.constant 0 : index
    %28 = vector.load %arg7[%c0_12, %c0_13] : memref<1x192xf32, #tpu.memory_space<vmem>>, vector<1x192xf32>
    %29 = vector.broadcast %28 : vector<1x192xf32> to vector<10x192xf32>
    %30 = arith.addf %27, %29 : vector<10x192xf32>
    %31 = arith.truncf %30 : vector<10x192xf32> to vector<10x192xbf16>
    %c0_14 = arith.constant 0 : index
    %c0_15 = arith.constant 0 : index
    %32 = vector.load %arg8[%c0_14, %c0_15] : memref<10x192xbf16, #tpu.memory_space<vmem>>, vector<10x192xbf16>
    tpu.vector_store %arg8[%c0_14, %c0_15], %31 {strides = array<i32>} : memref<10x192xbf16, #tpu.memory_space<vmem>>, vector<10x192xbf16>,
    return
  }
  func.func @transform_0(%arg0: i32, %arg1: i32, %arg2: i32) -> (i32, i32) {
    %c0_i32 = arith.constant 0 : i32
    return %arg0, %arg2 : i32, i32
  }
  func.func @transform_1(%arg0: i32, %arg1: i32, %arg2: i32) -> (i32, i32) {
    %c0_i32 = arith.constant 0 : i32
    return %arg2, %arg1 : i32, i32
  }
  func.func @transform_2(%arg0: i32, %arg1: i32, %arg2: i32) -> (i32, i32) {
    %c0_i32 = arith.constant 0 : i32
    %c0_i32_0 = arith.constant 0 : i32
    %c0_i32_1 = arith.constant 0 : i32
    return %c0_i32, %c0_i32_0 : i32, i32
  }
  func.func @transform_3(%arg0: i32, %arg1: i32, %arg2: i32) -> (i32, i32) {
    %c0_i32 = arith.constant 0 : i32
    %c0_i32_0 = arith.constant 0 : i32
    %c0_i32_1 = arith.constant 0 : i32
    return %c0_i32, %c0_i32_0 : i32, i32
  }
  func.func @transform_4(%arg0: i32, %arg1: i32, %arg2: i32) -> (i32, i32) {
    %c0_i32 = arith.constant 0 : i32
    %c0_i32_0 = arith.constant 0 : i32
    return %c0_i32, %arg1 : i32, i32
  }
  func.func @transform_5(%arg0: i32, %arg1: i32, %arg2: i32) -> (i32, i32) {
    %c0_i32 = arith.constant 0 : i32
    return %arg0, %arg1 : i32, i32
  }
}

module attributes {stable_mosaic.version = 11 : i64} {
  func.func @_attn_kernel(%arg0: i32, %arg1: memref<1x5x192xbf16, #tpu.memory_space<vmem>>, %arg2: memref<64x64xbf16, #tpu.memory_space<vmem>>, %arg3: memref<1x64xf32, #tpu.memory_space<vmem>>, %arg4: memref<1x5x64xf32, #tpu.memory_space<vmem>>, %arg5: memref<1x5x64xf32, #tpu.memory_space<vmem>>) attributes {dimension_semantics = [#tpu.dimension_semantics<parallel>], iteration_bounds = array<i64: 2>, scalar_prefetch = 0 : i64, scratch_operands = 0 : i64, tpu.core_type = #tpu.core_type<tc>, window_params = [{transform_indices = @transform_0, window_bounds = array<i64: 1, 5, 192>}, {pipeline_mode = #tpu.pipeline_mode<synchronous>, transform_indices = @transform_1, window_bounds = array<i64: 64, 64>}, {pipeline_mode = #tpu.pipeline_mode<synchronous>, transform_indices = @transform_2, window_bounds = array<i64: 1, 64>}, {transform_indices = @transform_3, window_bounds = array<i64: 1, 5, 64>}, {transform_indices = @transform_4, window_bounds = array<i64: 1, 5, 64>}]} {
    %c0 = arith.constant 0 : index
    %c0_0 = arith.constant 0 : index
    %c0_1 = arith.constant 0 : index
    %0 = vector.load %arg1[%c0, %c0_0, %c0_1] : memref<1x5x192xbf16, #tpu.memory_space<vmem>>, vector<1x5x192xbf16>
    %1 = vector.shape_cast %0 : vector<1x5x192xbf16> to vector<5x192xbf16>
    %c0_2 = arith.constant 0 : index
    %c0_3 = arith.constant 0 : index
    %c0_4 = arith.constant 0 : index
    %2 = vector.load %arg4[%c0_2, %c0_3, %c0_4] : memref<1x5x64xf32, #tpu.memory_space<vmem>>, vector<1x5x64xf32>
    %3 = vector.shape_cast %2 : vector<1x5x64xf32> to vector<5x64xf32>
    %c0_5 = arith.constant 0 : index
    %c0_6 = arith.constant 0 : index
    %4 = vector.load %arg3[%c0_5, %c0_6] : memref<1x64xf32, #tpu.memory_space<vmem>>, vector<1x64xf32>
    %5 = vector.broadcast %4 : vector<1x64xf32> to vector<5x64xf32>
    %6 = arith.addf %3, %5 : vector<5x64xf32>
    %7 = vector.extract_strided_slice %1 {offsets = [0, 0], sizes = [5, 32], strides = [1, 1]} : vector<5x192xbf16> to vector<5x32xbf16>
    %8 = vector.extract_strided_slice %1 {offsets = [0, 64], sizes = [5, 32], strides = [1, 1]} : vector<5x192xbf16> to vector<5x32xbf16>
    %9 = vector.extract_strided_slice %1 {offsets = [0, 128], sizes = [5, 32], strides = [1, 1]} : vector<5x192xbf16> to vector<5x32xbf16>
    %cst = arith.constant dense<0.000000e+00> : vector<5x5xf32>
    %10 = tpu.matmul %7, %8, %cst {dimension_numbers = #tpu.dot_dimension_numbers<[1], [1], [0], [0], [0, 0, 1, 0], [], []>} : vector<5x32xbf16>, vector<5x32xbf16>, vector<5x5xf32> -> vector<5x5xf32>
    %cst_7 = arith.constant 0.176776692 : f32
    %11 = vector.broadcast %cst_7 : f32 to vector<5x5xf32>
    %12 = arith.mulf %10, %11 : vector<5x5xf32>
    %cst_8 = arith.constant dense<0xFF800000> : vector<5xf32>
    %13 = vector.multi_reduction <maximumf>, %12, %cst_8 [1] : vector<5x5xf32> to vector<5xf32>
    %14 = vector.shape_cast %13 : vector<5xf32> to vector<5x1xf32>
    %15 = vector.broadcast %14 : vector<5x1xf32> to vector<5x5xf32>
    %16 = arith.subf %12, %15 : vector<5x5xf32>
    %17 = math.exp %16 : vector<5x5xf32>
    %cst_9 = arith.constant dense<0.000000e+00> : vector<5xf32>
    %18 = vector.multi_reduction <add>, %17, %cst_9 [1] : vector<5x5xf32> to vector<5xf32>
    %19 = vector.shape_cast %18 : vector<5xf32> to vector<5x1xf32>
    %20 = tpu.reciprocal %19 {approx = true} : vector<5x1xf32> -> vector<5x1xf32>
    %21 = vector.broadcast %20 : vector<5x1xf32> to vector<5x5xf32>
    %22 = arith.mulf %17, %21 : vector<5x5xf32>
    %23 = arith.truncf %22 : vector<5x5xf32> to vector<5x5xbf16>
    %cst_10 = arith.constant dense<0.000000e+00> : vector<5x32xf32>
    %24 = tpu.matmul %23, %9, %cst_10 {dimension_numbers = #tpu.dot_dimension_numbers<[1], [0], [0], [1], [0, 0, 1, 1], [], []>} : vector<5x5xbf16>, vector<5x32xbf16>, vector<5x32xf32> -> vector<5x32xf32>
    %25 = arith.truncf %24 : vector<5x32xf32> to vector<5x32xbf16>
    %c0_11 = arith.constant 0 : index
    %c0_12 = arith.constant 0 : index
    %26 = vector.load %arg2[%c0_11, %c0_12] : memref<64x64xbf16, #tpu.memory_space<vmem>>, vector<32x64xbf16>
    %cst_13 = arith.constant dense<0.000000e+00> : vector<5x64xf32>
    %27 = tpu.matmul %25, %26, %cst_13 {dimension_numbers = #tpu.dot_dimension_numbers<[1], [0], [0], [1], [0, 0, 1, 1], [], []>} : vector<5x32xbf16>, vector<32x64xbf16>, vector<5x64xf32> -> vector<5x64xf32>
    %28 = arith.addf %6, %27 : vector<5x64xf32>
    %29 = vector.extract_strided_slice %1 {offsets = [0, 32], sizes = [5, 32], strides = [1, 1]} : vector<5x192xbf16> to vector<5x32xbf16>
    %30 = vector.extract_strided_slice %1 {offsets = [0, 96], sizes = [5, 32], strides = [1, 1]} : vector<5x192xbf16> to vector<5x32xbf16>
    %31 = vector.extract_strided_slice %1 {offsets = [0, 160], sizes = [5, 32], strides = [1, 1]} : vector<5x192xbf16> to vector<5x32xbf16>
    %cst_14 = arith.constant dense<0.000000e+00> : vector<5x5xf32>
    %32 = tpu.matmul %29, %30, %cst_14 {dimension_numbers = #tpu.dot_dimension_numbers<[1], [1], [0], [0], [0, 0, 1, 0], [], []>} : vector<5x32xbf16>, vector<5x32xbf16>, vector<5x5xf32> -> vector<5x5xf32>
    %cst_15 = arith.constant 0.176776692 : f32
    %33 = vector.broadcast %cst_15 : f32 to vector<5x5xf32>
    %34 = arith.mulf %32, %33 : vector<5x5xf32>
    %cst_16 = arith.constant dense<0xFF800000> : vector<5xf32>
    %35 = vector.multi_reduction <maximumf>, %34, %cst_16 [1] : vector<5x5xf32> to vector<5xf32>
    %36 = vector.shape_cast %35 : vector<5xf32> to vector<5x1xf32>
    %37 = vector.broadcast %36 : vector<5x1xf32> to vector<5x5xf32>
    %38 = arith.subf %34, %37 : vector<5x5xf32>
    %39 = math.exp %38 : vector<5x5xf32>
    %cst_17 = arith.constant dense<0.000000e+00> : vector<5xf32>
    %40 = vector.multi_reduction <add>, %39, %cst_17 [1] : vector<5x5xf32> to vector<5xf32>
    %41 = vector.shape_cast %40 : vector<5xf32> to vector<5x1xf32>
    %42 = tpu.reciprocal %41 {approx = true} : vector<5x1xf32> -> vector<5x1xf32>
    %43 = vector.broadcast %42 : vector<5x1xf32> to vector<5x5xf32>
    %44 = arith.mulf %39, %43 : vector<5x5xf32>
    %45 = arith.truncf %44 : vector<5x5xf32> to vector<5x5xbf16>
    %cst_18 = arith.constant dense<0.000000e+00> : vector<5x32xf32>
    %46 = tpu.matmul %45, %31, %cst_18 {dimension_numbers = #tpu.dot_dimension_numbers<[1], [0], [0], [1], [0, 0, 1, 1], [], []>} : vector<5x5xbf16>, vector<5x32xbf16>, vector<5x32xf32> -> vector<5x32xf32>
    %47 = arith.truncf %46 : vector<5x32xf32> to vector<5x32xbf16>
    %c32 = arith.constant 32 : index
    %c0_19 = arith.constant 0 : index
    %48 = vector.load %arg2[%c32, %c0_19] : memref<64x64xbf16, #tpu.memory_space<vmem>>, vector<32x64xbf16>
    %cst_20 = arith.constant dense<0.000000e+00> : vector<5x64xf32>
    %49 = tpu.matmul %47, %48, %cst_20 {dimension_numbers = #tpu.dot_dimension_numbers<[1], [0], [0], [1], [0, 0, 1, 1], [], []>} : vector<5x32xbf16>, vector<32x64xbf16>, vector<5x64xf32> -> vector<5x64xf32>
    %50 = arith.addf %28, %49 : vector<5x64xf32>
    %c0_21 = arith.constant 0 : index
    %c0_22 = arith.constant 0 : index
    %c0_23 = arith.constant 0 : index
    %51 = vector.load %arg5[%c0_21, %c0_22, %c0_23] : memref<1x5x64xf32, #tpu.memory_space<vmem>>, vector<1x5x64xf32>
    %52 = vector.shape_cast %51 : vector<1x5x64xf32> to vector<5x64xf32>
    %53 = vector.shape_cast %50 : vector<5x64xf32> to vector<1x5x64xf32>
    tpu.vector_store %arg5[%c0_21, %c0_22, %c0_23], %53 {strides = array<i32>} : memref<1x5x64xf32, #tpu.memory_space<vmem>>, vector<1x5x64xf32>,
    return
  }
  func.func @transform_0(%arg0: i32) -> (i32, i32, i32) {
    %c0_i32 = arith.constant 0 : i32
    %c0_i32_0 = arith.constant 0 : i32
    %c0_i32_1 = arith.constant 0 : i32
    return %arg0, %c0_i32, %c0_i32_0 : i32, i32, i32
  }
  func.func @transform_1(%arg0: i32) -> (i32, i32) {
    %c0_i32 = arith.constant 0 : i32
    %c0_i32_0 = arith.constant 0 : i32
    %c0_i32_1 = arith.constant 0 : i32
    return %c0_i32, %c0_i32_0 : i32, i32
  }
  func.func @transform_2(%arg0: i32) -> (i32, i32) {
    %c0_i32 = arith.constant 0 : i32
    %c0_i32_0 = arith.constant 0 : i32
    %c0_i32_1 = arith.constant 0 : i32
    return %c0_i32, %c0_i32_0 : i32, i32
  }
  func.func @transform_3(%arg0: i32) -> (i32, i32, i32) {
    %c0_i32 = arith.constant 0 : i32
    %c0_i32_0 = arith.constant 0 : i32
    %c0_i32_1 = arith.constant 0 : i32
    return %arg0, %c0_i32, %c0_i32_0 : i32, i32, i32
  }
  func.func @transform_4(%arg0: i32) -> (i32, i32, i32) {
    %c0_i32 = arith.constant 0 : i32
    %c0_i32_0 = arith.constant 0 : i32
    %c0_i32_1 = arith.constant 0 : i32
    return %arg0, %c0_i32, %c0_i32_0 : i32, i32, i32
  }
}

module attributes {stable_mosaic.version = 11 : i64} {
  func.func @_linear_kernel(%arg0: i32, %arg1: i32, %arg2: i32, %arg3: memref<10x64xf32, #tpu.memory_space<vmem>>, %arg4: memref<64x256xbf16, #tpu.memory_space<vmem>>, %arg5: memref<1x64xf32, #tpu.memory_space<vmem>>, %arg6: memref<1x64xf32, #tpu.memory_space<vmem>>, %arg7: memref<1x256xf32, #tpu.memory_space<vmem>>, %arg8: memref<10x256xbf16, #tpu.memory_space<vmem>>) attributes {dimension_semantics = [#tpu.dimension_semantics<parallel>, #tpu.dimension_semantics<parallel>, #tpu.dimension_semantics<arbitrary>], iteration_bounds = array<i64: 1, 1, 1>, scalar_prefetch = 0 : i64, scratch_operands = 0 : i64, tpu.core_type = #tpu.core_type<tc>, window_params = [{transform_indices = @transform_0, window_bounds = array<i64: 10, 64>}, {transform_indices = @transform_1, window_bounds = array<i64: 64, 256>}, {pipeline_mode = #tpu.pipeline_mode<synchronous>, transform_indices = @transform_2, window_bounds = array<i64: 1, 64>}, {pipeline_mode = #tpu.pipeline_mode<synchronous>, transform_indices = @transform_3, window_bounds = array<i64: 1, 64>}, {transform_indices = @transform_4, window_bounds = array<i64: 1, 256>}, {transform_indices = @transform_5, window_bounds = array<i64: 10, 256>}]} {
    %c0 = arith.constant 0 : index
    %c0_0 = arith.constant 0 : index
    %0 = vector.load %arg3[%c0, %c0_0] : memref<10x64xf32, #tpu.memory_space<vmem>>, vector<10x64xf32>
    %cst = arith.constant dense<0.000000e+00> : vector<10xf32>
    %1 = vector.multi_reduction <add>, %0, %cst [1] : vector<10x64xf32> to vector<10xf32>
    %2 = vector.shape_cast %1 : vector<10xf32> to vector<10x1xf32>
    %cst_1 = arith.constant 6.400000e+01 : f32
    %3 = vector.broadcast %cst_1 : f32 to vector<10x1xf32>
    %4 = arith.divf %2, %3 : vector<10x1xf32>
    %5 = vector.broadcast %4 : vector<10x1xf32> to vector<10x64xf32>
    %6 = arith.subf %0, %5 : vector<10x64xf32>
    %7 = arith.mulf %6, %6 : vector<10x64xf32>
    %cst_2 = arith.constant dense<0.000000e+00> : vector<10xf32>
    %8 = vector.multi_reduction <add>, %7, %cst_2 [1] : vector<10x64xf32> to vector<10xf32>
    %9 = vector.shape_cast %8 : vector<10xf32> to vector<10x1xf32>
    %cst_3 = arith.constant 6.400000e+01 : f32
    %10 = vector.broadcast %cst_3 : f32 to vector<10x1xf32>
    %11 = arith.divf %9, %10 : vector<10x1xf32>
    %12 = vector.broadcast %4 : vector<10x1xf32> to vector<10x64xf32>
    %13 = arith.subf %0, %12 : vector<10x64xf32>
    %cst_4 = arith.constant 9.99999974E-6 : f32
    %14 = vector.broadcast %cst_4 : f32 to vector<10x1xf32>
    %15 = arith.addf %11, %14 : vector<10x1xf32>
    %16 = math.rsqrt %15 : vector<10x1xf32>
    %17 = vector.broadcast %16 : vector<10x1xf32> to vector<10x64xf32>
    %18 = arith.mulf %13, %17 : vector<10x64xf32>
    %c0_5 = arith.constant 0 : index
    %c0_6 = arith.constant 0 : index
    %19 = vector.load %arg5[%c0_5, %c0_6] : memref<1x64xf32, #tpu.memory_space<vmem>>, vector<1x64xf32>
    %20 = vector.broadcast %19 : vector<1x64xf32> to vector<10x64xf32>
    %21 = arith.mulf %18, %20 : vector<10x64xf32>
    %c0_7 = arith.constant 0 : index
    %c0_8 = arith.constant 0 : index
    %22 = vector.load %arg6[%c0_7, %c0_8] : memref<1x64xf32, #tpu.memory_space<vmem>>, vector<1x64xf32>
    %23 = vector.broadcast %22 : vector<1x64xf32> to vector<10x64xf32>
    %24 = arith.addf %21, %23 : vector<10x64xf32>
    %25 = arith.truncf %24 : vector<10x64xf32> to vector<10x64xbf16>
    %c0_9 = arith.constant 0 : index
    %c0_10 = arith.constant 0 : index
    %26 = vector.load %arg4[%c0_9, %c0_10] : memref<64x256xbf16, #tpu.memory_space<vmem>>, vector<64x256xbf16>
    %cst_11 = arith.constant dense<0.000000e+00> : vector<10x256xf32>
    %27 = tpu.matmul %25, %26, %cst_11 {dimension_numbers = #tpu.dot_dimension_numbers<[1], [0], [0], [1], [0, 0, 1, 1], [], []>} : vector<10x64xbf16>, vector<64x256xbf16>, vector<10x256xf32> -> vector<10x256xf32>
    %c0_12 = arith.constant 0 : index
    %c0_13 = arith.constant 0 : index
    %28 = vector.load %arg7[%c0_12, %c0_13] : memref<1x256xf32, #tpu.memory_space<vmem>>, vector<1x256xf32>
    %29 = vector.broadcast %28 : vector<1x256xf32> to vector<10x256xf32>
    %30 = arith.addf %27, %29 : vector<10x256xf32>
    %cst_14 = arith.constant 1.702000e+00 : f32
    %31 = vector.broadcast %cst_14 : f32 to vector<10x256xf32>
    %32 = arith.mulf %31, %30 : vector<10x256xf32>
    %33 = arith.negf %32 : vector<10x256xf32>
    %34 = math.exp %33 : vector<10x256xf32>
    %cst_15 = arith.constant 1.000000e+00 : f32
    %35 = vector.broadcast %cst_15 : f32 to vector<10x256xf32>
    %36 = arith.addf %35, %34 : vector<10x256xf32>
    %37 = arith.divf %35, %36 : vector<10x256xf32>
    %38 = arith.mulf %30, %37 : vector<10x256xf32>
    %39 = arith.truncf %38 : vector<10x256xf32> to vector<10x256xbf16>
    %c0_16 = arith.constant 0 : index
    %c0_17 = arith.constant 0 : index
    %40 = vector.load %arg8[%c0_16, %c0_17] : memref<10x256xbf16, #tpu.memory_space<vmem>>, vector<10x256xbf16>
    tpu.vector_store %arg8[%c0_16, %c0_17], %39 {strides = array<i32>} : memref<10x256xbf16, #tpu.memory_space<vmem>>, vector<10x256xbf16>,
    return
  }
  func.func @transform_0(%arg0: i32, %arg1: i32, %arg2: i32) -> (i32, i32) {
    %c0_i32 = arith.constant 0 : i32
    return %arg0, %arg2 : i32, i32
  }
  func.func @transform_1(%arg0: i32, %arg1: i32, %arg2: i32) -> (i32, i32) {
    %c0_i32 = arith.constant 0 : i32
    return %arg2, %arg1 : i32, i32
  }
  func.func @transform_2(%arg0: i32, %arg1: i32, %arg2: i32) -> (i32, i32) {
    %c0_i32 = arith.constant 0 : i32
    %c0_i32_0 = arith.constant 0 : i32
    %c0_i32_1 = arith.constant 0 : i32
    return %c0_i32, %c0_i32_0 : i32, i32
  }
  func.func @transform_3(%arg0: i32, %arg1: i32, %arg2: i32) -> (i32, i32) {
    %c0_i32 = arith.constant 0 : i32
    %c0_i32_0 = arith.constant 0 : i32
    %c0_i32_1 = arith.constant 0 : i32
    return %c0_i32, %c0_i32_0 : i32, i32
  }
  func.func @transform_4(%arg0: i32, %arg1: i32, %arg2: i32) -> (i32, i32) {
    %c0_i32 = arith.constant 0 : i32
    %c0_i32_0 = arith.constant 0 : i32
    return %c0_i32, %arg1 : i32, i32
  }
  func.func @transform_5(%arg0: i32, %arg1: i32, %arg2: i32) -> (i32, i32) {
    %c0_i32 = arith.constant 0 : i32
    return %arg0, %arg1 : i32, i32
  }
}

module attributes {stable_mosaic.version = 11 : i64} {
  func.func @_linear_kernel(%arg0: i32, %arg1: i32, %arg2: i32, %arg3: memref<10x256xbf16, #tpu.memory_space<vmem>>, %arg4: memref<256x64xbf16, #tpu.memory_space<vmem>>, %arg5: memref<1x64xf32, #tpu.memory_space<vmem>>, %arg6: memref<10x64xf32, #tpu.memory_space<vmem>>, %arg7: memref<10x64xf32, #tpu.memory_space<vmem>>) attributes {dimension_semantics = [#tpu.dimension_semantics<parallel>, #tpu.dimension_semantics<parallel>, #tpu.dimension_semantics<arbitrary>], iteration_bounds = array<i64: 1, 1, 1>, scalar_prefetch = 0 : i64, scratch_operands = 0 : i64, tpu.core_type = #tpu.core_type<tc>, window_params = [{transform_indices = @transform_0, window_bounds = array<i64: 10, 256>}, {transform_indices = @transform_1, window_bounds = array<i64: 256, 64>}, {transform_indices = @transform_2, window_bounds = array<i64: 1, 64>}, {transform_indices = @transform_3, window_bounds = array<i64: 10, 64>}, {transform_indices = @transform_4, window_bounds = array<i64: 10, 64>}]} {
    %c0 = arith.constant 0 : index
    %c0_0 = arith.constant 0 : index
    %0 = vector.load %arg3[%c0, %c0_0] : memref<10x256xbf16, #tpu.memory_space<vmem>>, vector<10x256xbf16>
    %c0_1 = arith.constant 0 : index
    %c0_2 = arith.constant 0 : index
    %1 = vector.load %arg4[%c0_1, %c0_2] : memref<256x64xbf16, #tpu.memory_space<vmem>>, vector<256x64xbf16>
    %cst = arith.constant dense<0.000000e+00> : vector<10x64xf32>
    %2 = tpu.matmul %0, %1, %cst {dimension_numbers = #tpu.dot_dimension_numbers<[1], [0], [0], [1], [0, 0, 1, 1], [], []>} : vector<10x256xbf16>, vector<256x64xbf16>, vector<10x64xf32> -> vector<10x64xf32>
    %c0_3 = arith.constant 0 : index
    %c0_4 = arith.constant 0 : index
    %3 = vector.load %arg5[%c0_3, %c0_4] : memref<1x64xf32, #tpu.memory_space<vmem>>, vector<1x64xf32>
    %4 = vector.broadcast %3 : vector<1x64xf32> to vector<10x64xf32>
    %5 = arith.addf %2, %4 : vector<10x64xf32>
    %c0_5 = arith.constant 0 : index
    %c0_6 = arith.constant 0 : index
    %6 = vector.load %arg6[%c0_5, %c0_6] : memref<10x64xf32, #tpu.memory_space<vmem>>, vector<10x64xf32>
    %7 = arith.addf %5, %6 : vector<10x64xf32>
    %c0_7 = arith.constant 0 : index
    %c0_8 = arith.constant 0 : index
    %8 = vector.load %arg7[%c0_7, %c0_8] : memref<10x64xf32, #tpu.memory_space<vmem>>, vector<10x64xf32>
    tpu.vector_store %arg7[%c0_7, %c0_8], %7 {strides = array<i32>} : memref<10x64xf32, #tpu.memory_space<vmem>>, vector<10x64xf32>,
    return
  }
  func.func @transform_0(%arg0: i32, %arg1: i32, %arg2: i32) -> (i32, i32) {
    %c0_i32 = arith.constant 0 : i32
    return %arg0, %arg2 : i32, i32
  }
  func.func @transform_1(%arg0: i32, %arg1: i32, %arg2: i32) -> (i32, i32) {
    %c0_i32 = arith.constant 0 : i32
    return %arg2, %arg1 : i32, i32
  }
  func.func @transform_2(%arg0: i32, %arg1: i32, %arg2: i32) -> (i32, i32) {
    %c0_i32 = arith.constant 0 : i32
    %c0_i32_0 = arith.constant 0 : i32
    return %c0_i32, %arg1 : i32, i32
  }
  func.func @transform_3(%arg0: i32, %arg1: i32, %arg2: i32) -> (i32, i32) {
    %c0_i32 = arith.constant 0 : i32
    return %arg0, %arg1 : i32, i32
  }
  func.func @transform_4(%arg0: i32, %arg1: i32, %arg2: i32) -> (i32, i32) {
    %c0_i32 = arith.constant 0 : i32
    return %arg0, %arg1 : i32, i32
  }
}

module attributes {stable_mosaic.version = 11 : i64} {
  func.func @_linear_kernel(%arg0: i32, %arg1: i32, %arg2: i32, %arg3: memref<2x64xf32, #tpu.memory_space<vmem>>, %arg4: memref<64x64xbf16, #tpu.memory_space<vmem>>, %arg5: memref<1x64xf32, #tpu.memory_space<vmem>>, %arg6: memref<1x64xf32, #tpu.memory_space<vmem>>, %arg7: memref<2x64xf32, #tpu.memory_space<vmem>>) attributes {dimension_semantics = [#tpu.dimension_semantics<parallel>, #tpu.dimension_semantics<parallel>, #tpu.dimension_semantics<arbitrary>], iteration_bounds = array<i64: 1, 1, 1>, scalar_prefetch = 0 : i64, scratch_operands = 0 : i64, tpu.core_type = #tpu.core_type<tc>, window_params = [{transform_indices = @transform_0, window_bounds = array<i64: 2, 64>}, {transform_indices = @transform_1, window_bounds = array<i64: 64, 64>}, {pipeline_mode = #tpu.pipeline_mode<synchronous>, transform_indices = @transform_2, window_bounds = array<i64: 1, 64>}, {pipeline_mode = #tpu.pipeline_mode<synchronous>, transform_indices = @transform_3, window_bounds = array<i64: 1, 64>}, {transform_indices = @transform_4, window_bounds = array<i64: 2, 64>}]} {
    %c0 = arith.constant 0 : index
    %c0_0 = arith.constant 0 : index
    %0 = vector.load %arg3[%c0, %c0_0] : memref<2x64xf32, #tpu.memory_space<vmem>>, vector<2x64xf32>
    %cst = arith.constant dense<0.000000e+00> : vector<2xf32>
    %1 = vector.multi_reduction <add>, %0, %cst [1] : vector<2x64xf32> to vector<2xf32>
    %2 = vector.shape_cast %1 : vector<2xf32> to vector<2x1xf32>
    %cst_1 = arith.constant 6.400000e+01 : f32
    %3 = vector.broadcast %cst_1 : f32 to vector<2x1xf32>
    %4 = arith.divf %2, %3 : vector<2x1xf32>
    %5 = vector.broadcast %4 : vector<2x1xf32> to vector<2x64xf32>
    %6 = arith.subf %0, %5 : vector<2x64xf32>
    %7 = arith.mulf %6, %6 : vector<2x64xf32>
    %cst_2 = arith.constant dense<0.000000e+00> : vector<2xf32>
    %8 = vector.multi_reduction <add>, %7, %cst_2 [1] : vector<2x64xf32> to vector<2xf32>
    %9 = vector.shape_cast %8 : vector<2xf32> to vector<2x1xf32>
    %cst_3 = arith.constant 6.400000e+01 : f32
    %10 = vector.broadcast %cst_3 : f32 to vector<2x1xf32>
    %11 = arith.divf %9, %10 : vector<2x1xf32>
    %12 = vector.broadcast %4 : vector<2x1xf32> to vector<2x64xf32>
    %13 = arith.subf %0, %12 : vector<2x64xf32>
    %cst_4 = arith.constant 9.99999974E-6 : f32
    %14 = vector.broadcast %cst_4 : f32 to vector<2x1xf32>
    %15 = arith.addf %11, %14 : vector<2x1xf32>
    %16 = math.rsqrt %15 : vector<2x1xf32>
    %17 = vector.broadcast %16 : vector<2x1xf32> to vector<2x64xf32>
    %18 = arith.mulf %13, %17 : vector<2x64xf32>
    %c0_5 = arith.constant 0 : index
    %c0_6 = arith.constant 0 : index
    %19 = vector.load %arg5[%c0_5, %c0_6] : memref<1x64xf32, #tpu.memory_space<vmem>>, vector<1x64xf32>
    %20 = vector.broadcast %19 : vector<1x64xf32> to vector<2x64xf32>
    %21 = arith.mulf %18, %20 : vector<2x64xf32>
    %c0_7 = arith.constant 0 : index
    %c0_8 = arith.constant 0 : index
    %22 = vector.load %arg6[%c0_7, %c0_8] : memref<1x64xf32, #tpu.memory_space<vmem>>, vector<1x64xf32>
    %23 = vector.broadcast %22 : vector<1x64xf32> to vector<2x64xf32>
    %24 = arith.addf %21, %23 : vector<2x64xf32>
    %25 = arith.truncf %24 : vector<2x64xf32> to vector<2x64xbf16>
    %c0_9 = arith.constant 0 : index
    %c0_10 = arith.constant 0 : index
    %26 = vector.load %arg4[%c0_9, %c0_10] : memref<64x64xbf16, #tpu.memory_space<vmem>>, vector<64x64xbf16>
    %cst_11 = arith.constant dense<0.000000e+00> : vector<2x64xf32>
    %27 = tpu.matmul %25, %26, %cst_11 {dimension_numbers = #tpu.dot_dimension_numbers<[1], [0], [0], [1], [0, 0, 1, 1], [], []>} : vector<2x64xbf16>, vector<64x64xbf16>, vector<2x64xf32> -> vector<2x64xf32>
    %c0_12 = arith.constant 0 : index
    %c0_13 = arith.constant 0 : index
    %28 = vector.load %arg7[%c0_12, %c0_13] : memref<2x64xf32, #tpu.memory_space<vmem>>, vector<2x64xf32>
    tpu.vector_store %arg7[%c0_12, %c0_13], %27 {strides = array<i32>} : memref<2x64xf32, #tpu.memory_space<vmem>>, vector<2x64xf32>,
    return
  }
  func.func @transform_0(%arg0: i32, %arg1: i32, %arg2: i32) -> (i32, i32) {
    %c0_i32 = arith.constant 0 : i32
    return %arg0, %arg2 : i32, i32
  }
  func.func @transform_1(%arg0: i32, %arg1: i32, %arg2: i32) -> (i32, i32) {
    %c0_i32 = arith.constant 0 : i32
    return %arg2, %arg1 : i32, i32
  }
  func.func @transform_2(%arg0: i32, %arg1: i32, %arg2: i32) -> (i32, i32) {
    %c0_i32 = arith.constant 0 : i32
    %c0_i32_0 = arith.constant 0 : i32
    %c0_i32_1 = arith.constant 0 : i32
    return %c0_i32, %c0_i32_0 : i32, i32
  }
  func.func @transform_3(%arg0: i32, %arg1: i32, %arg2: i32) -> (i32, i32) {
    %c0_i32 = arith.constant 0 : i32
    %c0_i32_0 = arith.constant 0 : i32
    %c0_i32_1 = arith.constant 0 : i32
    return %c0_i32, %c0_i32_0 : i32, i32
  }
  func.func @transform_4(%arg0: i32, %arg1: i32, %arg2: i32) -> (i32, i32) {
    %c0_i32 = arith.constant 0 : i32
    return %arg0, %arg1 : i32, i32
  }
}

module attributes {stable_mosaic.version = 11 : i64} {
  func.func @_attn_kernel(%arg0: i32, %arg1: memref<1x16x192xbf16, #tpu.memory_space<vmem>>, %arg2: memref<64x64xbf16, #tpu.memory_space<vmem>>, %arg3: memref<1x64xf32, #tpu.memory_space<vmem>>, %arg4: memref<1x16x64xf32, #tpu.memory_space<vmem>>, %arg5: memref<1x16x64xf32, #tpu.memory_space<vmem>>) attributes {dimension_semantics = [#tpu.dimension_semantics<parallel>], iteration_bounds = array<i64: 3>, scalar_prefetch = 0 : i64, scratch_operands = 0 : i64, tpu.core_type = #tpu.core_type<tc>, window_params = [{transform_indices = @transform_0, window_bounds = array<i64: 1, 16, 192>}, {pipeline_mode = #tpu.pipeline_mode<synchronous>, transform_indices = @transform_1, window_bounds = array<i64: 64, 64>}, {pipeline_mode = #tpu.pipeline_mode<synchronous>, transform_indices = @transform_2, window_bounds = array<i64: 1, 64>}, {transform_indices = @transform_3, window_bounds = array<i64: 1, 16, 64>}, {transform_indices = @transform_4, window_bounds = array<i64: 1, 16, 64>}]} {
    %c0 = arith.constant 0 : index
    %c0_0 = arith.constant 0 : index
    %c0_1 = arith.constant 0 : index
    %0 = vector.load %arg1[%c0, %c0_0, %c0_1] : memref<1x16x192xbf16, #tpu.memory_space<vmem>>, vector<1x16x192xbf16>
    %1 = vector.shape_cast %0 : vector<1x16x192xbf16> to vector<16x192xbf16>
    %2 = tpu.iota {dimensions = array<i32: 0>} : vector<16x16xi32>
    %3 = tpu.iota {dimensions = array<i32: 1>} : vector<16x16xi32>
    %4 = arith.cmpi sle, %3, %2 : vector<16x16xi32>
    %c0_2 = arith.constant 0 : index
    %c0_3 = arith.constant 0 : index
    %c0_4 = arith.constant 0 : index
    %5 = vector.load %arg4[%c0_2, %c0_3, %c0_4] : memref<1x16x64xf32, #tpu.memory_space<vmem>>, vector<1x16x64xf32>
    %6 = vector.shape_cast %5 : vector<1x16x64xf32> to vector<16x64xf32>
    %c0_5 = arith.constant 0 : index
    %c0_6 = arith.constant 0 : index
    %7 = vector.load %arg3[%c0_5, %c0_6] : memref<1x64xf32, #tpu.memory_space<vmem>>, vector<1x64xf32>
    %8 = vector.broadcast %7 : vector<1x64xf32> to vector<16x64xf32>
    %9 = arith.addf %6, %8 : vector<16x64xf32>
    %10 = vector.extract_strided_slice %1 {offsets = [0, 0], sizes = [16, 32], strides = [1, 1]} : vector<16x192xbf16> to vector<16x32xbf16>
    %11 = vector.extract_strided_slice %1 {offsets = [0, 64], sizes = [16, 32], strides = [1, 1]} : vector<16x192xbf16> to vector<16x32xbf16>
    %12 = vector.extract_strided_slice %1 {offsets = [0, 128], sizes = [16, 32], strides = [1, 1]} : vector<16x192xbf16> to vector<16x32xbf16>
    %cst = arith.constant dense<0.000000e+00> : vector<16x16xf32>
    %13 = tpu.matmul %10, %11, %cst {dimension_numbers = #tpu.dot_dimension_numbers<[1], [1], [0], [0], [0, 0, 1, 0], [], []>} : vector<16x32xbf16>, vector<16x32xbf16>, vector<16x16xf32> -> vector<16x16xf32>
    %cst_7 = arith.constant 0.176776692 : f32
    %14 = vector.broadcast %cst_7 : f32 to vector<16x16xf32>
    %15 = arith.mulf %13, %14 : vector<16x16xf32>
    %cst_8 = arith.constant -1.000000e+30 : f32
    %16 = vector.broadcast %cst_8 : f32 to vector<16x16xf32>
    %17 = arith.select %4, %15, %16 : vector<16x16xi1>, vector<16x16xf32>
    %cst_9 = arith.constant dense<0xFF800000> : vector<16xf32>
    %18 = vector.multi_reduction <maximumf>, %17, %cst_9 [1] : vector<16x16xf32> to vector<16xf32>
    %19 = vector.shape_cast %18 : vector<16xf32> to vector<16x1xf32>
    %20 = vector.broadcast %19 : vector<16x1xf32> to vector<16x16xf32>
    %21 = arith.subf %17, %20 : vector<16x16xf32>
    %22 = math.exp %21 : vector<16x16xf32>
    %cst_10 = arith.constant dense<0.000000e+00> : vector<16xf32>
    %23 = vector.multi_reduction <add>, %22, %cst_10 [1] : vector<16x16xf32> to vector<16xf32>
    %24 = vector.shape_cast %23 : vector<16xf32> to vector<16x1xf32>
    %25 = tpu.reciprocal %24 {approx = true} : vector<16x1xf32> -> vector<16x1xf32>
    %26 = vector.broadcast %25 : vector<16x1xf32> to vector<16x16xf32>
    %27 = arith.mulf %22, %26 : vector<16x16xf32>
    %28 = arith.truncf %27 : vector<16x16xf32> to vector<16x16xbf16>
    %cst_11 = arith.constant dense<0.000000e+00> : vector<16x32xf32>
    %29 = tpu.matmul %28, %12, %cst_11 {dimension_numbers = #tpu.dot_dimension_numbers<[1], [0], [0], [1], [0, 0, 1, 1], [], []>} : vector<16x16xbf16>, vector<16x32xbf16>, vector<16x32xf32> -> vector<16x32xf32>
    %30 = arith.truncf %29 : vector<16x32xf32> to vector<16x32xbf16>
    %c0_12 = arith.constant 0 : index
    %c0_13 = arith.constant 0 : index
    %31 = vector.load %arg2[%c0_12, %c0_13] : memref<64x64xbf16, #tpu.memory_space<vmem>>, vector<32x64xbf16>
    %cst_14 = arith.constant dense<0.000000e+00> : vector<16x64xf32>
    %32 = tpu.matmul %30, %31, %cst_14 {dimension_numbers = #tpu.dot_dimension_numbers<[1], [0], [0], [1], [0, 0, 1, 1], [], []>} : vector<16x32xbf16>, vector<32x64xbf16>, vector<16x64xf32> -> vector<16x64xf32>
    %33 = arith.addf %9, %32 : vector<16x64xf32>
    %34 = vector.extract_strided_slice %1 {offsets = [0, 32], sizes = [16, 32], strides = [1, 1]} : vector<16x192xbf16> to vector<16x32xbf16>
    %35 = vector.extract_strided_slice %1 {offsets = [0, 96], sizes = [16, 32], strides = [1, 1]} : vector<16x192xbf16> to vector<16x32xbf16>
    %36 = vector.extract_strided_slice %1 {offsets = [0, 160], sizes = [16, 32], strides = [1, 1]} : vector<16x192xbf16> to vector<16x32xbf16>
    %cst_15 = arith.constant dense<0.000000e+00> : vector<16x16xf32>
    %37 = tpu.matmul %34, %35, %cst_15 {dimension_numbers = #tpu.dot_dimension_numbers<[1], [1], [0], [0], [0, 0, 1, 0], [], []>} : vector<16x32xbf16>, vector<16x32xbf16>, vector<16x16xf32> -> vector<16x16xf32>
    %cst_16 = arith.constant 0.176776692 : f32
    %38 = vector.broadcast %cst_16 : f32 to vector<16x16xf32>
    %39 = arith.mulf %37, %38 : vector<16x16xf32>
    %cst_17 = arith.constant -1.000000e+30 : f32
    %40 = vector.broadcast %cst_17 : f32 to vector<16x16xf32>
    %41 = arith.select %4, %39, %40 : vector<16x16xi1>, vector<16x16xf32>
    %cst_18 = arith.constant dense<0xFF800000> : vector<16xf32>
    %42 = vector.multi_reduction <maximumf>, %41, %cst_18 [1] : vector<16x16xf32> to vector<16xf32>
    %43 = vector.shape_cast %42 : vector<16xf32> to vector<16x1xf32>
    %44 = vector.broadcast %43 : vector<16x1xf32> to vector<16x16xf32>
    %45 = arith.subf %41, %44 : vector<16x16xf32>
    %46 = math.exp %45 : vector<16x16xf32>
    %cst_19 = arith.constant dense<0.000000e+00> : vector<16xf32>
    %47 = vector.multi_reduction <add>, %46, %cst_19 [1] : vector<16x16xf32> to vector<16xf32>
    %48 = vector.shape_cast %47 : vector<16xf32> to vector<16x1xf32>
    %49 = tpu.reciprocal %48 {approx = true} : vector<16x1xf32> -> vector<16x1xf32>
    %50 = vector.broadcast %49 : vector<16x1xf32> to vector<16x16xf32>
    %51 = arith.mulf %46, %50 : vector<16x16xf32>
    %52 = arith.truncf %51 : vector<16x16xf32> to vector<16x16xbf16>
    %cst_20 = arith.constant dense<0.000000e+00> : vector<16x32xf32>
    %53 = tpu.matmul %52, %36, %cst_20 {dimension_numbers = #tpu.dot_dimension_numbers<[1], [0], [0], [1], [0, 0, 1, 1], [], []>} : vector<16x16xbf16>, vector<16x32xbf16>, vector<16x32xf32> -> vector<16x32xf32>
    %54 = arith.truncf %53 : vector<16x32xf32> to vector<16x32xbf16>
    %c32 = arith.constant 32 : index
    %c0_21 = arith.constant 0 : index
    %55 = vector.load %arg2[%c32, %c0_21] : memref<64x64xbf16, #tpu.memory_space<vmem>>, vector<32x64xbf16>
    %cst_22 = arith.constant dense<0.000000e+00> : vector<16x64xf32>
    %56 = tpu.matmul %54, %55, %cst_22 {dimension_numbers = #tpu.dot_dimension_numbers<[1], [0], [0], [1], [0, 0, 1, 1], [], []>} : vector<16x32xbf16>, vector<32x64xbf16>, vector<16x64xf32> -> vector<16x64xf32>
    %57 = arith.addf %33, %56 : vector<16x64xf32>
    %c0_23 = arith.constant 0 : index
    %c0_24 = arith.constant 0 : index
    %c0_25 = arith.constant 0 : index
    %58 = vector.load %arg5[%c0_23, %c0_24, %c0_25] : memref<1x16x64xf32, #tpu.memory_space<vmem>>, vector<1x16x64xf32>
    %59 = vector.shape_cast %58 : vector<1x16x64xf32> to vector<16x64xf32>
    %60 = vector.shape_cast %57 : vector<16x64xf32> to vector<1x16x64xf32>
    tpu.vector_store %arg5[%c0_23, %c0_24, %c0_25], %60 {strides = array<i32>} : memref<1x16x64xf32, #tpu.memory_space<vmem>>, vector<1x16x64xf32>,
    return
  }
  func.func @transform_0(%arg0: i32) -> (i32, i32, i32) {
    %c0_i32 = arith.constant 0 : i32
    %c0_i32_0 = arith.constant 0 : i32
    %c0_i32_1 = arith.constant 0 : i32
    return %arg0, %c0_i32, %c0_i32_0 : i32, i32, i32
  }
  func.func @transform_1(%arg0: i32) -> (i32, i32) {
    %c0_i32 = arith.constant 0 : i32
    %c0_i32_0 = arith.constant 0 : i32
    %c0_i32_1 = arith.constant 0 : i32
    return %c0_i32, %c0_i32_0 : i32, i32
  }
  func.func @transform_2(%arg0: i32) -> (i32, i32) {
    %c0_i32 = arith.constant 0 : i32
    %c0_i32_0 = arith.constant 0 : i32
    %c0_i32_1 = arith.constant 0 : i32
    return %c0_i32, %c0_i32_0 : i32, i32
  }
  func.func @transform_3(%arg0: i32) -> (i32, i32, i32) {
    %c0_i32 = arith.constant 0 : i32
    %c0_i32_0 = arith.constant 0 : i32
    %c0_i32_1 = arith.constant 0 : i32
    return %arg0, %c0_i32, %c0_i32_0 : i32, i32, i32
  }
  func.func @transform_4(%arg0: i32) -> (i32, i32, i32) {
    %c0_i32 = arith.constant 0 : i32
    %c0_i32_0 = arith.constant 0 : i32
    %c0_i32_1 = arith.constant 0 : i32
    return %arg0, %c0_i32, %c0_i32_0 : i32, i32, i32
  }
}

module attributes {stable_mosaic.version = 11 : i64} {
  func.func @_linear_kernel(%arg0: i32, %arg1: i32, %arg2: i32, %arg3: memref<48x64xf32, #tpu.memory_space<vmem>>, %arg4: memref<64x192xbf16, #tpu.memory_space<vmem>>, %arg5: memref<1x64xf32, #tpu.memory_space<vmem>>, %arg6: memref<1x64xf32, #tpu.memory_space<vmem>>, %arg7: memref<1x192xf32, #tpu.memory_space<vmem>>, %arg8: memref<48x192xbf16, #tpu.memory_space<vmem>>) attributes {dimension_semantics = [#tpu.dimension_semantics<parallel>, #tpu.dimension_semantics<parallel>, #tpu.dimension_semantics<arbitrary>], iteration_bounds = array<i64: 1, 1, 1>, scalar_prefetch = 0 : i64, scratch_operands = 0 : i64, tpu.core_type = #tpu.core_type<tc>, window_params = [{transform_indices = @transform_0, window_bounds = array<i64: 48, 64>}, {transform_indices = @transform_1, window_bounds = array<i64: 64, 192>}, {pipeline_mode = #tpu.pipeline_mode<synchronous>, transform_indices = @transform_2, window_bounds = array<i64: 1, 64>}, {pipeline_mode = #tpu.pipeline_mode<synchronous>, transform_indices = @transform_3, window_bounds = array<i64: 1, 64>}, {transform_indices = @transform_4, window_bounds = array<i64: 1, 192>}, {transform_indices = @transform_5, window_bounds = array<i64: 48, 192>}]} {
    %c0 = arith.constant 0 : index
    %c0_0 = arith.constant 0 : index
    %0 = vector.load %arg3[%c0, %c0_0] : memref<48x64xf32, #tpu.memory_space<vmem>>, vector<48x64xf32>
    %cst = arith.constant dense<0.000000e+00> : vector<48xf32>
    %1 = vector.multi_reduction <add>, %0, %cst [1] : vector<48x64xf32> to vector<48xf32>
    %2 = vector.shape_cast %1 : vector<48xf32> to vector<48x1xf32>
    %cst_1 = arith.constant 6.400000e+01 : f32
    %3 = vector.broadcast %cst_1 : f32 to vector<48x1xf32>
    %4 = arith.divf %2, %3 : vector<48x1xf32>
    %5 = vector.broadcast %4 : vector<48x1xf32> to vector<48x64xf32>
    %6 = arith.subf %0, %5 : vector<48x64xf32>
    %7 = arith.mulf %6, %6 : vector<48x64xf32>
    %cst_2 = arith.constant dense<0.000000e+00> : vector<48xf32>
    %8 = vector.multi_reduction <add>, %7, %cst_2 [1] : vector<48x64xf32> to vector<48xf32>
    %9 = vector.shape_cast %8 : vector<48xf32> to vector<48x1xf32>
    %cst_3 = arith.constant 6.400000e+01 : f32
    %10 = vector.broadcast %cst_3 : f32 to vector<48x1xf32>
    %11 = arith.divf %9, %10 : vector<48x1xf32>
    %12 = vector.broadcast %4 : vector<48x1xf32> to vector<48x64xf32>
    %13 = arith.subf %0, %12 : vector<48x64xf32>
    %cst_4 = arith.constant 9.99999974E-6 : f32
    %14 = vector.broadcast %cst_4 : f32 to vector<48x1xf32>
    %15 = arith.addf %11, %14 : vector<48x1xf32>
    %16 = math.rsqrt %15 : vector<48x1xf32>
    %17 = vector.broadcast %16 : vector<48x1xf32> to vector<48x64xf32>
    %18 = arith.mulf %13, %17 : vector<48x64xf32>
    %c0_5 = arith.constant 0 : index
    %c0_6 = arith.constant 0 : index
    %19 = vector.load %arg5[%c0_5, %c0_6] : memref<1x64xf32, #tpu.memory_space<vmem>>, vector<1x64xf32>
    %20 = vector.broadcast %19 : vector<1x64xf32> to vector<48x64xf32>
    %21 = arith.mulf %18, %20 : vector<48x64xf32>
    %c0_7 = arith.constant 0 : index
    %c0_8 = arith.constant 0 : index
    %22 = vector.load %arg6[%c0_7, %c0_8] : memref<1x64xf32, #tpu.memory_space<vmem>>, vector<1x64xf32>
    %23 = vector.broadcast %22 : vector<1x64xf32> to vector<48x64xf32>
    %24 = arith.addf %21, %23 : vector<48x64xf32>
    %25 = arith.truncf %24 : vector<48x64xf32> to vector<48x64xbf16>
    %c0_9 = arith.constant 0 : index
    %c0_10 = arith.constant 0 : index
    %26 = vector.load %arg4[%c0_9, %c0_10] : memref<64x192xbf16, #tpu.memory_space<vmem>>, vector<64x192xbf16>
    %cst_11 = arith.constant dense<0.000000e+00> : vector<48x192xf32>
    %27 = tpu.matmul %25, %26, %cst_11 {dimension_numbers = #tpu.dot_dimension_numbers<[1], [0], [0], [1], [0, 0, 1, 1], [], []>} : vector<48x64xbf16>, vector<64x192xbf16>, vector<48x192xf32> -> vector<48x192xf32>
    %c0_12 = arith.constant 0 : index
    %c0_13 = arith.constant 0 : index
    %28 = vector.load %arg7[%c0_12, %c0_13] : memref<1x192xf32, #tpu.memory_space<vmem>>, vector<1x192xf32>
    %29 = vector.broadcast %28 : vector<1x192xf32> to vector<48x192xf32>
    %30 = arith.addf %27, %29 : vector<48x192xf32>
    %31 = arith.truncf %30 : vector<48x192xf32> to vector<48x192xbf16>
    %c0_14 = arith.constant 0 : index
    %c0_15 = arith.constant 0 : index
    %32 = vector.load %arg8[%c0_14, %c0_15] : memref<48x192xbf16, #tpu.memory_space<vmem>>, vector<48x192xbf16>
    tpu.vector_store %arg8[%c0_14, %c0_15], %31 {strides = array<i32>} : memref<48x192xbf16, #tpu.memory_space<vmem>>, vector<48x192xbf16>,
    return
  }
  func.func @transform_0(%arg0: i32, %arg1: i32, %arg2: i32) -> (i32, i32) {
    %c0_i32 = arith.constant 0 : i32
    return %arg0, %arg2 : i32, i32
  }
  func.func @transform_1(%arg0: i32, %arg1: i32, %arg2: i32) -> (i32, i32) {
    %c0_i32 = arith.constant 0 : i32
    return %arg2, %arg1 : i32, i32
  }
  func.func @transform_2(%arg0: i32, %arg1: i32, %arg2: i32) -> (i32, i32) {
    %c0_i32 = arith.constant 0 : i32
    %c0_i32_0 = arith.constant 0 : i32
    %c0_i32_1 = arith.constant 0 : i32
    return %c0_i32, %c0_i32_0 : i32, i32
  }
  func.func @transform_3(%arg0: i32, %arg1: i32, %arg2: i32) -> (i32, i32) {
    %c0_i32 = arith.constant 0 : i32
    %c0_i32_0 = arith.constant 0 : i32
    %c0_i32_1 = arith.constant 0 : i32
    return %c0_i32, %c0_i32_0 : i32, i32
  }
  func.func @transform_4(%arg0: i32, %arg1: i32, %arg2: i32) -> (i32, i32) {
    %c0_i32 = arith.constant 0 : i32
    %c0_i32_0 = arith.constant 0 : i32
    return %c0_i32, %arg1 : i32, i32
  }
  func.func @transform_5(%arg0: i32, %arg1: i32, %arg2: i32) -> (i32, i32) {
    %c0_i32 = arith.constant 0 : i32
    return %arg0, %arg1 : i32, i32
  }
}

module attributes {stable_mosaic.version = 11 : i64} {
  func.func @_linear_kernel(%arg0: i32, %arg1: i32, %arg2: i32, %arg3: memref<48x64xf32, #tpu.memory_space<vmem>>, %arg4: memref<64x256xbf16, #tpu.memory_space<vmem>>, %arg5: memref<1x64xf32, #tpu.memory_space<vmem>>, %arg6: memref<1x64xf32, #tpu.memory_space<vmem>>, %arg7: memref<1x256xf32, #tpu.memory_space<vmem>>, %arg8: memref<48x256xbf16, #tpu.memory_space<vmem>>) attributes {dimension_semantics = [#tpu.dimension_semantics<parallel>, #tpu.dimension_semantics<parallel>, #tpu.dimension_semantics<arbitrary>], iteration_bounds = array<i64: 1, 1, 1>, scalar_prefetch = 0 : i64, scratch_operands = 0 : i64, tpu.core_type = #tpu.core_type<tc>, window_params = [{transform_indices = @transform_0, window_bounds = array<i64: 48, 64>}, {transform_indices = @transform_1, window_bounds = array<i64: 64, 256>}, {pipeline_mode = #tpu.pipeline_mode<synchronous>, transform_indices = @transform_2, window_bounds = array<i64: 1, 64>}, {pipeline_mode = #tpu.pipeline_mode<synchronous>, transform_indices = @transform_3, window_bounds = array<i64: 1, 64>}, {transform_indices = @transform_4, window_bounds = array<i64: 1, 256>}, {transform_indices = @transform_5, window_bounds = array<i64: 48, 256>}]} {
    %c0 = arith.constant 0 : index
    %c0_0 = arith.constant 0 : index
    %0 = vector.load %arg3[%c0, %c0_0] : memref<48x64xf32, #tpu.memory_space<vmem>>, vector<48x64xf32>
    %cst = arith.constant dense<0.000000e+00> : vector<48xf32>
    %1 = vector.multi_reduction <add>, %0, %cst [1] : vector<48x64xf32> to vector<48xf32>
    %2 = vector.shape_cast %1 : vector<48xf32> to vector<48x1xf32>
    %cst_1 = arith.constant 6.400000e+01 : f32
    %3 = vector.broadcast %cst_1 : f32 to vector<48x1xf32>
    %4 = arith.divf %2, %3 : vector<48x1xf32>
    %5 = vector.broadcast %4 : vector<48x1xf32> to vector<48x64xf32>
    %6 = arith.subf %0, %5 : vector<48x64xf32>
    %7 = arith.mulf %6, %6 : vector<48x64xf32>
    %cst_2 = arith.constant dense<0.000000e+00> : vector<48xf32>
    %8 = vector.multi_reduction <add>, %7, %cst_2 [1] : vector<48x64xf32> to vector<48xf32>
    %9 = vector.shape_cast %8 : vector<48xf32> to vector<48x1xf32>
    %cst_3 = arith.constant 6.400000e+01 : f32
    %10 = vector.broadcast %cst_3 : f32 to vector<48x1xf32>
    %11 = arith.divf %9, %10 : vector<48x1xf32>
    %12 = vector.broadcast %4 : vector<48x1xf32> to vector<48x64xf32>
    %13 = arith.subf %0, %12 : vector<48x64xf32>
    %cst_4 = arith.constant 9.99999974E-6 : f32
    %14 = vector.broadcast %cst_4 : f32 to vector<48x1xf32>
    %15 = arith.addf %11, %14 : vector<48x1xf32>
    %16 = math.rsqrt %15 : vector<48x1xf32>
    %17 = vector.broadcast %16 : vector<48x1xf32> to vector<48x64xf32>
    %18 = arith.mulf %13, %17 : vector<48x64xf32>
    %c0_5 = arith.constant 0 : index
    %c0_6 = arith.constant 0 : index
    %19 = vector.load %arg5[%c0_5, %c0_6] : memref<1x64xf32, #tpu.memory_space<vmem>>, vector<1x64xf32>
    %20 = vector.broadcast %19 : vector<1x64xf32> to vector<48x64xf32>
    %21 = arith.mulf %18, %20 : vector<48x64xf32>
    %c0_7 = arith.constant 0 : index
    %c0_8 = arith.constant 0 : index
    %22 = vector.load %arg6[%c0_7, %c0_8] : memref<1x64xf32, #tpu.memory_space<vmem>>, vector<1x64xf32>
    %23 = vector.broadcast %22 : vector<1x64xf32> to vector<48x64xf32>
    %24 = arith.addf %21, %23 : vector<48x64xf32>
    %25 = arith.truncf %24 : vector<48x64xf32> to vector<48x64xbf16>
    %c0_9 = arith.constant 0 : index
    %c0_10 = arith.constant 0 : index
    %26 = vector.load %arg4[%c0_9, %c0_10] : memref<64x256xbf16, #tpu.memory_space<vmem>>, vector<64x256xbf16>
    %cst_11 = arith.constant dense<0.000000e+00> : vector<48x256xf32>
    %27 = tpu.matmul %25, %26, %cst_11 {dimension_numbers = #tpu.dot_dimension_numbers<[1], [0], [0], [1], [0, 0, 1, 1], [], []>} : vector<48x64xbf16>, vector<64x256xbf16>, vector<48x256xf32> -> vector<48x256xf32>
    %c0_12 = arith.constant 0 : index
    %c0_13 = arith.constant 0 : index
    %28 = vector.load %arg7[%c0_12, %c0_13] : memref<1x256xf32, #tpu.memory_space<vmem>>, vector<1x256xf32>
    %29 = vector.broadcast %28 : vector<1x256xf32> to vector<48x256xf32>
    %30 = arith.addf %27, %29 : vector<48x256xf32>
    %cst_14 = arith.constant 1.702000e+00 : f32
    %31 = vector.broadcast %cst_14 : f32 to vector<48x256xf32>
    %32 = arith.mulf %31, %30 : vector<48x256xf32>
    %33 = arith.negf %32 : vector<48x256xf32>
    %34 = math.exp %33 : vector<48x256xf32>
    %cst_15 = arith.constant 1.000000e+00 : f32
    %35 = vector.broadcast %cst_15 : f32 to vector<48x256xf32>
    %36 = arith.addf %35, %34 : vector<48x256xf32>
    %37 = arith.divf %35, %36 : vector<48x256xf32>
    %38 = arith.mulf %30, %37 : vector<48x256xf32>
    %39 = arith.truncf %38 : vector<48x256xf32> to vector<48x256xbf16>
    %c0_16 = arith.constant 0 : index
    %c0_17 = arith.constant 0 : index
    %40 = vector.load %arg8[%c0_16, %c0_17] : memref<48x256xbf16, #tpu.memory_space<vmem>>, vector<48x256xbf16>
    tpu.vector_store %arg8[%c0_16, %c0_17], %39 {strides = array<i32>} : memref<48x256xbf16, #tpu.memory_space<vmem>>, vector<48x256xbf16>,
    return
  }
  func.func @transform_0(%arg0: i32, %arg1: i32, %arg2: i32) -> (i32, i32) {
    %c0_i32 = arith.constant 0 : i32
    return %arg0, %arg2 : i32, i32
  }
  func.func @transform_1(%arg0: i32, %arg1: i32, %arg2: i32) -> (i32, i32) {
    %c0_i32 = arith.constant 0 : i32
    return %arg2, %arg1 : i32, i32
  }
  func.func @transform_2(%arg0: i32, %arg1: i32, %arg2: i32) -> (i32, i32) {
    %c0_i32 = arith.constant 0 : i32
    %c0_i32_0 = arith.constant 0 : i32
    %c0_i32_1 = arith.constant 0 : i32
    return %c0_i32, %c0_i32_0 : i32, i32
  }
  func.func @transform_3(%arg0: i32, %arg1: i32, %arg2: i32) -> (i32, i32) {
    %c0_i32 = arith.constant 0 : i32
    %c0_i32_0 = arith.constant 0 : i32
    %c0_i32_1 = arith.constant 0 : i32
    return %c0_i32, %c0_i32_0 : i32, i32
  }
  func.func @transform_4(%arg0: i32, %arg1: i32, %arg2: i32) -> (i32, i32) {
    %c0_i32 = arith.constant 0 : i32
    %c0_i32_0 = arith.constant 0 : i32
    return %c0_i32, %arg1 : i32, i32
  }
  func.func @transform_5(%arg0: i32, %arg1: i32, %arg2: i32) -> (i32, i32) {
    %c0_i32 = arith.constant 0 : i32
    return %arg0, %arg1 : i32, i32
  }
}

module attributes {stable_mosaic.version = 11 : i64} {
  func.func @_linear_kernel(%arg0: i32, %arg1: i32, %arg2: i32, %arg3: memref<48x256xbf16, #tpu.memory_space<vmem>>, %arg4: memref<256x64xbf16, #tpu.memory_space<vmem>>, %arg5: memref<1x64xf32, #tpu.memory_space<vmem>>, %arg6: memref<48x64xf32, #tpu.memory_space<vmem>>, %arg7: memref<48x64xf32, #tpu.memory_space<vmem>>) attributes {dimension_semantics = [#tpu.dimension_semantics<parallel>, #tpu.dimension_semantics<parallel>, #tpu.dimension_semantics<arbitrary>], iteration_bounds = array<i64: 1, 1, 1>, scalar_prefetch = 0 : i64, scratch_operands = 0 : i64, tpu.core_type = #tpu.core_type<tc>, window_params = [{transform_indices = @transform_0, window_bounds = array<i64: 48, 256>}, {transform_indices = @transform_1, window_bounds = array<i64: 256, 64>}, {transform_indices = @transform_2, window_bounds = array<i64: 1, 64>}, {transform_indices = @transform_3, window_bounds = array<i64: 48, 64>}, {transform_indices = @transform_4, window_bounds = array<i64: 48, 64>}]} {
    %c0 = arith.constant 0 : index
    %c0_0 = arith.constant 0 : index
    %0 = vector.load %arg3[%c0, %c0_0] : memref<48x256xbf16, #tpu.memory_space<vmem>>, vector<48x256xbf16>
    %c0_1 = arith.constant 0 : index
    %c0_2 = arith.constant 0 : index
    %1 = vector.load %arg4[%c0_1, %c0_2] : memref<256x64xbf16, #tpu.memory_space<vmem>>, vector<256x64xbf16>
    %cst = arith.constant dense<0.000000e+00> : vector<48x64xf32>
    %2 = tpu.matmul %0, %1, %cst {dimension_numbers = #tpu.dot_dimension_numbers<[1], [0], [0], [1], [0, 0, 1, 1], [], []>} : vector<48x256xbf16>, vector<256x64xbf16>, vector<48x64xf32> -> vector<48x64xf32>
    %c0_3 = arith.constant 0 : index
    %c0_4 = arith.constant 0 : index
    %3 = vector.load %arg5[%c0_3, %c0_4] : memref<1x64xf32, #tpu.memory_space<vmem>>, vector<1x64xf32>
    %4 = vector.broadcast %3 : vector<1x64xf32> to vector<48x64xf32>
    %5 = arith.addf %2, %4 : vector<48x64xf32>
    %c0_5 = arith.constant 0 : index
    %c0_6 = arith.constant 0 : index
    %6 = vector.load %arg6[%c0_5, %c0_6] : memref<48x64xf32, #tpu.memory_space<vmem>>, vector<48x64xf32>
    %7 = arith.addf %5, %6 : vector<48x64xf32>
    %c0_7 = arith.constant 0 : index
    %c0_8 = arith.constant 0 : index
    %8 = vector.load %arg7[%c0_7, %c0_8] : memref<48x64xf32, #tpu.memory_space<vmem>>, vector<48x64xf32>
    tpu.vector_store %arg7[%c0_7, %c0_8], %7 {strides = array<i32>} : memref<48x64xf32, #tpu.memory_space<vmem>>, vector<48x64xf32>,
    return
  }
  func.func @transform_0(%arg0: i32, %arg1: i32, %arg2: i32) -> (i32, i32) {
    %c0_i32 = arith.constant 0 : i32
    return %arg0, %arg2 : i32, i32
  }
  func.func @transform_1(%arg0: i32, %arg1: i32, %arg2: i32) -> (i32, i32) {
    %c0_i32 = arith.constant 0 : i32
    return %arg2, %arg1 : i32, i32
  }
  func.func @transform_2(%arg0: i32, %arg1: i32, %arg2: i32) -> (i32, i32) {
    %c0_i32 = arith.constant 0 : i32
    %c0_i32_0 = arith.constant 0 : i32
    return %c0_i32, %arg1 : i32, i32
  }
  func.func @transform_3(%arg0: i32, %arg1: i32, %arg2: i32) -> (i32, i32) {
    %c0_i32 = arith.constant 0 : i32
    return %arg0, %arg1 : i32, i32
  }
  func.func @transform_4(%arg0: i32, %arg1: i32, %arg2: i32) -> (i32, i32) {
    %c0_i32 = arith.constant 0 : i32
    return %arg0, %arg1 : i32, i32
  }
}

module attributes {stable_mosaic.version = 11 : i64} {
  func.func @_linear_kernel(%arg0: i32, %arg1: i32, %arg2: i32, %arg3: memref<3x64xf32, #tpu.memory_space<vmem>>, %arg4: memref<64x64xbf16, #tpu.memory_space<vmem>>, %arg5: memref<1x64xf32, #tpu.memory_space<vmem>>, %arg6: memref<1x64xf32, #tpu.memory_space<vmem>>, %arg7: memref<3x64xf32, #tpu.memory_space<vmem>>) attributes {dimension_semantics = [#tpu.dimension_semantics<parallel>, #tpu.dimension_semantics<parallel>, #tpu.dimension_semantics<arbitrary>], iteration_bounds = array<i64: 1, 1, 1>, scalar_prefetch = 0 : i64, scratch_operands = 0 : i64, tpu.core_type = #tpu.core_type<tc>, window_params = [{transform_indices = @transform_0, window_bounds = array<i64: 3, 64>}, {transform_indices = @transform_1, window_bounds = array<i64: 64, 64>}, {pipeline_mode = #tpu.pipeline_mode<synchronous>, transform_indices = @transform_2, window_bounds = array<i64: 1, 64>}, {pipeline_mode = #tpu.pipeline_mode<synchronous>, transform_indices = @transform_3, window_bounds = array<i64: 1, 64>}, {transform_indices = @transform_4, window_bounds = array<i64: 3, 64>}]} {
    %c0 = arith.constant 0 : index
    %c0_0 = arith.constant 0 : index
    %0 = vector.load %arg3[%c0, %c0_0] : memref<3x64xf32, #tpu.memory_space<vmem>>, vector<3x64xf32>
    %cst = arith.constant dense<0.000000e+00> : vector<3xf32>
    %1 = vector.multi_reduction <add>, %0, %cst [1] : vector<3x64xf32> to vector<3xf32>
    %2 = vector.shape_cast %1 : vector<3xf32> to vector<3x1xf32>
    %cst_1 = arith.constant 6.400000e+01 : f32
    %3 = vector.broadcast %cst_1 : f32 to vector<3x1xf32>
    %4 = arith.divf %2, %3 : vector<3x1xf32>
    %5 = vector.broadcast %4 : vector<3x1xf32> to vector<3x64xf32>
    %6 = arith.subf %0, %5 : vector<3x64xf32>
    %7 = arith.mulf %6, %6 : vector<3x64xf32>
    %cst_2 = arith.constant dense<0.000000e+00> : vector<3xf32>
    %8 = vector.multi_reduction <add>, %7, %cst_2 [1] : vector<3x64xf32> to vector<3xf32>
    %9 = vector.shape_cast %8 : vector<3xf32> to vector<3x1xf32>
    %cst_3 = arith.constant 6.400000e+01 : f32
    %10 = vector.broadcast %cst_3 : f32 to vector<3x1xf32>
    %11 = arith.divf %9, %10 : vector<3x1xf32>
    %12 = vector.broadcast %4 : vector<3x1xf32> to vector<3x64xf32>
    %13 = arith.subf %0, %12 : vector<3x64xf32>
    %cst_4 = arith.constant 9.99999974E-6 : f32
    %14 = vector.broadcast %cst_4 : f32 to vector<3x1xf32>
    %15 = arith.addf %11, %14 : vector<3x1xf32>
    %16 = math.rsqrt %15 : vector<3x1xf32>
    %17 = vector.broadcast %16 : vector<3x1xf32> to vector<3x64xf32>
    %18 = arith.mulf %13, %17 : vector<3x64xf32>
    %c0_5 = arith.constant 0 : index
    %c0_6 = arith.constant 0 : index
    %19 = vector.load %arg5[%c0_5, %c0_6] : memref<1x64xf32, #tpu.memory_space<vmem>>, vector<1x64xf32>
    %20 = vector.broadcast %19 : vector<1x64xf32> to vector<3x64xf32>
    %21 = arith.mulf %18, %20 : vector<3x64xf32>
    %c0_7 = arith.constant 0 : index
    %c0_8 = arith.constant 0 : index
    %22 = vector.load %arg6[%c0_7, %c0_8] : memref<1x64xf32, #tpu.memory_space<vmem>>, vector<1x64xf32>
    %23 = vector.broadcast %22 : vector<1x64xf32> to vector<3x64xf32>
    %24 = arith.addf %21, %23 : vector<3x64xf32>
    %25 = arith.truncf %24 : vector<3x64xf32> to vector<3x64xbf16>
    %c0_9 = arith.constant 0 : index
    %c0_10 = arith.constant 0 : index
    %26 = vector.load %arg4[%c0_9, %c0_10] : memref<64x64xbf16, #tpu.memory_space<vmem>>, vector<64x64xbf16>
    %cst_11 = arith.constant dense<0.000000e+00> : vector<3x64xf32>
    %27 = tpu.matmul %25, %26, %cst_11 {dimension_numbers = #tpu.dot_dimension_numbers<[1], [0], [0], [1], [0, 0, 1, 1], [], []>} : vector<3x64xbf16>, vector<64x64xbf16>, vector<3x64xf32> -> vector<3x64xf32>
    %c0_12 = arith.constant 0 : index
    %c0_13 = arith.constant 0 : index
    %28 = vector.load %arg7[%c0_12, %c0_13] : memref<3x64xf32, #tpu.memory_space<vmem>>, vector<3x64xf32>
    tpu.vector_store %arg7[%c0_12, %c0_13], %27 {strides = array<i32>} : memref<3x64xf32, #tpu.memory_space<vmem>>, vector<3x64xf32>,
    return
  }
  func.func @transform_0(%arg0: i32, %arg1: i32, %arg2: i32) -> (i32, i32) {
    %c0_i32 = arith.constant 0 : i32
    return %arg0, %arg2 : i32, i32
  }
  func.func @transform_1(%arg0: i32, %arg1: i32, %arg2: i32) -> (i32, i32) {
    %c0_i32 = arith.constant 0 : i32
    return %arg2, %arg1 : i32, i32
  }
  func.func @transform_2(%arg0: i32, %arg1: i32, %arg2: i32) -> (i32, i32) {
    %c0_i32 = arith.constant 0 : i32
    %c0_i32_0 = arith.constant 0 : i32
    %c0_i32_1 = arith.constant 0 : i32
    return %c0_i32, %c0_i32_0 : i32, i32
  }
  func.func @transform_3(%arg0: i32, %arg1: i32, %arg2: i32) -> (i32, i32) {
    %c0_i32 = arith.constant 0 : i32
    %c0_i32_0 = arith.constant 0 : i32
    %c0_i32_1 = arith.constant 0 : i32
    return %c0_i32, %c0_i32_0 : i32, i32
  }
  func.func @transform_4(%arg0: i32, %arg1: i32, %arg2: i32) -> (i32, i32) {
    %c0_i32 = arith.constant 0 : i32
    return %arg0, %arg1 : i32, i32
  }
}

module attributes {stable_mosaic.version = 11 : i64} {
  func.func @_logits_kernel(%arg0: memref<2x64xf32, #tpu.memory_space<vmem>>, %arg1: memref<3x64xf32, #tpu.memory_space<vmem>>, %arg2: memref<1xf32, #tpu.memory_space<smem>>, %arg3: memref<2x3xf32, #tpu.memory_space<vmem>>) attributes {dimension_semantics = [], scalar_prefetch = 0 : i64, scratch_operands = 0 : i64, tpu.core_type = #tpu.core_type<tc>} {
    %c0 = arith.constant 0 : index
    %c0_0 = arith.constant 0 : index
    %0 = vector.load %arg0[%c0, %c0_0] : memref<2x64xf32, #tpu.memory_space<vmem>>, vector<2x64xf32>
    %c0_1 = arith.constant 0 : index
    %c0_2 = arith.constant 0 : index
    %1 = vector.load %arg1[%c0_1, %c0_2] : memref<3x64xf32, #tpu.memory_space<vmem>>, vector<3x64xf32>
    %2 = arith.mulf %0, %0 : vector<2x64xf32>
    %cst = arith.constant dense<0.000000e+00> : vector<2xf32>
    %3 = vector.multi_reduction <add>, %2, %cst [1] : vector<2x64xf32> to vector<2xf32>
    %4 = vector.shape_cast %3 : vector<2xf32> to vector<2x1xf32>
    %cst_3 = arith.constant 9.99999996E-13 : f32
    %5 = vector.broadcast %cst_3 : f32 to vector<2x1xf32>
    %6 = arith.maximumf %4, %5 : vector<2x1xf32>
    %7 = math.rsqrt %6 : vector<2x1xf32>
    %8 = vector.broadcast %7 : vector<2x1xf32> to vector<2x64xf32>
    %9 = arith.mulf %0, %8 : vector<2x64xf32>
    %10 = arith.mulf %1, %1 : vector<3x64xf32>
    %cst_4 = arith.constant dense<0.000000e+00> : vector<3xf32>
    %11 = vector.multi_reduction <add>, %10, %cst_4 [1] : vector<3x64xf32> to vector<3xf32>
    %12 = vector.shape_cast %11 : vector<3xf32> to vector<3x1xf32>
    %cst_5 = arith.constant 9.99999996E-13 : f32
    %13 = vector.broadcast %cst_5 : f32 to vector<3x1xf32>
    %14 = arith.maximumf %12, %13 : vector<3x1xf32>
    %15 = math.rsqrt %14 : vector<3x1xf32>
    %16 = vector.broadcast %15 : vector<3x1xf32> to vector<3x64xf32>
    %17 = arith.mulf %1, %16 : vector<3x64xf32>
    %18 = arith.truncf %9 : vector<2x64xf32> to vector<2x64xbf16>
    %19 = arith.truncf %17 : vector<3x64xf32> to vector<3x64xbf16>
    %cst_6 = arith.constant dense<0.000000e+00> : vector<2x3xf32>
    %20 = tpu.matmul %18, %19, %cst_6 {dimension_numbers = #tpu.dot_dimension_numbers<[1], [1], [0], [0], [0, 0, 1, 0], [], []>} : vector<2x64xbf16>, vector<3x64xbf16>, vector<2x3xf32> -> vector<2x3xf32>
    %c0_7 = arith.constant 0 : index
    %21 = memref.load %arg2[%c0_7] : memref<1xf32, #tpu.memory_space<smem>>
    %22 = math.exp %21 : f32
    %23 = vector.broadcast %22 : f32 to vector<2x3xf32>
    %24 = arith.mulf %23, %20 : vector<2x3xf32>
    %c0_8 = arith.constant 0 : index
    %c0_9 = arith.constant 0 : index
    %25 = vector.load %arg3[%c0_8, %c0_9] : memref<2x3xf32, #tpu.memory_space<vmem>>, vector<2x3xf32>
    tpu.vector_store %arg3[%c0_8, %c0_9], %24 {strides = array<i32>} : memref<2x3xf32, #tpu.memory_space<vmem>>, vector<2x3xf32>,
    return
  }
}

</mosaic_0001>

<bundles_post_ra>
// kernel: custom_clip_forward.21
= control target key start
LH: loop header
LB: loop body
LE: loop exit
PB: predicated region body
PF: predicated region fallthrough
CT: control target
= control target key end

     0   :  { %v187_v0 = vmov 0   ;;  %vm112_vm0 = vcmask 523264   ;;  %s250_s1 = inlined_call_operand.vmem [shape: bf16[192,64], index: 1, kind: input, shape index: {}]   ;;  %s251_s0 = inlined_call_operand.vmem [shape: f32[8,192], index: 0, kind: input, shape index: {}]   ;;  %s252_s2 = inlined_call_operand.vmem [shape: f32[8,64], index: 2, kind: output, shape index: {}]  }
   0x1   :  { %116 = vmatprep.subr.bf16.mxu0 %v187_v0  ;;  %v175_v1 = vld [vmem:[%s250_s1] sm:$0xff]   ;;  %v176_v2 = vld [vmem:[%s250_s1 + $0x8] sm:$0xff]   ;;  %v177_v3 = vld [vmem:[%s250_s1 + $0x10] sm:$0xff]  }
   0x2   :  { %117 = vmatpush1.bf16.msra.mxu0 %v175_v1  ;;  %v178_v4 = vld [vmem:[%s250_s1 + $0x18] sm:$0xff]   ;;  %v13_v5 = vld [vmem:[%s251_s0 + $0x8] sm:$0xff]  ;;  %v179_v7 = vld [vmem:[%s250_s1 + $0x20] sm:$0xff]  }
   0x3   :  { %118 = vmatprep.subr.bf16.mxu0 %v187_v0  ;;  %v15_v6 = vpack.c.bf16 %v13_v5, %v13_v5  ;;  %v180_v8 = vld [vmem:[%s250_s1 + $0x28] sm:$0xff]   ;;  %v181_v9 = vld [vmem:[%s250_s1 + $0x30] sm:$0xff]   ;;  %v182_v10 = vld [vmem:[%s250_s1 + $0x38] sm:$0xff]  }
   0x4   :  { %v183_v11 = vld [vmem:[%s250_s1 + $0x40] sm:$0xff]   ;;  %v184_v12 = vld [vmem:[%s250_s1 + $0x48] sm:$0xff]   ;;  %v185_v13 = vld [vmem:[%s250_s1 + $0x50] sm:$0xff]  }
   0x5   :  { %173 = vmatprep.mubr.msk.bf16.mxu0 %vm112_vm0, %v15_v6  ;;  %v186_v14 = vld [vmem:[%s250_s1 + $0x58] sm:$0xff]   ;;  %v12_v15 = vld [vmem:[%s251_s0] sm:$0xff] }
   0x6   :  { %119 = vmatpush1.bf16.msra.mxu0 %v176_v2  ;;  %v14_v16 = vpack.c.bf16 %v12_v15, %v12_v15 }
   0x7   :  { %120 = vmatprep.subr.bf16.mxu0 %v187_v0 }
   0xa   :  { %121 = vmatpush1.bf16.msra.mxu0 %v177_v3 }
   0xb   :  { %122 = vmatprep.subr.bf16.mxu0 %v187_v0 }
   0xe   :  { %123 = vmatpush1.bf16.msra.mxu0 %v178_v4 }
   0xf   :  { %124 = vmatprep.subr.bf16.mxu0 %v187_v0 }
  0x12   :  { %125 = vmatpush1.bf16.msra.mxu0 %v179_v7 }
  0x13   :  { %126 = vmatprep.subr.bf16.mxu0 %v187_v0 }
  0x16   :  { %127 = vmatpush1.bf16.msra.mxu0 %v180_v8 }
  0x17   :  { %128 = vmatprep.subr.bf16.mxu0 %v187_v0 }
  0x1a   :  { %129 = vmatpush1.bf16.msra.mxu0 %v181_v9 }
  0x1b   :  { %130 = vmatprep.subr.bf16.mxu0 %v187_v0 }
  0x1e   :  { %131 = vmatpush1.bf16.msra.mxu0 %v182_v10 }
  0x1f   :  { %132 = vmatprep.subr.bf16.mxu0 %v187_v0 }
  0x22   :  { %133 = vmatpush1.bf16.msra.mxu0 %v183_v11 }
  0x23   :  { %134 = vmatprep.subr.bf16.mxu0 %v187_v0 }
  0x26   :  { %135 = vmatpush1.bf16.msra.mxu0 %v184_v12 }
  0x27   :  { %136 = vmatprep.subr.bf16.mxu0 %v187_v0 }
  0x2a   :  { %137 = vmatpush1.bf16.msra.mxu0 %v185_v13 }
  0x2b   :  { %138 = vmatprep.subr.bf16.mxu0 %v187_v0 }
  0x2e   :  { %139 = vmatpush1.bf16.msra.mxu0 %v186_v14 }
  0x31   :  { %149 = vmatmul.mubr.bf16.vlgmr.msra.gmra.mrb[0].mxu0 %v14_v16 }
 0x104   :  { %v150_v17 = vpop.f32.mrb[0].mxu0 }
 0x105   :  { %156 = vst.msk [vmem:[%s252_s2] sm:$0xff] %vm112_vm0, %v150_v17  ;;  %v152_v18 = vpop.f32.mrb[1].mxu0 }
 0x106   :  { %v153_v19 = vpop.f32.mrb[2].mxu0 }
 0x107   :  { %v154_v20 = vpop.f32.mrb[3].mxu0 }

// kernel: custom_clip_forward.22
= control target key start
LH: loop header
LB: loop body
LE: loop exit
PB: predicated region body
PF: predicated region fallthrough
CT: control target
= control target key end

     0   :  { %vm16_vm0 = vcmask 523264   ;;  %vm20_vm1 = vcmask 517120   ;;  %s119_s0 = inlined_call_operand.vmem [shape: f32[10,64], index: 0, kind: input, shape index: {}]   ;;  %s120_s1 = inlined_call_operand.vmem [shape: f32[1,64], index: 1, kind: input, shape index: {}]   ;;  %s121_s2 = inlined_call_operand.vmem [shape: f32[1,64], index: 2, kind: input, shape index: {}]   ;;  %s122_s3 = inlined_call_operand.vmem [shape: f32[10,64], index: 3, kind: output, shape index: {}]  }
   0x1   :  { %v14_v0 = vld [vmem:[%s119_s0] sm:$0xff]  ;;  %v15_v1 = vld [vmem:[%s119_s0 + $0x8] sm:$0x3] }
   0x2   :  { %v17_v2 = vsel %vm16_vm0, %v14_v0, 0.0  ;;  %v21_v3 = vsel %vm20_vm1, %v15_v1, 0.0  ;;  %v69_v21 = vld [vmem:[%s120_s1] ss:$0 sm:$0xff] }
   0x3   :  { %18 = vadd.xlane.f32.xlu0 %v17_v2  ;;  %v70_v23 = vld [vmem:[%s121_s2] ss:$0 sm:$0xff] }
   0x7   :  { %22 = vadd.xlane.f32.xlu0 %v21_v3 }
  0x90   :  { %v19_v4 = vpop.xlane.xlu0 %18 }
  0x91   :  { %v25_v5 = vmul.f32 0.015625, %v19_v4 }
  0x93   :  { %v27_v6 = vsub.f32 %v14_v0, %v25_v5 }
  0x94   :  { %v23_v7 = vpop.xlane.xlu0 %22 }
  0x95   :  { %v26_v8 = vmul.f32 0.015625, %v23_v7  ;;  %v29_v9 = vmul.f32 %v27_v6, %v27_v6 }
  0x97   :  { %v28_v10 = vsub.f32 %v15_v1, %v26_v8  ;;  %v31_v11 = vsel %vm16_vm0, %v29_v9, 0.0 }
  0x98   :  { %32 = vadd.xlane.f32.xlu1 %v31_v11 }
  0x99   :  { %v30_v12 = vmul.f32 %v28_v10, %v28_v10 }
  0x9b   :  { %v34_v13 = vsel %vm20_vm1, %v30_v12, 0.0 }
  0x9c   :  { %35 = vadd.xlane.f32.xlu1 %v34_v13 }
 0x125   :  { %v33_v14 = vpop.xlane.xlu1 %32 }
 0x126   :  { %v37_v15 = vmul.f32 0.015625, %v33_v14 }
 0x128   :  { %v39_v16 = vadd.f32 1e-05, %v37_v15 }
 0x129   :  { %v36_v17 = vpop.xlane.xlu1 %35 }
 0x12a   :  { %71 = vrsqrt.f32 %v39_v16  ;;  %v38_v18 = vmul.f32 0.015625, %v36_v17 }
 0x12c   :  { %v40_v19 = vadd.f32 1e-05, %v38_v18 }
 0x12e   :  { %73 = vrsqrt.f32 %v40_v19 }
 0x134   :  { %v72_v20 = vpop.eup %71 }
 0x135   :  { %v43_v22 = vmul.f32 %v72_v20, %v27_v6 }
 0x137   :  { %v52_v24 = vmul.f32 %v69_v21, %v43_v22 }
 0x138   :  { %v74_v25 = vpop.eup %73 }
 0x139   :  { %v61_v26 = vadd.f32 %v70_v23, %v52_v24  ;;  %v44_v27 = vmul.f32 %v74_v25, %v28_v10 }
 0x13b   :  { %63 = vst.msk [vmem:[%s122_s3] sm:$0xff] %vm16_vm0, %v61_v26  ;;  %v53_v28 = vmul.f32 %v69_v21, %v44_v27 }
 0x13d   :  { %v62_v29 = vadd.f32 %v70_v23, %v53_v28 }
 0x13f   :  { %64 = vst.msk [vmem:[%s122_s3 + $0x8] sm:$0x3] %vm20_vm1, %v62_v29 }

// kernel: custom_clip_forward.23
= control target key start
LH: loop header
LB: loop body
LE: loop exit
PB: predicated region body
PF: predicated region fallthrough
CT: control target
= control target key end

     0   :  { %vm23_vm0 = vcmask 523264   ;;  %vm27_vm1 = vcmask 517120   ;;  %v233_v22 = vmov 0   ;;  %v81_v40 = vlaneseq  ;;  %s312_s0 = inlined_call_operand.vmem [shape: f32[10,64], index: 0, kind: input, shape index: {}]   ;;  %s313_s1 = inlined_call_operand.vmem [shape: bf16[64,192], index: 1, kind: input, shape index: {}]   ;;  %s314_s2 = inlined_call_operand.vmem [shape: f32[1,64], index: 2, kind: input, shape index: {}]   ;;  %s315_s3 = inlined_call_operand.vmem [shape: f32[1,64], index: 3, kind: input, shape index: {}]   ;;  %s316_s4 = inlined_call_operand.vmem [shape: f32[1,192], index: 4, kind: input, shape index: {}]   ;;  %s317_s5 = inlined_call_operand.vmem [shape: bf16[10,192], index: 5, kind: output, shape index: {}]  }
   0x1   :  { %v21_v0 = vld [vmem:[%s312_s0] sm:$0xff]  ;;  %v22_v1 = vld [vmem:[%s312_s0 + $0x8] sm:$0x3]  ;;  %v220_v16 = vld [vmem:[%s313_s1 + $0x14] ss:$8 sps:$4 sm:$0xff]   ;;  %166 = vmatprep.mubr.bf16.mxu0 %v233_v22  ;;  %vm189_vm2 = vcmask 1043456  }
   0x2   :  { %v24_v2 = vsel %vm23_vm0, %v21_v0, 0.0  ;;  %v28_v3 = vsel %vm27_vm1, %v22_v1, 0.0  ;;  %v217_v14 = vld [vmem:[%s313_s1 + $0x4] ss:$8 sps:$4 sm:$0xff]   ;;  %v219_v15 = vld [vmem:[%s313_s1] ss:$8 sps:$4 sm:$0xff]  }
   0x3   :  { %25 = vadd.xlane.f32.xlu0 %v24_v2  ;;  %134 = vmatprep.subr.bf16.mxu0 %v217_v14  ;;  %v222_v17 = vld [vmem:[%s313_s1 + $0x10] ss:$8 sps:$4 sm:$0xff]   ;;  %v223_v18 = vld [vmem:[%s313_s1 + $0x24] ss:$8 sps:$4 sm:$0xff]   ;;  %v225_v19 = vld [vmem:[%s313_s1 + $0x20] ss:$8 sps:$4 sm:$0xff]  }
   0x4   :  { %135 = vmatpush1.bf16.msra.mxu0 %v219_v15  ;;  %v226_v20 = vld [vmem:[%s313_s1 + $0x34] ss:$8 sps:$4 sm:$0xff]   ;;  %v228_v21 = vld [vmem:[%s313_s1 + $0x30] ss:$8 sps:$4 sm:$0xff]   ;;  %v201_v31 = vld [vmem:[%s314_s2] ss:$0 sm:$0xff] }
   0x5   :  { %136 = vmatprep.subr.bf16.mxu0 %v220_v16  ;;  %v202_v35 = vld [vmem:[%s315_s3] ss:$0 sm:$0xff]  ;;  %v82_v41 = vshrl.u32 %v81_v40, 7  ;;  %vm190_vm3 = vcmask 523268   ;;  %vm193_vm4 = vcmask 1040384   ;;  %vm194_vm5 = vcmask 520196  }
   0x6   :  { %v79_v43 = vld [vmem:[%s316_s4] sm:$0x3]  ;;  %vm191_vm6 = vmor %vm190_vm3, %vm189_vm2 }
   0x7   :  { %29 = vadd.xlane.f32.xlu0 %v28_v3  ;;  %v83_v42 = vsub.s32 0, %v82_v41  ;;  %v87_v44 = vsub.s32 1, %v82_v41  ;;  %vm195_vm7 = vmor %vm194_vm5, %vm193_vm4 }
   0x8   :  { %137 = vmatpush1.bf16.msra.mxu0 %v222_v17 }
   0x9   :  { %138 = vmatprep.subr.bf16.mxu0 %v223_v18  ;;  %v84_v45 = vrot.slane %v79_v43, %v83_v42  ;;  %v88_v46 = vrot.slane %v79_v43, %v87_v44 }
   0xc   :  { %139 = vmatpush1.bf16.msra.mxu0 %v225_v19 }
   0xd   :  { %140 = vmatprep.subr.bf16.mxu0 %v226_v20 }
  0x10   :  { %141 = vmatpush1.bf16.msra.mxu0 %v228_v21 }
  0x90   :  { %v26_v4 = vpop.xlane.xlu0 %25 }
  0x91   :  { %v32_v5 = vmul.f32 0.015625, %v26_v4 }
  0x93   :  { %v34_v6 = vsub.f32 %v21_v0, %v32_v5 }
  0x94   :  { %v30_v7 = vpop.xlane.xlu0 %29 }
  0x95   :  { %v33_v8 = vmul.f32 0.015625, %v30_v7  ;;  %v36_v9 = vmul.f32 %v34_v6, %v34_v6 }
  0x97   :  { %v35_v10 = vsub.f32 %v22_v1, %v33_v8  ;;  %v38_v11 = vsel %vm23_vm0, %v36_v9, 0.0 }
  0x98   :  { %39 = vadd.xlane.f32.xlu1 %v38_v11 }
  0x99   :  { %v37_v12 = vmul.f32 %v35_v10, %v35_v10 }
  0x9b   :  { %v41_v13 = vsel %vm27_vm1, %v37_v12, 0.0 }
  0x9c   :  { %42 = vadd.xlane.f32.xlu1 %v41_v13 }
 0x125   :  { %v40_v23 = vpop.xlane.xlu1 %39 }
 0x126   :  { %v44_v24 = vmul.f32 0.015625, %v40_v23 }
 0x128   :  { %v46_v25 = vadd.f32 1e-05, %v44_v24 }
 0x129   :  { %v43_v26 = vpop.xlane.xlu1 %42 }
 0x12a   :  { %229 = vrsqrt.f32 %v46_v25  ;;  %v45_v27 = vmul.f32 0.015625, %v43_v26 }
 0x12c   :  { %v47_v28 = vadd.f32 1e-05, %v45_v27 }
 0x12e   :  { %231 = vrsqrt.f32 %v47_v28 }
 0x134   :  { %v230_v29 = vpop.eup %229 }
 0x135   :  { %v50_v30 = vmul.f32 %v230_v29, %v34_v6 }
 0x137   :  { %v59_v34 = vmul.f32 %v201_v31, %v50_v30 }
 0x138   :  { %v232_v32 = vpop.eup %231 }
 0x139   :  { %v51_v33 = vmul.f32 %v232_v32, %v35_v10  ;;  %v68_v37 = vadd.f32 %v202_v35, %v59_v34 }
 0x13b   :  { %v60_v36 = vmul.f32 %v201_v31, %v51_v33 }
 0x13d   :  { %v69_v38 = vadd.f32 %v202_v35, %v60_v36 }
 0x13f   :  { %v70_v39 = vpack.c.bf16 %v69_v38, %v68_v37 }
 0x141   :  { %211 = vmatmul.mubr.msk.bf16.vlgmr.msra.gmra.mrb[0].mxu0 %vm23_vm0, %v70_v39 }
 0x214   :  { %v168_v47 = vpop.f32.mrb[0].mxu0 }
 0x215   :  { %v169_v48 = vadd.f32 %v168_v47, %v84_v45  ;;  %v170_v49 = vpop.f32.mrb[1].mxu0 }
 0x216   :  { %v171_v50 = vadd.f32 %v170_v49, %v88_v46  ;;  %v172_v51 = vpop.f32.mrb[2].mxu0 }
 0x217   :  { %v173_v52 = vadd.f32 %v172_v51, %v84_v45  ;;  %v174_v53 = vpop.f32.mrb[3].mxu0 }
 0x218   :  { %v214_v54 = vpack.c.bf16 %v171_v50, %v169_v48  ;;  %v175_v55 = vadd.f32 %v174_v53, %v88_v46 }
 0x21a   :  { %192 = vst.msk [vmem:[%s317_s5] sm:$0xff] %vm191_vm6, %v214_v54  ;;  %v215_v56 = vpack.c.bf16 %v175_v55, %v173_v52 }
 0x21c   :  { %196 = vst.msk [vmem:[%s317_s5 + $0x8] sm:$0x11] %vm195_vm7, %v215_v56 }

// kernel: custom_clip_forward.24
= control target key start
LH: loop header
LB: loop body
LE: loop exit
PB: predicated region body
PF: predicated region fallthrough
CT: control target
= control target key end

     0   :  { %s794_s15 = smov 0   ;;  %s868_s0 = inlined_call_operand.vmem [shape: bf16[2,5,192], index: 0, kind: input, shape index: {}]   ;;  %s869_s1 = inlined_call_operand.vmem [shape: bf16[64,64], index: 1, kind: input, shape index: {}]   ;;  %s870_s2 = inlined_call_operand.vmem [shape: f32[1,64], index: 2, kind: input, shape index: {}]   ;;  %s871_s3 = inlined_call_operand.vmem [shape: f32[2,5,64], index: 3, kind: input, shape index: {}]   ;;  %s872_s4 = inlined_call_operand.vmem [shape: f32[2,5,64], index: 4, kind: output, shape index: {}]  }
   0x1 LB: > { %s643_s16 = sadd.s32 4294967295, %s761_s15   ;;  %p647_p0 = scmp.ge.s32.totalorder %s761_s15, 1  ;;  %s761_s15 = sphi %s794_s15, %s14_s15  }
   0x2   : > { %p171_p1 = scmp.lt.s32.totalorder %s761_s15, 3 }
   0x4   : > { %p172_p2 = pnand %p647_p0, %p171_p1 }
   0x5   : > { %p200_p3 = scmp.lt.s32.totalorder (!%p172_p2), %s643_s16, 1  ;;  %v763_v0 = vmov (!%p172_p2), 0.0   ;;  %vm764_vm0 = vmmov (!%p172_p2), 0   ;;  %s765_s21 = smov (!%p172_p2), 64   ;;  %vm229_vm1 = vcmask (!%p172_p2), 261120   ;;  %vm277_vm2 = vcmask (!%p172_p2), 36864  }
   0x6   : > { %175 = sbr.rel (%p172_p2) target bundleno = 1639 (0x667), region = 36  ;;  %682 = vmatprep.subr.bf16.mxu0 (!%p172_p2), %v763_v0  ;;  %684 = vmatprep.mubr.msk.bf16.mxu0 (!%p172_p2), %vm764_vm0, %v763_v0  ;;  %vm296_vm3 = vcmask (!%p172_p2), 1041408   ;;  %s766_s22 = smov (!%p172_p2), 32   ;;  %vm297_vm4 = vcmask (!%p172_p2), 1042432   ;;  %v767_v17 = vmov (!%p172_p2), 65535   ;;  %v743_v21 = vld [vmem:[%s869_s1] sm:$0xff] (!%p172_p2)  }
   0x7   : > { %694 = vmatprep.subr.bf16.mxu1 (!%p172_p2), %v763_v0  ;;  %698 = vmatprep.mubr.msk.bf16.mxu1 (!%p172_p2), %vm764_vm0, %v763_v0  ;;  %v298_v18 = vsel (!%p172_p2), %vm296_vm3, 4294967295, %v767_v17  ;;  %s768_s23 = smov (!%p172_p2), 96   ;;  %vm292_vm5 = vcmask (!%p172_p2), 39936   ;;  %v744_v29 = vld [vmem:[%s869_s1 + $0x8] sm:$0xff] (!%p172_p2)   ;;  %v745_v51 = vld [vmem:[%s869_s1 + $0x10] sm:$0xff] (!%p172_p2)   ;;  %v746_v53 = vld [vmem:[%s869_s1 + $0x18] sm:$0xff] (!%p172_p2)  }
   0x8   : > { %v299_v19 = vsel (!%p172_p2), %vm297_vm4, %v298_v18, 0  ;;  %695 = vmatpush3.bf16.msra.mxu1 (!%p172_p2), %v743_v21  ;;  %v652_v60 = vld [vmem:[%s870_s2] ss:$0 sm:$0xff] (!%p172_p2)  ;;  %vm576_vm6 = vcmask (!%p172_p2), 520192  }
   0x9   : > { %696 = vmatprep.subr.bf16.mxu1 (!%p172_p2), %v763_v0 }
   0xc   : > { %697 = vmatpush3.bf16.msra.mxu1 (!%p172_p2), %v744_v29 }
   0xd   : > { %s874_s16 = smov (!%p200_p3, %s643_s16), 1  ;;  %708 = vmatprep.subr.bf16.mxu1 %v763_v0 }
   0xe   : > { %s808_s17 = sshll.u32 %s874_s16, 3 }
   0xf   : > { %s204_s20 = scalar_lea.vmem %s868_s0, %s808_s17  ;;  %s208_s8 = scalar_lea.vmem %s871_s3, %s808_s17 }
  0x10   : > { %v214_v1 = vld [vmem:[%s204_s20] sm:$0x77]  ;;  %s212_s13 = scalar_lea.vmem %s872_s4, %s808_s17 }
  0x11   : > { %v653_v2 = vcombine.low %v214_v1, %v214_v1  ;;  %v655_v16 = vcombine.high %v214_v1, %v214_v1  ;;  %v215_v59 = vld [vmem:[%s208_s8] sm:$0x1f] }
  0x12   : > { %v223_v61 = vadd.f32 %v652_v60, %v215_v59 }
  0x13   : > { %227 = vrot.lane.b32.xlu0 %v653_v2, %s765_s21  ;;  %v301_v20 = vand.u32 %v655_v16, %v299_v19 }
  0x85   : > { %v228_v3 = vpop.permute.xlu0 %227 }
  0x86   : > { %v234_v4 = vsel %vm229_vm1, %v228_v3, 0 }
  0x87   : > { %683 = vmatpush3.bf16.xpose.msra.mxu0 %v234_v4 }
  0x88   : > { %688 = vmatprep.subr.bf16.mxu0 %v763_v0 }
  0x8e   : > { %685 = vmatmul.mubr.msk.bf16.vlgmr.msra.gmra.mrb[0].mxu0 %vm229_vm1, %v214_v1 }
  0x8f   : > { %690 = vmatprep.mubr.msk.bf16.mxu0 %vm764_vm0, %v763_v0  ;;  %689 = vmatpush3.bf16.msra.mxu0 %v301_v20 }
  0x90   : > { %702 = vmatprep.subr.bf16.mxu0 %v763_v0 }
 0x161   : > { %v270_v5 = vpop.f32.mrb[0].mxu0 }
 0x162   : > { %v276_v6 = vmul.f32 0.17677669, %v270_v5  ;;  %v686_v7 = vpop.f32.mrb[1].mxu0 }
 0x163   : > { %v273_v8 = vpop.f32.mrb[2].mxu0 }
 0x164   : > { %v687_v9 = vpop.f32.mrb[3].mxu0  ;;  %v278_v10 = vsel %vm277_vm2, %v276_v6, -inf }
 0x165   : > { %279 = vmax.xlane.f32.xlu0 %v278_v10 }
 0x1f2   : > { %v280_v11 = vpop.xlane.xlu0 %279 }
 0x1f3   : > { %v281_v12 = vsub.f32 %v276_v6, %v280_v11 }
 0x1f5   : > { %v282_v13 = vmul.f32 1.442695, %v281_v12 }
 0x1f7   : > { %747 = vpow2.f32 %v282_v13 }
 0x201   : > { %v748_v14 = vpop.eup %747 }
 0x202   : > { %v284_v15 = vsel %vm277_vm2, %v748_v14, 0.0 }
 0x203   : > { %285 = vadd.xlane.f32.xlu1 %v284_v15 }
 0x214   : > { %406 = vrot.lane.b32.xlu1 %v653_v2, %s766_s22 }
 0x218   : > { %404 = vrot.lane.b32.xlu1 %v653_v2, %s768_s23 }
 0x290   : > { %v286_v22 = vpop.xlane.xlu1 %285 }
 0x291   : > { %749 = vrcp.f32 %v286_v22 }
 0x294   : > { %v407_v24 = vpop.permute.xlu1 %406 }
 0x295   : > { %v412_v26 = vsel %vm229_vm1, %v407_v24, 0 }
 0x298   : > { %v405_v28 = vpop.permute.xlu1 %404 }
 0x29b   : > { %v750_v23 = vpop.eup %749 }
 0x29c   : > { %v288_v25 = vmul.f32 %v750_v23, %v748_v14 }
 0x29e   : > { %v289_v27 = vpack.c.bf16 %v288_v25, %v288_v25 }
 0x2a0   : > { %691 = vmatmul.mubr.msk.bf16.vlgmr.msra.gmra.mrb[4].mxu0 %vm292_vm5, %v289_v27 }
 0x2a1   : > { %703 = vmatpush3.bf16.xpose.msra.mxu0 %v412_v26  ;;  %704 = vmatprep.mubr.msk.bf16.mxu0 %vm764_vm0, %v763_v0 }
 0x2a8   : > { %705 = vmatmul.mubr.msk.bf16.vlgmr.msra.gmra.mrb[8].mxu0 %vm229_vm1, %v405_v28 }
 0x373   : > { %v337_v30 = vpop.f32.mrb[4].mxu0 }
 0x374   : > { %v343_v31 = vpack.c.bf16 %v337_v30, %v337_v30  ;;  %v692_v32 = vpop.f32.mrb[5].mxu0 }
 0x375   : > { %v340_v33 = vpop.f32.mrb[6].mxu0 }
 0x376   : > { %v693_v34 = vpop.f32.mrb[7].mxu0  ;;  %699 = vmatmul.mubr.msk.bf16.vlgmr.msra.gmra.mrb[0].mxu1 %vm229_vm1, %v343_v31 }
 0x377   : > { %710 = vmatprep.mubr.msk.bf16.mxu1 %vm764_vm0, %v763_v0 }
 0x37b   : > { %v448_v35 = vpop.f32.mrb[8].mxu0 }
 0x37c   : > { %v454_v36 = vmul.f32 0.17677669, %v448_v35  ;;  %v706_v37 = vpop.f32.mrb[9].mxu0 }
 0x37d   : > { %v451_v38 = vpop.f32.mrb[10].mxu0 }
 0x37e   : > { %v707_v39 = vpop.f32.mrb[11].mxu0  ;;  %v455_v40 = vsel %vm277_vm2, %v454_v36, -inf }
 0x37f   : > { %456 = vmax.xlane.f32.xlu1 %v455_v40 }
 0x40c   : > { %v457_v41 = vpop.xlane.xlu1 %456 }
 0x40d   : > { %v458_v42 = vsub.f32 %v454_v36, %v457_v41 }
 0x40f   : > { %v459_v43 = vmul.f32 1.442695, %v458_v42 }
 0x411   : > { %751 = vpow2.f32 %v459_v43 }
 0x41b   : > { %v752_v44 = vpop.eup %751 }
 0x41c   : > { %v461_v45 = vsel %vm277_vm2, %v752_v44, 0.0 }
 0x41d   : > { %462 = vadd.xlane.f32.xlu0 %v461_v45 }
 0x433   : > { %467 = vrot.lane.b32.xlu0 %v655_v16, %s768_s23 }
 0x4aa   : > { %v463_v46 = vpop.xlane.xlu0 %462 }
 0x4ab   : > { %753 = vrcp.f32 %v463_v46 }
 0x4ae   : > { %v468_v47 = vpop.permute.xlu0 %467 }
 0x4af   : > { %v473_v48 = vand.u32 %v468_v47, %v299_v19 }
 0x4b1   : > { %709 = vmatpush3.bf16.msra.mxu1 %v473_v48 }
 0x4b2   : > { %714 = vmatprep.subr.bf16.mxu1 %v763_v0 }
 0x4b5   : > { %v754_v49 = vpop.eup %753 }
 0x4b6   : > { %v465_v50 = vmul.f32 %v754_v49, %v752_v44 }
 0x4b8   : > { %v466_v52 = vpack.c.bf16 %v465_v50, %v465_v50 }
 0x4ba   : > { %711 = vmatmul.mubr.msk.bf16.vlgmr.msra.gmra.mrb[4].mxu1 %vm292_vm5, %v466_v52 }
 0x4bb   : > { %715 = vmatpush3.bf16.msra.mxu1 %v745_v51  ;;  %718 = vmatprep.mubr.msk.bf16.mxu1 %vm764_vm0, %v763_v0 }
 0x4bc   : > { %716 = vmatprep.subr.bf16.mxu1 %v763_v0 }
 0x4bf   : > { %717 = vmatpush3.bf16.msra.mxu1 %v746_v53 }
 0x58d   : > { %v509_v54 = vpop.f32.mrb[4].mxu1 }
 0x58e   : > { %v515_v55 = vpack.c.bf16 %v509_v54, %v509_v54  ;;  %v712_v56 = vpop.f32.mrb[5].mxu1 }
 0x58f   : > { %v512_v57 = vpop.f32.mrb[6].mxu1 }
 0x590   : > { %v713_v58 = vpop.f32.mrb[7].mxu1  ;;  %719 = vmatmul.mubr.msk.bf16.vlgmr.msra.gmra.mrb[0].mxu1 %vm229_vm1, %v515_v55 }
 0x663   : > { %v569_v62 = vpop.f32.mrb[0].mxu1 }
 0x664   : > { %v722_v63 = vadd.f32 %v569_v62, %v223_v61  ;;  %v720_v0 = vpop.f32.mrb[1].mxu1 }
 0x665   : > { %v572_v1 = vpop.f32.mrb[2].mxu1 }
 0x666   : > { %577 = vst.msk [vmem:[%s212_s13] sm:$0x1f] %vm576_vm6, %v722_v63  ;;  %v721_v2 = vpop.f32.mrb[3].mxu1 }
 0x667 PF: > { %s14_s15 = sadd.s32 1, %s761_s15  }
 0x668   : > { %p11_p4 = scmp.ge.s32.totalorder %s14_s15, 4  }
 0x66a   :  { %13 = sbr.rel (!%p11_p4) target bundleno = 1 (0x1), region = 69 }

// kernel: custom_clip_forward.25
= control target key start
LH: loop header
LB: loop body
LE: loop exit
PB: predicated region body
PF: predicated region fallthrough
CT: control target
= control target key end

     0   :  { %vm23_vm0 = vcmask 523264   ;;  %vm27_vm1 = vcmask 517120   ;;  %v279_v22 = vmov 0   ;;  %v81_v40 = vlaneseq  ;;  %s358_s0 = inlined_call_operand.vmem [shape: f32[10,64], index: 0, kind: input, shape index: {}]   ;;  %s359_s1 = inlined_call_operand.vmem [shape: bf16[64,256], index: 1, kind: input, shape index: {}]   ;;  %s360_s2 = inlined_call_operand.vmem [shape: f32[1,64], index: 2, kind: input, shape index: {}]   ;;  %s361_s3 = inlined_call_operand.vmem [shape: f32[1,64], index: 3, kind: input, shape index: {}]   ;;  %s362_s4 = inlined_call_operand.vmem [shape: f32[1,256], index: 4, kind: input, shape index: {}]   ;;  %s363_s5 = inlined_call_operand.vmem [shape: bf16[10,256], index: 5, kind: output, shape index: {}]  }
   0x1   :  { %v21_v0 = vld [vmem:[%s358_s0] sm:$0xff]  ;;  %v22_v1 = vld [vmem:[%s358_s0 + $0x8] sm:$0x3]  ;;  %v250_v16 = vld [vmem:[%s359_s1 + $0x14] ss:$8 sps:$4 sm:$0xff]   ;;  %166 = vmatprep.mubr.bf16.mxu0 %v279_v22 }
   0x2   :  { %v24_v2 = vsel %vm23_vm0, %v21_v0, 0.0  ;;  %v28_v3 = vsel %vm27_vm1, %v22_v1, 0.0  ;;  %v247_v14 = vld [vmem:[%s359_s1 + $0x4] ss:$8 sps:$4 sm:$0xff]   ;;  %v249_v15 = vld [vmem:[%s359_s1] ss:$8 sps:$4 sm:$0xff]  }
   0x3   :  { %25 = vadd.xlane.f32.xlu0 %v24_v2  ;;  %134 = vmatprep.subr.bf16.mxu0 %v247_v14  ;;  %v252_v17 = vld [vmem:[%s359_s1 + $0x10] ss:$8 sps:$4 sm:$0xff]   ;;  %v253_v18 = vld [vmem:[%s359_s1 + $0x24] ss:$8 sps:$4 sm:$0xff]   ;;  %v255_v19 = vld [vmem:[%s359_s1 + $0x20] ss:$8 sps:$4 sm:$0xff]  }
   0x4   :  { %135 = vmatpush1.bf16.msra.mxu0 %v249_v15  ;;  %v256_v20 = vld [vmem:[%s359_s1 + $0x34] ss:$8 sps:$4 sm:$0xff]   ;;  %v258_v21 = vld [vmem:[%s359_s1 + $0x30] ss:$8 sps:$4 sm:$0xff]   ;;  %v227_v31 = vld [vmem:[%s360_s2] ss:$0 sm:$0xff] }
   0x5   :  { %136 = vmatprep.subr.bf16.mxu0 %v250_v16  ;;  %v228_v35 = vld [vmem:[%s361_s3] ss:$0 sm:$0xff]  ;;  %v82_v41 = vshrl.u32 %v81_v40, 7 }
   0x6   :  { %v79_v43 = vld [vmem:[%s362_s4] sm:$0x3] }
   0x7   :  { %29 = vadd.xlane.f32.xlu0 %v28_v3  ;;  %v83_v42 = vsub.s32 0, %v82_v41  ;;  %v87_v44 = vsub.s32 1, %v82_v41 }
   0x8   :  { %137 = vmatpush1.bf16.msra.mxu0 %v252_v17 }
   0x9   :  { %138 = vmatprep.subr.bf16.mxu0 %v253_v18  ;;  %v84_v45 = vrot.slane %v79_v43, %v83_v42  ;;  %v88_v46 = vrot.slane %v79_v43, %v87_v44 }
   0xc   :  { %139 = vmatpush1.bf16.msra.mxu0 %v255_v19 }
   0xd   :  { %140 = vmatprep.subr.bf16.mxu0 %v256_v20 }
  0x10   :  { %141 = vmatpush1.bf16.msra.mxu0 %v258_v21 }
  0x90   :  { %v26_v4 = vpop.xlane.xlu0 %25 }
  0x91   :  { %v32_v5 = vmul.f32 0.015625, %v26_v4 }
  0x93   :  { %v34_v6 = vsub.f32 %v21_v0, %v32_v5 }
  0x94   :  { %v30_v7 = vpop.xlane.xlu0 %29 }
  0x95   :  { %v33_v8 = vmul.f32 0.015625, %v30_v7  ;;  %v36_v9 = vmul.f32 %v34_v6, %v34_v6 }
  0x97   :  { %v35_v10 = vsub.f32 %v22_v1, %v33_v8  ;;  %v38_v11 = vsel %vm23_vm0, %v36_v9, 0.0 }
  0x98   :  { %39 = vadd.xlane.f32.xlu1 %v38_v11 }
  0x99   :  { %v37_v12 = vmul.f32 %v35_v10, %v35_v10 }
  0x9b   :  { %v41_v13 = vsel %vm27_vm1, %v37_v12, 0.0 }
  0x9c   :  { %42 = vadd.xlane.f32.xlu1 %v41_v13 }
 0x125   :  { %v40_v23 = vpop.xlane.xlu1 %39 }
 0x126   :  { %v44_v24 = vmul.f32 0.015625, %v40_v23 }
 0x128   :  { %v46_v25 = vadd.f32 1e-05, %v44_v24 }
 0x129   :  { %v43_v26 = vpop.xlane.xlu1 %42 }
 0x12a   :  { %259 = vrsqrt.f32 %v46_v25  ;;  %v45_v27 = vmul.f32 0.015625, %v43_v26 }
 0x12c   :  { %v47_v28 = vadd.f32 1e-05, %v45_v27 }
 0x12e   :  { %261 = vrsqrt.f32 %v47_v28 }
 0x134   :  { %v260_v29 = vpop.eup %259 }
 0x135   :  { %v50_v30 = vmul.f32 %v260_v29, %v34_v6 }
 0x137   :  { %v59_v34 = vmul.f32 %v227_v31, %v50_v30 }
 0x138   :  { %v262_v32 = vpop.eup %261 }
 0x139   :  { %v51_v33 = vmul.f32 %v262_v32, %v35_v10  ;;  %v68_v37 = vadd.f32 %v228_v35, %v59_v34 }
 0x13b   :  { %v60_v36 = vmul.f32 %v227_v31, %v51_v33 }
 0x13d   :  { %v69_v38 = vadd.f32 %v228_v35, %v60_v36 }
 0x13f   :  { %v70_v39 = vpack.c.bf16 %v69_v38, %v68_v37 }
 0x141   :  { %237 = vmatmul.mubr.msk.bf16.vlgmr.msra.gmra.mrb[0].mxu0 %vm23_vm0, %v70_v39 }
 0x214   :  { %v168_v47 = vpop.f32.mrb[0].mxu0 }
 0x215   :  { %v169_v48 = vadd.f32 %v168_v47, %v84_v45  ;;  %v170_v49 = vpop.f32.mrb[1].mxu0 }
 0x216   :  { %v171_v50 = vadd.f32 %v170_v49, %v88_v46  ;;  %v172_v51 = vpop.f32.mrb[2].mxu0 }
 0x217   :  { %v238_v52 = vmul.f32 -1.702, %v169_v48  ;;  %v173_v53 = vadd.f32 %v172_v51, %v84_v45  ;;  %v174_v54 = vpop.f32.mrb[3].mxu0 }
 0x218   :  { %v239_v55 = vmul.f32 -1.702, %v171_v50  ;;  %v175_v56 = vadd.f32 %v174_v54, %v88_v46 }
 0x219   :  { %v185_v57 = vmul.f32 1.442695, %v238_v52  ;;  %v240_v58 = vmul.f32 -1.702, %v173_v53 }
 0x21a   :  { %v187_v59 = vmul.f32 1.442695, %v239_v55  ;;  %v241_v60 = vmul.f32 -1.702, %v175_v56 }
 0x21b   :  { %263 = vpow2.f32 %v185_v57  ;;  %v189_v61 = vmul.f32 1.442695, %v240_v58 }
 0x21c   :  { %265 = vpow2.f32 %v187_v59  ;;  %v191_v62 = vmul.f32 1.442695, %v241_v60 }
 0x21d   :  { %267 = vpow2.f32 %v189_v61 }
 0x21e   :  { %269 = vpow2.f32 %v191_v62 }
 0x225   :  { %v264_v63 = vpop.eup %263 }
 0x226   :  { %v266_v0 = vpop.eup %265  ;;  %v193_v1 = vadd.f32 1.0, %v264_v63 }
 0x227   :  { %v268_v2 = vpop.eup %267  ;;  %v194_v3 = vadd.f32 1.0, %v266_v0 }
 0x228   :  { %v270_v4 = vpop.eup %269  ;;  %271 = vrcp.f32 %v193_v1  ;;  %v195_v5 = vadd.f32 1.0, %v268_v2 }
 0x229   :  { %273 = vrcp.f32 %v194_v3  ;;  %v196_v6 = vadd.f32 1.0, %v270_v4 }
 0x22a   :  { %275 = vrcp.f32 %v195_v5 }
 0x22b   :  { %277 = vrcp.f32 %v196_v6 }
 0x232   :  { %v272_v7 = vpop.eup %271 }
 0x233   :  { %v274_v8 = vpop.eup %273  ;;  %v205_v9 = vmul.f32 %v272_v7, %v169_v48 }
 0x234   :  { %v276_v10 = vpop.eup %275  ;;  %v206_v11 = vmul.f32 %v274_v8, %v171_v50 }
 0x235   :  { %v278_v12 = vpop.eup %277  ;;  %v207_v13 = vmul.f32 %v276_v10, %v173_v53 }
 0x236   :  { %v244_v14 = vpack.c.bf16 %v206_v11, %v205_v9  ;;  %v208_v15 = vmul.f32 %v278_v12, %v175_v56 }
 0x238   :  { %221 = vst [vmem:[%s363_s5] sm:$0xff] %v244_v14  ;;  %v245_v16 = vpack.c.bf16 %v208_v15, %v207_v13 }
 0x23a   :  { %222 = vst [vmem:[%s363_s5 + $0x8] sm:$0x11] %v245_v16 }

// kernel: custom_clip_forward.26
= control target key start
LH: loop header
LB: loop body
LE: loop exit
PB: predicated region body
PF: predicated region fallthrough
CT: control target
= control target key end

     0   :  { %vm210_vm0 = vcmask 523264   ;;  %vm212_vm1 = vcmask 517120   ;;  %s372_s1 = inlined_call_operand.vmem [shape: bf16[256,64], index: 1, kind: input, shape index: {}]   ;;  %s373_s0 = inlined_call_operand.vmem [shape: bf16[10,256], index: 0, kind: input, shape index: {}]   ;;  %s374_s2 = inlined_call_operand.vmem [shape: f32[1,64], index: 2, kind: input, shape index: {}]   ;;  %s375_s3 = inlined_call_operand.vmem [shape: f32[10,64], index: 3, kind: input, shape index: {}]   ;;  %s376_s4 = inlined_call_operand.vmem [shape: f32[10,64], index: 4, kind: output, shape index: {}]  }
   0x1   :  { %v259_v0 = vld [vmem:[%s372_s1 + $0x40] sm:$0xff]   ;;  %v261_v2 = vld [vmem:[%s372_s1 + $0x48] sm:$0xff]   ;;  %v263_v4 = vld [vmem:[%s372_s1 + $0x50] sm:$0xff]  }
   0x2   :  { %v260_v1 = vld [vmem:[%s372_s1] sm:$0xff]   ;;  %237 = vmatprep.subr.bf16.mxu0 %v259_v0  ;;  %v262_v3 = vld [vmem:[%s372_s1 + $0x8] sm:$0xff]   ;;  %v264_v5 = vld [vmem:[%s372_s1 + $0x10] sm:$0xff]  }
   0x3   :  { %238 = vmatpush3.bf16.msra.mxu0 %v260_v1  ;;  %v265_v6 = vld [vmem:[%s372_s1 + $0x58] sm:$0xff]   ;;  %v267_v8 = vld [vmem:[%s372_s1 + $0x60] sm:$0xff]   ;;  %v269_v10 = vld [vmem:[%s372_s1 + $0x68] sm:$0xff]  }
   0x4   :  { %239 = vmatprep.subr.bf16.mxu0 %v261_v2  ;;  %v266_v7 = vld [vmem:[%s372_s1 + $0x18] sm:$0xff]   ;;  %v268_v9 = vld [vmem:[%s372_s1 + $0x20] sm:$0xff]   ;;  %v270_v12 = vld [vmem:[%s372_s1 + $0x28] sm:$0xff]  }
   0x5   :  { %v277_v11 = vld [vmem:[%s373_s0 + $0x4] ss:$8 sps:$4 sm:$0x1f]   ;;  %v271_v13 = vld [vmem:[%s372_s1 + $0x70] sm:$0xff]   ;;  %v273_v15 = vld [vmem:[%s372_s1 + $0x78] sm:$0xff]  }
   0x6   :  { %197 = vmatprep.mubr.bf16.mxu0 %v277_v11  ;;  %v272_v14 = vld [vmem:[%s372_s1 + $0x30] sm:$0xff]   ;;  %v274_v16 = vld [vmem:[%s372_s1 + $0x38] sm:$0xff]   ;;  %v275_v17 = vld [vmem:[%s373_s0] ss:$8 sps:$4 sm:$0x1f]  }
   0x7   :  { %240 = vmatpush3.bf16.msra.mxu0 %v262_v3  ;;  %v218_v19 = vld [vmem:[%s374_s2] ss:$0 sm:$0xff]  ;;  %v207_v27 = vld [vmem:[%s375_s3 + $0x8] sm:$0x3] }
   0x8   :  { %241 = vmatprep.subr.bf16.mxu0 %v263_v4  ;;  %v206_v23 = vld [vmem:[%s375_s3] sm:$0xff] }
   0xb   :  { %242 = vmatpush3.bf16.msra.mxu0 %v264_v5 }
   0xc   :  { %243 = vmatprep.subr.bf16.mxu0 %v265_v6 }
   0xf   :  { %244 = vmatpush3.bf16.msra.mxu0 %v266_v7 }
  0x10   :  { %245 = vmatprep.subr.bf16.mxu0 %v267_v8 }
  0x13   :  { %246 = vmatpush3.bf16.msra.mxu0 %v268_v9 }
  0x14   :  { %247 = vmatprep.subr.bf16.mxu0 %v269_v10 }
  0x17   :  { %248 = vmatpush3.bf16.msra.mxu0 %v270_v12 }
  0x18   :  { %249 = vmatprep.subr.bf16.mxu0 %v271_v13 }
  0x1b   :  { %250 = vmatpush3.bf16.msra.mxu0 %v272_v14 }
  0x1c   :  { %251 = vmatprep.subr.bf16.mxu0 %v273_v15 }
  0x1f   :  { %252 = vmatpush3.bf16.msra.mxu0 %v274_v16 }
  0x22   :  { %198 = vmatmul.mubr.bf16.vlgmr.msra.gmra.mrb[0].mxu0 %v275_v17 }
  0xf5   :  { %v253_v18 = vpop.f32.mrb[0].mxu0 }
  0xf6   :  { %v254_v20 = vpop.f32.mrb[1].mxu0 }
  0xf7   :  { %v255_v21 = vadd.f32 %v254_v20, %v253_v18  ;;  %v256_v22 = vpop.f32.mrb[2].mxu0 }
  0xf8   :  { %v257_v24 = vpop.f32.mrb[3].mxu0 }
  0xf9   :  { %v200_v25 = vadd.f32 %v255_v21, %v218_v19  ;;  %v258_v26 = vadd.f32 %v257_v24, %v256_v22 }
  0xfb   :  { %v208_v28 = vadd.f32 %v206_v23, %v200_v25  ;;  %v203_v29 = vadd.f32 %v258_v26, %v218_v19 }
  0xfd   :  { %211 = vst.msk [vmem:[%s376_s4] sm:$0xff] %vm210_vm0, %v208_v28  ;;  %v209_v30 = vadd.f32 %v207_v27, %v203_v29 }
  0xff   :  { %213 = vst.msk [vmem:[%s376_s4 + $0x8] sm:$0x3] %vm212_vm1, %v209_v30 }

// kernel: custom_clip_forward.31
= control target key start
LH: loop header
LB: loop body
LE: loop exit
PB: predicated region body
PF: predicated region fallthrough
CT: control target
= control target key end

     0   :  { %vm19_vm0 = vcmask 517120   ;;  %v164_v8 = vmov 0.0   ;;  %vm165_vm1 = vmmov 0   ;;  %vm83_vm2 = vcmask 523264   ;;  %s218_s0 = inlined_call_operand.vmem [shape: f32[2,64], index: 0, kind: input, shape index: {}]   ;;  %s219_s1 = inlined_call_operand.vmem [shape: bf16[64,64], index: 1, kind: input, shape index: {}]   ;;  %s220_s2 = inlined_call_operand.vmem [shape: f32[1,64], index: 2, kind: input, shape index: {}]   ;;  %s221_s3 = inlined_call_operand.vmem [shape: f32[1,64], index: 3, kind: input, shape index: {}]   ;;  %s222_s4 = inlined_call_operand.vmem [shape: f32[2,64], index: 4, kind: output, shape index: {}]  }
   0x1   :  { %v18_v0 = vld [vmem:[%s218_s0] sm:$0x3]  ;;  %144 = vmatprep.subr.bf16.mxu0 %v164_v8  ;;  %v159_v9 = vld [vmem:[%s219_s1 + $0x8] sm:$0xff]   ;;  %v160_v10 = vld [vmem:[%s219_s1 + $0x10] sm:$0xff]   ;;  %152 = vmatprep.mubr.msk.bf16.mxu0 %vm165_vm1, %v164_v8 }
   0x2   :  { %v20_v1 = vsel %vm19_vm0, %v18_v0, 0.0  ;;  %v158_v7 = vld [vmem:[%s219_s1] sm:$0xff]   ;;  %v161_v11 = vld [vmem:[%s219_s1 + $0x18] sm:$0xff]  }
   0x3   :  { %21 = vadd.xlane.f32.xlu0 %v20_v1  ;;  %145 = vmatpush3.bf16.msra.mxu0 %v158_v7  ;;  %v132_v16 = vld [vmem:[%s220_s2] ss:$0 sm:$0xff] }
   0x4   :  { %146 = vmatprep.subr.bf16.mxu0 %v164_v8  ;;  %v133_v18 = vld [vmem:[%s221_s3] ss:$0 sm:$0xff] }
   0x7   :  { %147 = vmatpush3.bf16.msra.mxu0 %v159_v9 }
   0x8   :  { %148 = vmatprep.subr.bf16.mxu0 %v164_v8 }
   0xb   :  { %149 = vmatpush3.bf16.msra.mxu0 %v160_v10 }
   0xc   :  { %150 = vmatprep.subr.bf16.mxu0 %v164_v8 }
   0xf   :  { %151 = vmatpush3.bf16.msra.mxu0 %v161_v11 }
  0x90   :  { %v22_v2 = vpop.xlane.xlu0 %21 }
  0x91   :  { %v24_v3 = vmul.f32 0.015625, %v22_v2 }
  0x93   :  { %v25_v4 = vsub.f32 %v18_v0, %v24_v3 }
  0x95   :  { %v26_v5 = vmul.f32 %v25_v4, %v25_v4 }
  0x97   :  { %v27_v6 = vsel %vm19_vm0, %v26_v5, 0.0 }
  0x98   :  { %28 = vadd.xlane.f32.xlu0 %v27_v6 }
 0x125   :  { %v29_v12 = vpop.xlane.xlu0 %28 }
 0x126   :  { %v30_v13 = vmul.f32 0.015625, %v29_v12 }
 0x128   :  { %v31_v14 = vadd.f32 1e-05, %v30_v13 }
 0x12a   :  { %162 = vrsqrt.f32 %v31_v14 }
 0x134   :  { %v163_v15 = vpop.eup %162 }
 0x135   :  { %v33_v17 = vmul.f32 %v163_v15, %v25_v4 }
 0x137   :  { %v41_v19 = vmul.f32 %v132_v16, %v33_v17 }
 0x139   :  { %v49_v20 = vadd.f32 %v133_v18, %v41_v19 }
 0x13b   :  { %v50_v21 = vpack.c.bf16 %v49_v20, %v49_v20 }
 0x13d   :  { %153 = vmatmul.mubr.msk.bf16.vlgmr.msra.gmra.mrb[0].mxu0 %vm83_vm2, %v50_v21 }
 0x210   :  { %v121_v22 = vpop.f32.mrb[0].mxu0 }
 0x211   :  { %127 = vst.msk [vmem:[%s222_s4] sm:$0x3] %vm19_vm0, %v121_v22  ;;  %v154_v23 = vpop.f32.mrb[1].mxu0 }
 0x212   :  { %v124_v24 = vpop.f32.mrb[2].mxu0 }
 0x213   :  { %v155_v25 = vpop.f32.mrb[3].mxu0 }

// kernel: custom_clip_forward.33
= control target key start
LH: loop header
LB: loop body
LE: loop exit
PB: predicated region body
PF: predicated region fallthrough
CT: control target
= control target key end

     0   :  { %s854_s15 = smov 0   ;;  %s959_s0 = inlined_call_operand.vmem [shape: bf16[3,16,192], index: 0, kind: input, shape index: {}]   ;;  %s960_s1 = inlined_call_operand.vmem [shape: bf16[64,64], index: 1, kind: input, shape index: {}]   ;;  %s961_s2 = inlined_call_operand.vmem [shape: f32[1,64], index: 2, kind: input, shape index: {}]   ;;  %s962_s3 = inlined_call_operand.vmem [shape: f32[3,16,64], index: 3, kind: input, shape index: {}]   ;;  %s963_s4 = inlined_call_operand.vmem [shape: f32[3,16,64], index: 4, kind: output, shape index: {}]  }
   0x1 LB: > { %s691_s16 = sadd.s32 4294967295, %s822_s15   ;;  %p695_p0 = scmp.ge.s32.totalorder %s822_s15, 1  ;;  %s822_s15 = sphi %s854_s15, %s14_s15  }
   0x2   : > { %p172_p1 = scmp.lt.s32.totalorder %s822_s15, 4 }
   0x4   : > { %p173_p2 = pnand %p695_p0, %p172_p1 }
   0x5   : > { %p203_p3 = scmp.lt.s32.totalorder (!%p173_p2), %s691_s16, 2  ;;  %v824_v0 = vmov (!%p173_p2), 0.0   ;;  %vm825_vm0 = vmmov (!%p173_p2), 0   ;;  %s826_s21 = smov (!%p173_p2), 64   ;;  %vm246_vm1 = vcmask (!%p173_p2), 261120   ;;  %v221_v4 = vlaneseq (!%p173_p2)  ;;  %v796_v29 = vld [vmem:[%s960_s1] sm:$0xff] (!%p173_p2)  }
   0x6   : > { %176 = sbr.rel (%p173_p2) target bundleno = 1651 (0x673), region = 36  ;;  %734 = vmatprep.subr.bf16.mxu0 (!%p173_p2), %v824_v0  ;;  %736 = vmatprep.mubr.msk.bf16.mxu0 (!%p173_p2), %vm825_vm0, %v824_v0  ;;  %vm298_vm3 = vcmask (!%p173_p2), 130048   ;;  %s827_s22 = smov (!%p173_p2), 32   ;;  %v797_v40 = vld [vmem:[%s960_s1 + $0x8] sm:$0xff] (!%p173_p2)   ;;  %vm621_vm5 = vcmask (!%p173_p2), 523264  }
   0x7   : > { %746 = vmatprep.subr.bf16.mxu1 (!%p173_p2), %v824_v0  ;;  %750 = vmatprep.mubr.msk.bf16.mxu1 (!%p173_p2), %vm825_vm0, %v824_v0  ;;  %v882_v5 = vshrl.u32 (!%p173_p2), %v221_v4, 7  ;;  %v884_v6 = vand.u32 (!%p173_p2), 127, %v221_v4  ;;  %s828_s23 = smov (!%p173_p2), 96  }
   0x8   : > { %747 = vmatpush3.bf16.msra.mxu1 (!%p173_p2), %v796_v29 }
   0x9   : > { %v887_v7 = vadd.s32 (!%p173_p2), 8, %v882_v5  ;;  %vm226_vm2 = vcmp.le.s32.totalorder (!%p173_p2), %v884_v6, %v882_v5  ;;  %748 = vmatprep.subr.bf16.mxu1 (!%p173_p2), %v824_v0 }
   0xb   : > { %vm227_vm4 = vcmp.le.s32.totalorder (!%p173_p2), %v884_v6, %v887_v7 }
   0xc   : > { %749 = vmatpush3.bf16.msra.mxu1 (!%p173_p2), %v797_v40 }
   0xd   : > { %s965_s16 = smov (!%p203_p3, %s691_s16), 2  ;;  %760 = vmatprep.subr.bf16.mxu1 %v824_v0 }
   0xe   : > { %s868_s17 = sshll.u32 %s965_s16, 4 }
   0xf   : > { %s874_s20 = scalar_lea.vmem %s959_s0, %s868_s17  ;;  %s212_s8 = scalar_lea.vmem %s962_s3, %s868_s17 }
  0x10   : > { %v793_v1 = vld [vmem:[%s874_s20] ss:$8 sps:$4 sm:$0xff]   ;;  %v795_v28 = vld [vmem:[%s874_s20 + $0x4] ss:$8 sps:$4 sm:$0xff]   ;;  %s217_s13 = scalar_lea.vmem %s963_s4, %s868_s17 }
  0x11   : > { %244 = vrot.lane.b32.xlu0 %v793_v1, %s826_s21 }
  0x83   : > { %v245_v2 = vpop.permute.xlu0 %244 }
  0x84   : > { %v251_v3 = vsel %vm246_vm1, %v245_v2, 0 }
  0x85   : > { %735 = vmatpush3.bf16.xpose.msra.mxu0 %v251_v3 }
  0x86   : > { %740 = vmatprep.subr.bf16.mxu0 %v824_v0 }
  0x8c   : > { %737 = vmatmul.mubr.msk.bf16.vlgmr.msra.gmra.mrb[0].mxu0 %vm246_vm1, %v793_v1 }
  0x8d   : > { %742 = vmatprep.mubr.msk.bf16.mxu0 %vm825_vm0, %v824_v0  ;;  %741 = vmatpush3.bf16.msra.mxu0 %v795_v28 }
  0x8e   : > { %754 = vmatprep.subr.bf16.mxu0 %v824_v0 }
 0x15f   : > { %v287_v8 = vpop.f32.mrb[0].mxu0 }
 0x160   : > { %v294_v9 = vmul.f32 0.17677669, %v287_v8  ;;  %v738_v10 = vpop.f32.mrb[1].mxu0 }
 0x161   : > { %v290_v11 = vpop.f32.mrb[2].mxu0  ;;  %v798_v10 = vld [vmem:[%s960_s1 + $0x10] sm:$0xff]  }
 0x162   : > { %v295_v12 = vmul.f32 0.17677669, %v290_v11  ;;  %v739_v13 = vpop.f32.mrb[3].mxu0  ;;  %v296_v14 = vsel %vm226_vm2, %v294_v9, -1e+30 }
 0x163   : > { %v299_v15 = vsel %vm298_vm3, %v296_v14, -inf }
 0x164   : > { %300 = vmax.xlane.f32.xlu0 %v299_v15  ;;  %v297_v16 = vsel %vm227_vm4, %v295_v12, -1e+30  ;;  %v799_v12 = vld [vmem:[%s960_s1 + $0x18] sm:$0xff]  }
 0x165   : > { %v302_v17 = vsel %vm298_vm3, %v297_v16, -inf }
 0x166   : > { %303 = vmax.xlane.f32.xlu1 %v302_v17 }
 0x1f1   : > { %v301_v18 = vpop.xlane.xlu0 %300 }
 0x1f2   : > { %v305_v19 = vsub.f32 %v296_v14, %v301_v18  ;;  %v228_v18 = vld [vmem:[%s212_s8] sm:$0xff] }
 0x1f3   : > { %v304_v20 = vpop.xlane.xlu1 %303 }
 0x1f4   : > { %v307_v21 = vmul.f32 1.442695, %v305_v19  ;;  %v306_v22 = vsub.f32 %v297_v16, %v304_v20  ;;  %v229_v19 = vld [vmem:[%s212_s8 + $0x8] sm:$0xff] }
 0x1f6   : > { %800 = vpow2.f32 %v307_v21  ;;  %v309_v23 = vmul.f32 1.442695, %v306_v22 }
 0x1f8   : > { %802 = vpow2.f32 %v309_v23 }
 0x200   : > { %v801_v24 = vpop.eup %800 }
 0x201   : > { %v311_v25 = vsel %vm298_vm3, %v801_v24, 0.0 }
 0x202   : > { %v803_v26 = vpop.eup %802  ;;  %312 = vadd.xlane.f32.xlu1 %v311_v25 }
 0x203   : > { %v314_v27 = vsel %vm298_vm3, %v803_v26, 0.0 }
 0x206   : > { %315 = vadd.xlane.f32.xlu1 %v314_v27 }
 0x217   : > { %435 = vrot.lane.b32.xlu1 %v793_v1, %s827_s22 }
 0x21b   : > { %433 = vrot.lane.b32.xlu1 %v793_v1, %s828_s23 }
 0x28f   : > { %v313_v30 = vpop.xlane.xlu1 %312 }
 0x290   : > { %804 = vrcp.f32 %v313_v30 }
 0x293   : > { %v316_v31 = vpop.xlane.xlu1 %315 }
 0x294   : > { %806 = vrcp.f32 %v316_v31 }
 0x297   : > { %v436_v34 = vpop.permute.xlu1 %435 }
 0x298   : > { %v441_v37 = vsel %vm246_vm1, %v436_v34, 0 }
 0x29a   : > { %v805_v32 = vpop.eup %804 }
 0x29b   : > { %v319_v35 = vmul.f32 %v805_v32, %v801_v24  ;;  %v434_v39 = vpop.permute.xlu1 %433 }
 0x29e   : > { %v807_v33 = vpop.eup %806 }
 0x29f   : > { %v320_v36 = vmul.f32 %v807_v33, %v803_v26 }
 0x2a1   : > { %v321_v38 = vpack.c.bf16 %v320_v36, %v319_v35 }
 0x2a3   : > { %743 = vmatmul.mubr.msk.bf16.vlgmr.msra.gmra.mrb[4].mxu0 %vm298_vm3, %v321_v38 }
 0x2a4   : > { %755 = vmatpush3.bf16.xpose.msra.mxu0 %v441_v37  ;;  %756 = vmatprep.mubr.msk.bf16.mxu0 %vm825_vm0, %v824_v0 }
 0x2ab   : > { %757 = vmatmul.mubr.msk.bf16.vlgmr.msra.gmra.mrb[8].mxu0 %vm246_vm1, %v434_v39 }
 0x376   : > { %v363_v41 = vpop.f32.mrb[4].mxu0 }
 0x377   : > { %v744_v42 = vpop.f32.mrb[5].mxu0 }
 0x378   : > { %v366_v43 = vpop.f32.mrb[6].mxu0 }
 0x379   : > { %v370_v44 = vpack.c.bf16 %v366_v43, %v363_v41  ;;  %v745_v45 = vpop.f32.mrb[7].mxu0 }
 0x37b   : > { %751 = vmatmul.mubr.msk.bf16.vlgmr.msra.gmra.mrb[0].mxu1 %vm246_vm1, %v370_v44 }
 0x37c   : > { %762 = vmatprep.mubr.msk.bf16.mxu1 %vm825_vm0, %v824_v0 }
 0x37e   : > { %v477_v46 = vpop.f32.mrb[8].mxu0 }
 0x37f   : > { %v484_v47 = vmul.f32 0.17677669, %v477_v46  ;;  %v758_v48 = vpop.f32.mrb[9].mxu0 }
 0x380   : > { %v480_v49 = vpop.f32.mrb[10].mxu0 }
 0x381   : > { %v485_v50 = vmul.f32 0.17677669, %v480_v49  ;;  %v759_v51 = vpop.f32.mrb[11].mxu0  ;;  %v486_v52 = vsel %vm226_vm2, %v484_v47, -1e+30 }
 0x382   : > { %v488_v53 = vsel %vm298_vm3, %v486_v52, -inf }
 0x383   : > { %489 = vmax.xlane.f32.xlu1 %v488_v53  ;;  %v487_v54 = vsel %vm227_vm4, %v485_v50, -1e+30 }
 0x384   : > { %v491_v55 = vsel %vm298_vm3, %v487_v54, -inf }
 0x385   : > { %492 = vmax.xlane.f32.xlu0 %v491_v55 }
 0x410   : > { %v490_v56 = vpop.xlane.xlu1 %489 }
 0x411   : > { %v494_v57 = vsub.f32 %v486_v52, %v490_v56 }
 0x412   : > { %v493_v58 = vpop.xlane.xlu0 %492 }
 0x413   : > { %v496_v59 = vmul.f32 1.442695, %v494_v57  ;;  %v495_v60 = vsub.f32 %v487_v54, %v493_v58 }
 0x415   : > { %808 = vpow2.f32 %v496_v59  ;;  %v498_v61 = vmul.f32 1.442695, %v495_v60 }
 0x417   : > { %810 = vpow2.f32 %v498_v61 }
 0x41f   : > { %v809_v62 = vpop.eup %808 }
 0x420   : > { %v500_v63 = vsel %vm298_vm3, %v809_v62, 0.0 }
 0x421   : > { %v811_v1 = vpop.eup %810  ;;  %501 = vadd.xlane.f32.xlu0 %v500_v63 }
 0x422   : > { %v503_v2 = vsel %vm298_vm3, %v811_v1, 0.0 }
 0x425   : > { %504 = vadd.xlane.f32.xlu0 %v503_v2 }
 0x43b   : > { %511 = vrot.lane.b32.xlu0 %v795_v28, %s828_s23 }
 0x4ae   : > { %v502_v3 = vpop.xlane.xlu0 %501 }
 0x4af   : > { %812 = vrcp.f32 %v502_v3 }
 0x4b2   : > { %v505_v4 = vpop.xlane.xlu0 %504 }
 0x4b3   : > { %814 = vrcp.f32 %v505_v4 }
 0x4b6   : > { %v512_v5 = vpop.permute.xlu0 %511 }
 0x4b7   : > { %761 = vmatpush3.bf16.msra.mxu1 %v512_v5 }
 0x4b8   : > { %766 = vmatprep.subr.bf16.mxu1 %v824_v0 }
 0x4b9   : > { %v813_v6 = vpop.eup %812 }
 0x4ba   : > { %v508_v8 = vmul.f32 %v813_v6, %v809_v62 }
 0x4bd   : > { %v815_v7 = vpop.eup %814 }
 0x4be   : > { %v509_v9 = vmul.f32 %v815_v7, %v811_v1 }
 0x4c0   : > { %v510_v11 = vpack.c.bf16 %v509_v9, %v508_v8 }
 0x4c2   : > { %763 = vmatmul.mubr.msk.bf16.vlgmr.msra.gmra.mrb[4].mxu1 %vm298_vm3, %v510_v11 }
 0x4c3   : > { %767 = vmatpush3.bf16.msra.mxu1 %v798_v10  ;;  %770 = vmatprep.mubr.msk.bf16.mxu1 %vm825_vm0, %v824_v0 }
 0x4c4   : > { %768 = vmatprep.subr.bf16.mxu1 %v824_v0  ;;  %v702_v0 = vld [vmem:[%s961_s2] ss:$0 sm:$0xff] }
 0x4c5   : > { %v237_v20 = vadd.f32 %v702_v0, %v228_v18  ;;  %v238_v21 = vadd.f32 %v702_v0, %v229_v19 }
 0x4c7   : > { %769 = vmatpush3.bf16.msra.mxu1 %v799_v12 }
 0x595   : > { %v551_v13 = vpop.f32.mrb[4].mxu1 }
 0x596   : > { %v764_v14 = vpop.f32.mrb[5].mxu1 }
 0x597   : > { %v554_v15 = vpop.f32.mrb[6].mxu1 }
 0x598   : > { %v558_v16 = vpack.c.bf16 %v554_v15, %v551_v13  ;;  %v765_v17 = vpop.f32.mrb[7].mxu1 }
 0x59a   : > { %771 = vmatmul.mubr.msk.bf16.vlgmr.msra.gmra.mrb[0].mxu1 %vm246_vm1, %v558_v16 }
 0x66d   : > { %v612_v22 = vpop.f32.mrb[0].mxu1 }
 0x66e   : > { %v774_v23 = vadd.f32 %v612_v22, %v237_v20  ;;  %v772_v24 = vpop.f32.mrb[1].mxu1 }
 0x66f   : > { %v615_v25 = vpop.f32.mrb[2].mxu1 }
 0x670   : > { %622 = vst.msk [vmem:[%s217_s13] sm:$0xff] %vm621_vm5, %v774_v23  ;;  %v775_v26 = vadd.f32 %v615_v25, %v238_v21  ;;  %v773_v27 = vpop.f32.mrb[3].mxu1 }
 0x672   : > { %623 = vst.msk [vmem:[%s217_s13 + $0x8] sm:$0xff] %vm621_vm5, %v775_v26 }
 0x673 PF: > { %s14_s15 = sadd.s32 1, %s822_s15  }
 0x674   : > { %p11_p4 = scmp.ge.s32.totalorder %s14_s15, 5  }
 0x676   :  { %13 = sbr.rel (!%p11_p4) target bundleno = 1 (0x1), region = 69 }

// kernel: custom_clip_forward.32
= control target key start
LH: loop header
LB: loop body
LE: loop exit
PB: predicated region body
PF: predicated region fallthrough
CT: control target
= control target key end

     0   :  { %vm27_vm0 = vcmask 523264   ;;  %v375_v50 = vmov 0   ;;  %vm304_vm1 = vcmask 1043456   ;;  %vm305_vm2 = vcmask 523268   ;;  %s536_s0 = inlined_call_operand.vmem [shape: f32[48,64], index: 0, kind: input, shape index: {}]   ;;  %s537_s1 = inlined_call_operand.vmem [shape: bf16[64,192], index: 1, kind: input, shape index: {}]   ;;  %s538_s2 = inlined_call_operand.vmem [shape: f32[1,64], index: 2, kind: input, shape index: {}]   ;;  %s539_s3 = inlined_call_operand.vmem [shape: f32[1,64], index: 3, kind: input, shape index: {}]   ;;  %s540_s4 = inlined_call_operand.vmem [shape: f32[1,192], index: 4, kind: input, shape index: {}]   ;;  %s541_s5 = inlined_call_operand.vmem [shape: bf16[48,192], index: 5, kind: output, shape index: {}]  }
   0x1   :  { %v23_v0 = vld [vmem:[%s536_s0 + $0x10] sm:$0xff]  ;;  %v24_v1 = vld [vmem:[%s536_s0 + $0x18] sm:$0xff]  ;;  %v21_v2 = vld [vmem:[%s536_s0] sm:$0xff]  ;;  %247 = vmatprep.mubr.bf16.mxu1 %v375_v50  ;;  %237 = vmatprep.mubr.bf16.mxu0 %v375_v50 }
   0x2   :  { %v34_v3 = vsel %vm27_vm0, %v23_v0, 0.0  ;;  %v28_v4 = vsel %vm27_vm0, %v21_v2, 0.0  ;;  %v22_v5 = vld [vmem:[%s536_s0 + $0x8] sm:$0xff]  ;;  %v37_v6 = vsel %vm27_vm0, %v24_v1, 0.0  ;;  %v25_v8 = vld [vmem:[%s536_s0 + $0x20] sm:$0xff]  ;;  %vm502_vm3 = vmor %vm305_vm2, %vm304_vm1 }
   0x3   :  { %35 = vadd.xlane.f32.xlu0 %v34_v3  ;;  %29 = vadd.xlane.f32.xlu1 %v28_v4  ;;  %v31_v7 = vsel %vm27_vm0, %v22_v5, 0.0  ;;  %v26_v9 = vld [vmem:[%s536_s0 + $0x28] sm:$0xff]  ;;  %v40_v10 = vsel %vm27_vm0, %v25_v8, 0.0  ;;  %v354_v44 = vld [vmem:[%s537_s1 + $0x14] ss:$8 sps:$4 sm:$0xff]  }
   0x4   :  { %v43_v11 = vsel %vm27_vm0, %v26_v9, 0.0  ;;  %v351_v42 = vld [vmem:[%s537_s1 + $0x4] ss:$8 sps:$4 sm:$0xff]   ;;  %v353_v43 = vld [vmem:[%s537_s1] ss:$8 sps:$4 sm:$0xff]  }
   0x5   :  { %342 = vmatprep.subr.bf16.mxu1 %v351_v42  ;;  %205 = vmatprep.subr.bf16.mxu0 %v351_v42  ;;  %v356_v45 = vld [vmem:[%s537_s1 + $0x10] ss:$8 sps:$4 sm:$0xff]   ;;  %v357_v46 = vld [vmem:[%s537_s1 + $0x24] ss:$8 sps:$4 sm:$0xff]   ;;  %v359_v47 = vld [vmem:[%s537_s1 + $0x20] ss:$8 sps:$4 sm:$0xff]  }
   0x6   :  { %346 = vmatpush1.bf16.msra.mxu1 %v353_v43  ;;  %206 = vmatpush1.bf16.msra.mxu0 %v353_v43  ;;  %v360_v48 = vld [vmem:[%s537_s1 + $0x34] ss:$8 sps:$4 sm:$0xff]   ;;  %v362_v49 = vld [vmem:[%s537_s1 + $0x30] ss:$8 sps:$4 sm:$0xff]  }
   0x7   :  { %38 = vadd.xlane.f32.xlu0 %v37_v6  ;;  %32 = vadd.xlane.f32.xlu1 %v31_v7  ;;  %v317_v7 = vld [vmem:[%s538_s2] ss:$0 sm:$0xff] }
   0x8   :  { %343 = vmatprep.subr.bf16.mxu1 %v354_v44  ;;  %207 = vmatprep.subr.bf16.mxu0 %v354_v44 }
   0xa   :  { %347 = vmatpush1.bf16.msra.mxu1 %v356_v45  ;;  %208 = vmatpush1.bf16.msra.mxu0 %v356_v45 }
   0xb   :  { %41 = vadd.xlane.f32.xlu0 %v40_v10  ;;  %44 = vadd.xlane.f32.xlu1 %v43_v11 }
   0xc   :  { %344 = vmatprep.subr.bf16.mxu1 %v357_v46  ;;  %209 = vmatprep.subr.bf16.mxu0 %v357_v46 }
   0xe   :  { %348 = vmatpush1.bf16.msra.mxu1 %v359_v47  ;;  %210 = vmatpush1.bf16.msra.mxu0 %v359_v47 }
   0xf   :  { %345 = vmatprep.subr.bf16.mxu1 %v360_v48  ;;  %211 = vmatprep.subr.bf16.mxu0 %v360_v48 }
  0x12   :  { %349 = vmatpush1.bf16.msra.mxu1 %v362_v49  ;;  %212 = vmatpush1.bf16.msra.mxu0 %v362_v49 }
  0x90   :  { %v36_v12 = vpop.xlane.xlu0 %35  ;;  %v30_v13 = vpop.xlane.xlu1 %29 }
  0x91   :  { %v49_v14 = vmul.f32 0.015625, %v36_v12  ;;  %v47_v15 = vmul.f32 0.015625, %v30_v13  ;;  %v318_v13 = vld [vmem:[%s539_s3] ss:$0 sm:$0xff] }
  0x93   :  { %v430_v16 = vsub.f32 %v23_v0, %v49_v14  ;;  %v432_v17 = vsub.f32 %v21_v2, %v47_v15 }
  0x94   :  { %v39_v18 = vpop.xlane.xlu0 %38  ;;  %v33_v19 = vpop.xlane.xlu1 %32 }
  0x95   :  { %v50_v20 = vmul.f32 0.015625, %v39_v18  ;;  %v61_v21 = vmul.f32 %v430_v16, %v430_v16  ;;  %v48_v22 = vmul.f32 0.015625, %v33_v19  ;;  %v59_v23 = vmul.f32 %v432_v17, %v432_v17 }
  0x97   :  { %v438_v24 = vsub.f32 %v24_v1, %v50_v20  ;;  %v71_v25 = vsel %vm27_vm0, %v61_v21, 0.0  ;;  %v441_v26 = vsub.f32 %v22_v5, %v48_v22  ;;  %v65_v28 = vsel %vm27_vm0, %v59_v23, 0.0 }
  0x98   :  { %72 = vadd.xlane.f32.xlu0 %v71_v25  ;;  %v42_v27 = vpop.xlane.xlu0 %41  ;;  %v45_v29 = vpop.xlane.xlu1 %44 }
  0x99   :  { %v51_v30 = vmul.f32 0.015625, %v42_v27  ;;  %v62_v31 = vmul.f32 %v438_v24, %v438_v24  ;;  %v52_v32 = vmul.f32 0.015625, %v45_v29  ;;  %v60_v33 = vmul.f32 %v441_v26, %v441_v26 }
  0x9b   :  { %v448_v34 = vsub.f32 %v25_v8, %v51_v30  ;;  %v74_v35 = vsel %vm27_vm0, %v62_v31, 0.0  ;;  %v451_v36 = vsub.f32 %v26_v9, %v52_v32  ;;  %v68_v38 = vsel %vm27_vm0, %v60_v33, 0.0 }
  0x9c   :  { %75 = vadd.xlane.f32.xlu1 %v74_v35  ;;  %66 = vadd.xlane.f32.xlu0 %v65_v28 }
  0x9d   :  { %v63_v37 = vmul.f32 %v448_v34, %v448_v34  ;;  %v64_v39 = vmul.f32 %v451_v36, %v451_v36 }
  0x9f   :  { %v77_v40 = vsel %vm27_vm0, %v63_v37, 0.0  ;;  %v80_v41 = vsel %vm27_vm0, %v64_v39, 0.0 }
  0xa0   :  { %78 = vadd.xlane.f32.xlu0 %v77_v40  ;;  %69 = vadd.xlane.f32.xlu1 %v68_v38 }
  0xa4   :  { %81 = vadd.xlane.f32.xlu1 %v80_v41 }
 0x125   :  { %v73_v51 = vpop.xlane.xlu0 %72 }
 0x126   :  { %v85_v52 = vmul.f32 0.015625, %v73_v51 }
 0x128   :  { %v91_v53 = vadd.f32 1e-05, %v85_v52 }
 0x129   :  { %v67_v54 = vpop.xlane.xlu0 %66  ;;  %v76_v55 = vpop.xlane.xlu1 %75 }
 0x12a   :  { %363 = vrsqrt.f32 %v91_v53  ;;  %v83_v56 = vmul.f32 0.015625, %v67_v54  ;;  %v86_v57 = vmul.f32 0.015625, %v76_v55 }
 0x12c   :  { %v89_v58 = vadd.f32 1e-05, %v83_v56  ;;  %v92_v59 = vadd.f32 1e-05, %v86_v57 }
 0x12d   :  { %v79_v60 = vpop.xlane.xlu0 %78  ;;  %v70_v61 = vpop.xlane.xlu1 %69 }
 0x12e   :  { %365 = vrsqrt.f32 %v89_v58  ;;  %v87_v62 = vmul.f32 0.015625, %v79_v60  ;;  %v84_v63 = vmul.f32 0.015625, %v70_v61 }
 0x12f   :  { %367 = vrsqrt.f32 %v92_v59 }
 0x130   :  { %v93_v0 = vadd.f32 1e-05, %v87_v62  ;;  %v90_v1 = vadd.f32 1e-05, %v84_v63 }
 0x131   :  { %v82_v2 = vpop.xlane.xlu1 %81 }
 0x132   :  { %369 = vrsqrt.f32 %v93_v0  ;;  %v88_v3 = vmul.f32 0.015625, %v82_v2 }
 0x133   :  { %371 = vrsqrt.f32 %v90_v1 }
 0x134   :  { %v364_v4 = vpop.eup %363  ;;  %v94_v5 = vadd.f32 1e-05, %v88_v3 }
 0x135   :  { %v103_v6 = vmul.f32 %v364_v4, %v430_v16 }
 0x136   :  { %373 = vrsqrt.f32 %v94_v5 }
 0x137   :  { %v116_v12 = vmul.f32 %v317_v7, %v103_v6 }
 0x138   :  { %v366_v8 = vpop.eup %365 }
 0x139   :  { %v368_v9 = vpop.eup %367  ;;  %v101_v10 = vmul.f32 %v366_v8, %v432_v17  ;;  %v129_v20 = vadd.f32 %v318_v13, %v116_v12 }
 0x13a   :  { %v104_v11 = vmul.f32 %v368_v9, %v438_v24 }
 0x13b   :  { %v114_v22 = vmul.f32 %v317_v7, %v101_v10 }
 0x13c   :  { %v370_v14 = vpop.eup %369  ;;  %v117_v15 = vmul.f32 %v317_v7, %v104_v11 }
 0x13d   :  { %v372_v18 = vpop.eup %371  ;;  %v105_v16 = vmul.f32 %v370_v14, %v448_v34  ;;  %v127_v28 = vadd.f32 %v318_v13, %v114_v22  ;;  %v146_v34 = vlaneseq }
 0x13e   :  { %v102_v19 = vmul.f32 %v372_v18, %v441_v26  ;;  %v130_v21 = vadd.f32 %v318_v13, %v117_v15 }
 0x13f   :  { %v118_v27 = vmul.f32 %v317_v7, %v105_v16  ;;  %v147_v35 = vshrl.u32 %v146_v34, 7 }
 0x140   :  { %v374_v23 = vpop.eup %373  ;;  %v134_v25 = vpack.c.bf16 %v130_v21, %v129_v20  ;;  %v115_v17 = vmul.f32 %v317_v7, %v102_v19 }
 0x141   :  { %v106_v24 = vmul.f32 %v374_v23, %v451_v36  ;;  %v131_v32 = vadd.f32 %v318_v13, %v118_v27  ;;  %v148_v37 = vsub.s32 0, %v147_v35  ;;  %v144_v36 = vld [vmem:[%s540_s4] sm:$0x3]  ;;  %v152_v38 = vsub.s32 1, %v147_v35 }
 0x142   :  { %328 = vmatmul.mubr.msk.bf16.vlgmr.msra.gmra.mrb[0].mxu1 %vm27_vm0, %v134_v25  ;;  %v128_v29 = vadd.f32 %v318_v13, %v115_v17 }
 0x143   :  { %257 = vmatprep.mubr.bf16.mxu1 %v375_v50  ;;  %v119_v30 = vmul.f32 %v317_v7, %v106_v24  ;;  %v149_v39 = vrot.slane %v144_v36, %v148_v37  ;;  %v153_v40 = vrot.slane %v144_v36, %v152_v38 }
 0x144   :  { %v133_v31 = vpack.c.bf16 %v128_v29, %v127_v28 }
 0x145   :  { %v132_v33 = vadd.f32 %v318_v13, %v119_v30 }
 0x146   :  { %327 = vmatmul.mubr.msk.bf16.vlgmr.msra.gmra.mrb[0].mxu0 %vm27_vm0, %v133_v31 }
 0x147   :  { %v135_v26 = vpack.c.bf16 %v132_v33, %v131_v32 }
 0x14a   :  { %329 = vmatmul.mubr.msk.bf16.gmra.mrb[4].mxu1 %vm27_vm0, %v135_v26 }
 0x215   :  { %v249_v41 = vpop.f32.mrb[0].mxu1 }
 0x216   :  { %v250_v42 = vadd.f32 %v249_v41, %v149_v39  ;;  %v251_v43 = vpop.f32.mrb[1].mxu1 }
 0x217   :  { %v252_v44 = vadd.f32 %v251_v43, %v153_v40  ;;  %v253_v45 = vpop.f32.mrb[2].mxu1 }
 0x218   :  { %v254_v47 = vadd.f32 %v253_v45, %v149_v39  ;;  %v255_v48 = vpop.f32.mrb[3].mxu1 }
 0x219   :  { %v338_v49 = vpack.c.bf16 %v252_v44, %v250_v42  ;;  %v256_v50 = vadd.f32 %v255_v48, %v153_v40  ;;  %v239_v51 = vpop.f32.mrb[0].mxu0 }
 0x21a   :  { %v240_v52 = vadd.f32 %v239_v51, %v149_v39  ;;  %v241_v53 = vpop.f32.mrb[1].mxu0 }
 0x21b   :  { %309 = vst.msk [vmem:[%s541_s5 + $0x10] sm:$0xff] %vm502_vm3, %v338_v49  ;;  %v339_v54 = vpack.c.bf16 %v256_v50, %v254_v47  ;;  %v242_v55 = vadd.f32 %v241_v53, %v153_v40  ;;  %v243_v56 = vpop.f32.mrb[2].mxu0 }
 0x21c   :  { %v244_v57 = vadd.f32 %v243_v56, %v149_v39  ;;  %v245_v58 = vpop.f32.mrb[3].mxu0 }
 0x21d   :  { %310 = vst.msk [vmem:[%s541_s5 + $0x18] sm:$0xff] %vm502_vm3, %v339_v54  ;;  %v336_v59 = vpack.c.bf16 %v242_v55, %v240_v52  ;;  %v246_v60 = vadd.f32 %v245_v58, %v153_v40  ;;  %v259_v61 = vpop.f32.mrb[4].mxu1 }
 0x21e   :  { %v260_v62 = vadd.f32 %v259_v61, %v149_v39  ;;  %v261_v63 = vpop.f32.mrb[5].mxu1 }
 0x21f   :  { %307 = vst.msk [vmem:[%s541_s5] sm:$0xff] %vm502_vm3, %v336_v59  ;;  %v337_v0 = vpack.c.bf16 %v246_v60, %v244_v57  ;;  %v262_v1 = vadd.f32 %v261_v63, %v153_v40  ;;  %v263_v2 = vpop.f32.mrb[6].mxu1 }
 0x220   :  { %v264_v3 = vadd.f32 %v263_v2, %v149_v39  ;;  %v265_v4 = vpop.f32.mrb[7].mxu1 }
 0x221   :  { %308 = vst.msk [vmem:[%s541_s5 + $0x8] sm:$0xff] %vm502_vm3, %v337_v0  ;;  %v340_v5 = vpack.c.bf16 %v262_v1, %v260_v62  ;;  %v266_v6 = vadd.f32 %v265_v4, %v153_v40 }
 0x223   :  { %311 = vst.msk [vmem:[%s541_s5 + $0x20] sm:$0xff] %vm502_vm3, %v340_v5  ;;  %v341_v7 = vpack.c.bf16 %v266_v6, %v264_v3 }
 0x225   :  { %312 = vst.msk [vmem:[%s541_s5 + $0x28] sm:$0xff] %vm502_vm3, %v341_v7 }

// kernel: custom_clip_forward.34
= control target key start
LH: loop header
LB: loop body
LE: loop exit
PB: predicated region body
PF: predicated region fallthrough
CT: control target
= control target key end

     0   :  { %vm27_vm0 = vcmask 523264   ;;  %v528_v50 = vmov 0   ;;  %s721_s0 = inlined_call_operand.vmem [shape: f32[48,64], index: 0, kind: input, shape index: {}]   ;;  %s722_s1 = inlined_call_operand.vmem [shape: bf16[64,256], index: 1, kind: input, shape index: {}]   ;;  %s723_s2 = inlined_call_operand.vmem [shape: f32[1,64], index: 2, kind: input, shape index: {}]   ;;  %s724_s3 = inlined_call_operand.vmem [shape: f32[1,64], index: 3, kind: input, shape index: {}]   ;;  %s725_s4 = inlined_call_operand.vmem [shape: f32[1,256], index: 4, kind: input, shape index: {}]   ;;  %s726_s5 = inlined_call_operand.vmem [shape: bf16[48,256], index: 5, kind: output, shape index: {}]  }
   0x1   :  { %v23_v0 = vld [vmem:[%s721_s0 + $0x10] sm:$0xff]  ;;  %v24_v1 = vld [vmem:[%s721_s0 + $0x18] sm:$0xff]  ;;  %v21_v2 = vld [vmem:[%s721_s0] sm:$0xff]  ;;  %247 = vmatprep.mubr.bf16.mxu1 %v528_v50  ;;  %237 = vmatprep.mubr.bf16.mxu0 %v528_v50 }
   0x2   :  { %v34_v3 = vsel %vm27_vm0, %v23_v0, 0.0  ;;  %v28_v4 = vsel %vm27_vm0, %v21_v2, 0.0  ;;  %v22_v5 = vld [vmem:[%s721_s0 + $0x8] sm:$0xff]  ;;  %v37_v6 = vsel %vm27_vm0, %v24_v1, 0.0  ;;  %v25_v8 = vld [vmem:[%s721_s0 + $0x20] sm:$0xff] }
   0x3   :  { %35 = vadd.xlane.f32.xlu0 %v34_v3  ;;  %29 = vadd.xlane.f32.xlu1 %v28_v4  ;;  %v31_v7 = vsel %vm27_vm0, %v22_v5, 0.0  ;;  %v26_v9 = vld [vmem:[%s721_s0 + $0x28] sm:$0xff]  ;;  %v40_v10 = vsel %vm27_vm0, %v25_v8, 0.0  ;;  %v459_v44 = vld [vmem:[%s722_s1 + $0x14] ss:$8 sps:$4 sm:$0xff]  }
   0x4   :  { %v43_v11 = vsel %vm27_vm0, %v26_v9, 0.0  ;;  %v456_v42 = vld [vmem:[%s722_s1 + $0x4] ss:$8 sps:$4 sm:$0xff]   ;;  %v458_v43 = vld [vmem:[%s722_s1] ss:$8 sps:$4 sm:$0xff]  }
   0x5   :  { %447 = vmatprep.subr.bf16.mxu1 %v456_v42  ;;  %205 = vmatprep.subr.bf16.mxu0 %v456_v42  ;;  %v461_v45 = vld [vmem:[%s722_s1 + $0x10] ss:$8 sps:$4 sm:$0xff]   ;;  %v462_v46 = vld [vmem:[%s722_s1 + $0x24] ss:$8 sps:$4 sm:$0xff]   ;;  %v464_v47 = vld [vmem:[%s722_s1 + $0x20] ss:$8 sps:$4 sm:$0xff]  }
   0x6   :  { %451 = vmatpush1.bf16.msra.mxu1 %v458_v43  ;;  %206 = vmatpush1.bf16.msra.mxu0 %v458_v43  ;;  %v465_v48 = vld [vmem:[%s722_s1 + $0x34] ss:$8 sps:$4 sm:$0xff]   ;;  %v467_v49 = vld [vmem:[%s722_s1 + $0x30] ss:$8 sps:$4 sm:$0xff]  }
   0x7   :  { %38 = vadd.xlane.f32.xlu0 %v37_v6  ;;  %32 = vadd.xlane.f32.xlu1 %v31_v7  ;;  %v410_v7 = vld [vmem:[%s723_s2] ss:$0 sm:$0xff] }
   0x8   :  { %448 = vmatprep.subr.bf16.mxu1 %v459_v44  ;;  %207 = vmatprep.subr.bf16.mxu0 %v459_v44 }
   0xa   :  { %452 = vmatpush1.bf16.msra.mxu1 %v461_v45  ;;  %208 = vmatpush1.bf16.msra.mxu0 %v461_v45 }
   0xb   :  { %41 = vadd.xlane.f32.xlu0 %v40_v10  ;;  %44 = vadd.xlane.f32.xlu1 %v43_v11 }
   0xc   :  { %449 = vmatprep.subr.bf16.mxu1 %v462_v46  ;;  %209 = vmatprep.subr.bf16.mxu0 %v462_v46 }
   0xe   :  { %453 = vmatpush1.bf16.msra.mxu1 %v464_v47  ;;  %210 = vmatpush1.bf16.msra.mxu0 %v464_v47 }
   0xf   :  { %450 = vmatprep.subr.bf16.mxu1 %v465_v48  ;;  %211 = vmatprep.subr.bf16.mxu0 %v465_v48 }
  0x12   :  { %454 = vmatpush1.bf16.msra.mxu1 %v467_v49  ;;  %212 = vmatpush1.bf16.msra.mxu0 %v467_v49 }
  0x90   :  { %v36_v12 = vpop.xlane.xlu0 %35  ;;  %v30_v13 = vpop.xlane.xlu1 %29 }
  0x91   :  { %v49_v14 = vmul.f32 0.015625, %v36_v12  ;;  %v47_v15 = vmul.f32 0.015625, %v30_v13  ;;  %v411_v13 = vld [vmem:[%s724_s3] ss:$0 sm:$0xff] }
  0x93   :  { %v583_v16 = vsub.f32 %v23_v0, %v49_v14  ;;  %v585_v17 = vsub.f32 %v21_v2, %v47_v15 }
  0x94   :  { %v39_v18 = vpop.xlane.xlu0 %38  ;;  %v33_v19 = vpop.xlane.xlu1 %32 }
  0x95   :  { %v50_v20 = vmul.f32 0.015625, %v39_v18  ;;  %v61_v21 = vmul.f32 %v583_v16, %v583_v16  ;;  %v48_v22 = vmul.f32 0.015625, %v33_v19  ;;  %v59_v23 = vmul.f32 %v585_v17, %v585_v17 }
  0x97   :  { %v591_v24 = vsub.f32 %v24_v1, %v50_v20  ;;  %v71_v25 = vsel %vm27_vm0, %v61_v21, 0.0  ;;  %v594_v26 = vsub.f32 %v22_v5, %v48_v22  ;;  %v65_v28 = vsel %vm27_vm0, %v59_v23, 0.0 }
  0x98   :  { %72 = vadd.xlane.f32.xlu0 %v71_v25  ;;  %v42_v27 = vpop.xlane.xlu0 %41  ;;  %v45_v29 = vpop.xlane.xlu1 %44 }
  0x99   :  { %v51_v30 = vmul.f32 0.015625, %v42_v27  ;;  %v62_v31 = vmul.f32 %v591_v24, %v591_v24  ;;  %v52_v32 = vmul.f32 0.015625, %v45_v29  ;;  %v60_v33 = vmul.f32 %v594_v26, %v594_v26 }
  0x9b   :  { %v601_v34 = vsub.f32 %v25_v8, %v51_v30  ;;  %v74_v35 = vsel %vm27_vm0, %v62_v31, 0.0  ;;  %v604_v36 = vsub.f32 %v26_v9, %v52_v32  ;;  %v68_v38 = vsel %vm27_vm0, %v60_v33, 0.0 }
  0x9c   :  { %75 = vadd.xlane.f32.xlu1 %v74_v35  ;;  %66 = vadd.xlane.f32.xlu0 %v65_v28 }
  0x9d   :  { %v63_v37 = vmul.f32 %v601_v34, %v601_v34  ;;  %v64_v39 = vmul.f32 %v604_v36, %v604_v36 }
  0x9f   :  { %v77_v40 = vsel %vm27_vm0, %v63_v37, 0.0  ;;  %v80_v41 = vsel %vm27_vm0, %v64_v39, 0.0 }
  0xa0   :  { %78 = vadd.xlane.f32.xlu0 %v77_v40  ;;  %69 = vadd.xlane.f32.xlu1 %v68_v38 }
  0xa4   :  { %81 = vadd.xlane.f32.xlu1 %v80_v41 }
 0x125   :  { %v73_v51 = vpop.xlane.xlu0 %72 }
 0x126   :  { %v85_v52 = vmul.f32 0.015625, %v73_v51 }
 0x128   :  { %v91_v53 = vadd.f32 1e-05, %v85_v52 }
 0x129   :  { %v67_v54 = vpop.xlane.xlu0 %66  ;;  %v76_v55 = vpop.xlane.xlu1 %75 }
 0x12a   :  { %468 = vrsqrt.f32 %v91_v53  ;;  %v83_v56 = vmul.f32 0.015625, %v67_v54  ;;  %v86_v57 = vmul.f32 0.015625, %v76_v55 }
 0x12c   :  { %v89_v58 = vadd.f32 1e-05, %v83_v56  ;;  %v92_v59 = vadd.f32 1e-05, %v86_v57 }
 0x12d   :  { %v79_v60 = vpop.xlane.xlu0 %78  ;;  %v70_v61 = vpop.xlane.xlu1 %69 }
 0x12e   :  { %470 = vrsqrt.f32 %v89_v58  ;;  %v87_v62 = vmul.f32 0.015625, %v79_v60  ;;  %v84_v63 = vmul.f32 0.015625, %v70_v61 }
 0x12f   :  { %472 = vrsqrt.f32 %v92_v59 }
 0x130   :  { %v93_v0 = vadd.f32 1e-05, %v87_v62  ;;  %v90_v1 = vadd.f32 1e-05, %v84_v63 }
 0x131   :  { %v82_v2 = vpop.xlane.xlu1 %81 }
 0x132   :  { %474 = vrsqrt.f32 %v93_v0  ;;  %v88_v3 = vmul.f32 0.015625, %v82_v2 }
 0x133   :  { %476 = vrsqrt.f32 %v90_v1 }
 0x134   :  { %v469_v4 = vpop.eup %468  ;;  %v94_v5 = vadd.f32 1e-05, %v88_v3 }
 0x135   :  { %v103_v6 = vmul.f32 %v469_v4, %v583_v16 }
 0x136   :  { %478 = vrsqrt.f32 %v94_v5 }
 0x137   :  { %v116_v12 = vmul.f32 %v410_v7, %v103_v6 }
 0x138   :  { %v471_v8 = vpop.eup %470 }
 0x139   :  { %v473_v9 = vpop.eup %472  ;;  %v101_v10 = vmul.f32 %v471_v8, %v585_v17  ;;  %v129_v20 = vadd.f32 %v411_v13, %v116_v12 }
 0x13a   :  { %v104_v11 = vmul.f32 %v473_v9, %v591_v24 }
 0x13b   :  { %v114_v22 = vmul.f32 %v410_v7, %v101_v10 }
 0x13c   :  { %v475_v14 = vpop.eup %474  ;;  %v117_v15 = vmul.f32 %v410_v7, %v104_v11 }
 0x13d   :  { %v477_v18 = vpop.eup %476  ;;  %v105_v16 = vmul.f32 %v475_v14, %v601_v34  ;;  %v127_v28 = vadd.f32 %v411_v13, %v114_v22  ;;  %v146_v34 = vlaneseq }
 0x13e   :  { %v102_v19 = vmul.f32 %v477_v18, %v594_v26  ;;  %v130_v21 = vadd.f32 %v411_v13, %v117_v15 }
 0x13f   :  { %v118_v27 = vmul.f32 %v410_v7, %v105_v16  ;;  %v147_v35 = vshrl.u32 %v146_v34, 7 }
 0x140   :  { %v479_v23 = vpop.eup %478  ;;  %v134_v25 = vpack.c.bf16 %v130_v21, %v129_v20  ;;  %v115_v17 = vmul.f32 %v410_v7, %v102_v19 }
 0x141   :  { %v106_v24 = vmul.f32 %v479_v23, %v604_v36  ;;  %v131_v32 = vadd.f32 %v411_v13, %v118_v27  ;;  %v148_v37 = vsub.s32 0, %v147_v35  ;;  %v144_v36 = vld [vmem:[%s725_s4] sm:$0x3]  ;;  %v152_v38 = vsub.s32 1, %v147_v35 }
 0x142   :  { %421 = vmatmul.mubr.msk.bf16.vlgmr.msra.gmra.mrb[0].mxu1 %vm27_vm0, %v134_v25  ;;  %v128_v29 = vadd.f32 %v411_v13, %v115_v17 }
 0x143   :  { %257 = vmatprep.mubr.bf16.mxu1 %v528_v50  ;;  %v119_v30 = vmul.f32 %v410_v7, %v106_v24  ;;  %v149_v39 = vrot.slane %v144_v36, %v148_v37  ;;  %v153_v40 = vrot.slane %v144_v36, %v152_v38 }
 0x144   :  { %v133_v31 = vpack.c.bf16 %v128_v29, %v127_v28 }
 0x145   :  { %v132_v33 = vadd.f32 %v411_v13, %v119_v30 }
 0x146   :  { %420 = vmatmul.mubr.msk.bf16.vlgmr.msra.gmra.mrb[0].mxu0 %vm27_vm0, %v133_v31 }
 0x147   :  { %v135_v26 = vpack.c.bf16 %v132_v33, %v131_v32 }
 0x14a   :  { %422 = vmatmul.mubr.msk.bf16.gmra.mrb[4].mxu1 %vm27_vm0, %v135_v26 }
 0x215   :  { %v249_v41 = vpop.f32.mrb[0].mxu1 }
 0x216   :  { %v655_v42 = vadd.f32 %v249_v41, %v149_v39  ;;  %v251_v43 = vpop.f32.mrb[1].mxu1 }
 0x217   :  { %v657_v44 = vadd.f32 %v251_v43, %v153_v40  ;;  %v253_v45 = vpop.f32.mrb[2].mxu1 }
 0x218   :  { %v427_v46 = vmul.f32 -1.702, %v655_v42  ;;  %v660_v47 = vadd.f32 %v253_v45, %v149_v39  ;;  %v255_v48 = vpop.f32.mrb[3].mxu1 }
 0x219   :  { %v428_v49 = vmul.f32 -1.702, %v657_v44  ;;  %v663_v50 = vadd.f32 %v255_v48, %v153_v40  ;;  %v239_v51 = vpop.f32.mrb[0].mxu0 }
 0x21a   :  { %v300_v52 = vmul.f32 1.442695, %v427_v46  ;;  %v429_v53 = vmul.f32 -1.702, %v660_v47  ;;  %v666_v54 = vadd.f32 %v239_v51, %v149_v39  ;;  %v241_v55 = vpop.f32.mrb[1].mxu0 }
 0x21b   :  { %v302_v56 = vmul.f32 1.442695, %v428_v49  ;;  %v430_v57 = vmul.f32 -1.702, %v663_v50  ;;  %v669_v58 = vadd.f32 %v241_v55, %v153_v40  ;;  %v243_v59 = vpop.f32.mrb[2].mxu0 }
 0x21c   :  { %480 = vpow2.f32 %v300_v52  ;;  %v304_v60 = vmul.f32 1.442695, %v429_v53  ;;  %v423_v61 = vmul.f32 -1.702, %v666_v54  ;;  %v672_v62 = vadd.f32 %v243_v59, %v149_v39  ;;  %v245_v63 = vpop.f32.mrb[3].mxu0 }
 0x21d   :  { %482 = vpow2.f32 %v302_v56  ;;  %v306_v0 = vmul.f32 1.442695, %v430_v57  ;;  %v424_v1 = vmul.f32 -1.702, %v669_v58  ;;  %v675_v2 = vadd.f32 %v245_v63, %v153_v40  ;;  %v259_v3 = vpop.f32.mrb[4].mxu1 }
 0x21e   :  { %484 = vpow2.f32 %v304_v60  ;;  %v292_v4 = vmul.f32 1.442695, %v423_v61  ;;  %v425_v5 = vmul.f32 -1.702, %v672_v62  ;;  %v678_v6 = vadd.f32 %v259_v3, %v149_v39  ;;  %v261_v7 = vpop.f32.mrb[5].mxu1 }
 0x21f   :  { %486 = vpow2.f32 %v306_v0  ;;  %v294_v8 = vmul.f32 1.442695, %v424_v1  ;;  %v426_v9 = vmul.f32 -1.702, %v675_v2  ;;  %v681_v10 = vadd.f32 %v261_v7, %v153_v40  ;;  %v263_v11 = vpop.f32.mrb[6].mxu1 }
 0x220   :  { %488 = vpow2.f32 %v292_v4  ;;  %v296_v12 = vmul.f32 1.442695, %v425_v5  ;;  %v431_v13 = vmul.f32 -1.702, %v678_v6  ;;  %v684_v14 = vadd.f32 %v263_v11, %v149_v39  ;;  %v265_v15 = vpop.f32.mrb[7].mxu1 }
 0x221   :  { %490 = vpow2.f32 %v294_v8  ;;  %v298_v18 = vmul.f32 1.442695, %v426_v9  ;;  %v432_v16 = vmul.f32 -1.702, %v681_v10  ;;  %v687_v19 = vadd.f32 %v265_v15, %v153_v40 }
 0x222   :  { %492 = vpow2.f32 %v296_v12  ;;  %v308_v20 = vmul.f32 1.442695, %v431_v13  ;;  %v433_v21 = vmul.f32 -1.702, %v684_v14 }
 0x223   :  { %494 = vpow2.f32 %v298_v18  ;;  %v310_v22 = vmul.f32 1.442695, %v432_v16  ;;  %v434_v23 = vmul.f32 -1.702, %v687_v19 }
 0x224   :  { %496 = vpow2.f32 %v308_v20  ;;  %v312_v25 = vmul.f32 1.442695, %v433_v21 }
 0x225   :  { %498 = vpow2.f32 %v310_v22  ;;  %v314_v17 = vmul.f32 1.442695, %v434_v23 }
 0x226   :  { %v481_v24 = vpop.eup %480  ;;  %500 = vpow2.f32 %v312_v25 }
 0x227   :  { %v483_v27 = vpop.eup %482  ;;  %v320_v28 = vadd.f32 1.0, %v481_v24  ;;  %502 = vpow2.f32 %v314_v17 }
 0x228   :  { %v485_v29 = vpop.eup %484  ;;  %v321_v30 = vadd.f32 1.0, %v483_v27 }
 0x229   :  { %v487_v31 = vpop.eup %486  ;;  %504 = vrcp.f32 %v320_v28  ;;  %v322_v32 = vadd.f32 1.0, %v485_v29 }
 0x22a   :  { %v489_v33 = vpop.eup %488  ;;  %506 = vrcp.f32 %v321_v30  ;;  %v323_v26 = vadd.f32 1.0, %v487_v31 }
 0x22b   :  { %v491_v34 = vpop.eup %490  ;;  %508 = vrcp.f32 %v322_v32  ;;  %v316_v35 = vadd.f32 1.0, %v489_v33 }
 0x22c   :  { %v493_v37 = vpop.eup %492  ;;  %510 = vrcp.f32 %v323_v26  ;;  %v317_v36 = vadd.f32 1.0, %v491_v34 }
 0x22d   :  { %v495_v38 = vpop.eup %494  ;;  %512 = vrcp.f32 %v316_v35  ;;  %v318_v39 = vadd.f32 1.0, %v493_v37 }
 0x22e   :  { %v497_v40 = vpop.eup %496  ;;  %514 = vrcp.f32 %v317_v36  ;;  %v319_v41 = vadd.f32 1.0, %v495_v38 }
 0x22f   :  { %v499_v43 = vpop.eup %498  ;;  %516 = vrcp.f32 %v318_v39  ;;  %v324_v45 = vadd.f32 1.0, %v497_v40 }
 0x230   :  { %v501_v46 = vpop.eup %500  ;;  %518 = vrcp.f32 %v319_v41  ;;  %v325_v48 = vadd.f32 1.0, %v499_v43 }
 0x231   :  { %v503_v49 = vpop.eup %502  ;;  %520 = vrcp.f32 %v324_v45  ;;  %v326_v51 = vadd.f32 1.0, %v501_v46 }
 0x232   :  { %522 = vrcp.f32 %v325_v48  ;;  %v327_v52 = vadd.f32 1.0, %v503_v49 }
 0x233   :  { %v505_v53 = vpop.eup %504  ;;  %524 = vrcp.f32 %v326_v51 }
 0x234   :  { %v507_v55 = vpop.eup %506  ;;  %v356_v56 = vmul.f32 %v505_v53, %v655_v42  ;;  %526 = vrcp.f32 %v327_v52 }
 0x235   :  { %v509_v57 = vpop.eup %508  ;;  %v357_v59 = vmul.f32 %v507_v55, %v657_v44 }
 0x236   :  { %v511_v60 = vpop.eup %510  ;;  %v358_v61 = vmul.f32 %v509_v57, %v660_v47 }
 0x237   :  { %v513_v63 = vpop.eup %512  ;;  %v443_v0 = vpack.c.bf16 %v357_v59, %v356_v56  ;;  %v359_v1 = vmul.f32 %v511_v60, %v663_v50 }
 0x238   :  { %v515_v3 = vpop.eup %514  ;;  %v352_v4 = vmul.f32 %v513_v63, %v666_v54 }
 0x239   :  { %v517_v5 = vpop.eup %516  ;;  %402 = vst [vmem:[%s726_s5 + $0x10] sm:$0xff] %v443_v0  ;;  %v444_v42 = vpack.c.bf16 %v359_v1, %v358_v61  ;;  %v353_v7 = vmul.f32 %v515_v3, %v669_v58 }
 0x23a   :  { %v519_v8 = vpop.eup %518  ;;  %v354_v44 = vmul.f32 %v517_v5, %v672_v62 }
 0x23b   :  { %v521_v9 = vpop.eup %520  ;;  %403 = vst [vmem:[%s726_s5 + $0x18] sm:$0xff] %v444_v42  ;;  %v441_v47 = vpack.c.bf16 %v353_v7, %v352_v4  ;;  %v355_v50 = vmul.f32 %v519_v8, %v675_v2 }
 0x23c   :  { %v523_v54 = vpop.eup %522  ;;  %v360_v11 = vmul.f32 %v521_v9, %v678_v6 }
 0x23d   :  { %v525_v12 = vpop.eup %524  ;;  %400 = vst [vmem:[%s726_s5] sm:$0xff] %v441_v47  ;;  %v442_v58 = vpack.c.bf16 %v355_v50, %v354_v44  ;;  %v361_v13 = vmul.f32 %v523_v54, %v681_v10 }
 0x23e   :  { %v527_v62 = vpop.eup %526  ;;  %v362_v15 = vmul.f32 %v525_v12, %v684_v14 }
 0x23f   :  { %401 = vst [vmem:[%s726_s5 + $0x8] sm:$0xff] %v442_v58  ;;  %v445_v18 = vpack.c.bf16 %v361_v13, %v360_v11  ;;  %v363_v2 = vmul.f32 %v527_v62, %v687_v19 }
 0x241   :  { %404 = vst [vmem:[%s726_s5 + $0x20] sm:$0xff] %v445_v18  ;;  %v446_v6 = vpack.c.bf16 %v363_v2, %v362_v15 }
 0x243   :  { %405 = vst [vmem:[%s726_s5 + $0x28] sm:$0xff] %v446_v6 }

// kernel: custom_clip_forward.35
= control target key start
LH: loop header
LB: loop body
LE: loop exit
PB: predicated region body
PF: predicated region fallthrough
CT: control target
= control target key end

     0   :  { %vm258_vm0 = vcmask 523264   ;;  %s503_s1 = inlined_call_operand.vmem [shape: bf16[256,64], index: 1, kind: input, shape index: {}]   ;;  %s504_s0 = inlined_call_operand.vmem [shape: bf16[48,256], index: 0, kind: input, shape index: {}]   ;;  %s505_s2 = inlined_call_operand.vmem [shape: f32[1,64], index: 2, kind: input, shape index: {}]   ;;  %s506_s3 = inlined_call_operand.vmem [shape: f32[48,64], index: 3, kind: input, shape index: {}]   ;;  %s507_s4 = inlined_call_operand.vmem [shape: f32[48,64], index: 4, kind: output, shape index: {}]  }
   0x1   :  { %v342_v0 = vld [vmem:[%s503_s1 + $0x40] sm:$0xff]   ;;  %v344_v2 = vld [vmem:[%s503_s1 + $0x48] sm:$0xff]   ;;  %v346_v4 = vld [vmem:[%s503_s1 + $0x50] sm:$0xff]  }
   0x2   :  { %v343_v1 = vld [vmem:[%s503_s1] sm:$0xff]   ;;  %326 = vmatprep.subr.bf16.mxu1 %v342_v0  ;;  %292 = vmatprep.subr.bf16.mxu0 %v342_v0  ;;  %v345_v3 = vld [vmem:[%s503_s1 + $0x8] sm:$0xff]   ;;  %v347_v5 = vld [vmem:[%s503_s1 + $0x10] sm:$0xff]  }
   0x3   :  { %334 = vmatpush3.bf16.msra.mxu1 %v343_v1  ;;  %293 = vmatpush3.bf16.msra.mxu0 %v343_v1  ;;  %v348_v6 = vld [vmem:[%s503_s1 + $0x58] sm:$0xff]   ;;  %v350_v8 = vld [vmem:[%s503_s1 + $0x60] sm:$0xff]   ;;  %v352_v10 = vld [vmem:[%s503_s1 + $0x68] sm:$0xff]  }
   0x4   :  { %327 = vmatprep.subr.bf16.mxu1 %v344_v2  ;;  %294 = vmatprep.subr.bf16.mxu0 %v344_v2  ;;  %v349_v7 = vld [vmem:[%s503_s1 + $0x18] sm:$0xff]   ;;  %v351_v9 = vld [vmem:[%s503_s1 + $0x20] sm:$0xff]   ;;  %v353_v13 = vld [vmem:[%s503_s1 + $0x28] sm:$0xff]  }
   0x5   :  { %v360_v11 = vld [vmem:[%s504_s0 + $0x14] ss:$8 sps:$4 sm:$0xff]   ;;  %v363_v12 = vld [vmem:[%s504_s0 + $0x4] ss:$8 sps:$4 sm:$0xff]   ;;  %v358_v18 = vld [vmem:[%s504_s0 + $0x10] ss:$8 sps:$4 sm:$0xff]  }
   0x6   :  { %v354_v14 = vld [vmem:[%s503_s1 + $0x70] sm:$0xff]   ;;  %229 = vmatprep.mubr.bf16.mxu1 %v360_v11  ;;  %221 = vmatprep.mubr.bf16.mxu0 %v363_v12  ;;  %v356_v16 = vld [vmem:[%s503_s1 + $0x78] sm:$0xff]   ;;  %v361_v19 = vld [vmem:[%s504_s0] ss:$8 sps:$4 sm:$0xff]  }
   0x7   :  { %335 = vmatpush3.bf16.msra.mxu1 %v345_v3  ;;  %295 = vmatpush3.bf16.msra.mxu0 %v345_v3  ;;  %v355_v15 = vld [vmem:[%s503_s1 + $0x30] sm:$0xff]   ;;  %v357_v17 = vld [vmem:[%s503_s1 + $0x38] sm:$0xff]   ;;  %v364_v20 = vld [vmem:[%s504_s0 + $0x24] ss:$8 sps:$4 sm:$0xff]  }
   0x8   :  { %328 = vmatprep.subr.bf16.mxu1 %v346_v4  ;;  %296 = vmatprep.subr.bf16.mxu0 %v346_v4  ;;  %v366_v21 = vld [vmem:[%s504_s0 + $0x20] ss:$8 sps:$4 sm:$0xff]   ;;  %v248_v31 = vld [vmem:[%s506_s3 + $0x10] sm:$0xff]  ;;  %v249_v39 = vld [vmem:[%s506_s3 + $0x18] sm:$0xff] }
   0x9   :  { %v269_v24 = vld [vmem:[%s505_s2] ss:$0 sm:$0xff]  ;;  %v247_v40 = vld [vmem:[%s506_s3 + $0x8] sm:$0xff] }
   0xa   :  { %v246_v33 = vld [vmem:[%s506_s3] sm:$0xff]  ;;  %v251_v55 = vld [vmem:[%s506_s3 + $0x28] sm:$0xff] }
   0xb   :  { %336 = vmatpush3.bf16.msra.mxu1 %v347_v5  ;;  %297 = vmatpush3.bf16.msra.mxu0 %v347_v5  ;;  %v250_v51 = vld [vmem:[%s506_s3 + $0x20] sm:$0xff] }
   0xc   :  { %329 = vmatprep.subr.bf16.mxu1 %v348_v6  ;;  %298 = vmatprep.subr.bf16.mxu0 %v348_v6 }
   0xf   :  { %337 = vmatpush3.bf16.msra.mxu1 %v349_v7  ;;  %299 = vmatpush3.bf16.msra.mxu0 %v349_v7 }
  0x10   :  { %330 = vmatprep.subr.bf16.mxu1 %v350_v8  ;;  %300 = vmatprep.subr.bf16.mxu0 %v350_v8 }
  0x13   :  { %338 = vmatpush3.bf16.msra.mxu1 %v351_v9  ;;  %301 = vmatpush3.bf16.msra.mxu0 %v351_v9 }
  0x14   :  { %331 = vmatprep.subr.bf16.mxu1 %v352_v10  ;;  %302 = vmatprep.subr.bf16.mxu0 %v352_v10 }
  0x17   :  { %339 = vmatpush3.bf16.msra.mxu1 %v353_v13  ;;  %303 = vmatpush3.bf16.msra.mxu0 %v353_v13 }
  0x18   :  { %332 = vmatprep.subr.bf16.mxu1 %v354_v14  ;;  %304 = vmatprep.subr.bf16.mxu0 %v354_v14 }
  0x1b   :  { %340 = vmatpush3.bf16.msra.mxu1 %v355_v15  ;;  %305 = vmatpush3.bf16.msra.mxu0 %v355_v15 }
  0x1c   :  { %333 = vmatprep.subr.bf16.mxu1 %v356_v16  ;;  %306 = vmatprep.subr.bf16.mxu0 %v356_v16 }
  0x1f   :  { %341 = vmatpush3.bf16.msra.mxu1 %v357_v17  ;;  %307 = vmatpush3.bf16.msra.mxu0 %v357_v17 }
  0x22   :  { %230 = vmatmul.mubr.bf16.vlgmr.msra.gmra.mrb[0].mxu1 %v358_v18  ;;  %222 = vmatmul.mubr.bf16.vlgmr.msra.gmra.mrb[0].mxu0 %v361_v19 }
  0x23   :  { %237 = vmatprep.mubr.bf16.mxu1 %v364_v20 }
  0x2a   :  { %238 = vmatmul.mubr.bf16.gmra.mrb[4].mxu1 %v366_v21 }
  0xf5   :  { %v314_v22 = vpop.f32.mrb[0].mxu1  ;;  %v308_v23 = vpop.f32.mrb[0].mxu0 }
  0xf6   :  { %v315_v25 = vpop.f32.mrb[1].mxu1  ;;  %v309_v26 = vpop.f32.mrb[1].mxu0 }
  0xf7   :  { %v316_v27 = vadd.f32 %v315_v25, %v314_v22  ;;  %v317_v28 = vpop.f32.mrb[2].mxu1  ;;  %v310_v29 = vadd.f32 %v309_v26, %v308_v23  ;;  %v311_v30 = vpop.f32.mrb[2].mxu0 }
  0xf8   :  { %v318_v32 = vpop.f32.mrb[3].mxu1  ;;  %v312_v34 = vpop.f32.mrb[3].mxu0 }
  0xf9   :  { %v232_v35 = vadd.f32 %v316_v27, %v269_v24  ;;  %v319_v36 = vadd.f32 %v318_v32, %v317_v28  ;;  %v224_v37 = vadd.f32 %v310_v29, %v269_v24  ;;  %v313_v38 = vadd.f32 %v312_v34, %v311_v30 }
  0xfb   :  { %v254_v41 = vadd.f32 %v248_v31, %v232_v35  ;;  %v235_v42 = vadd.f32 %v319_v36, %v269_v24  ;;  %v252_v43 = vadd.f32 %v246_v33, %v224_v37  ;;  %v227_v44 = vadd.f32 %v313_v38, %v269_v24 }
  0xfd   :  { %261 = vst.msk [vmem:[%s507_s4 + $0x10] sm:$0xff] %vm258_vm0, %v254_v41  ;;  %v255_v45 = vadd.f32 %v249_v39, %v235_v42  ;;  %259 = vst.msk [vmem:[%s507_s4] sm:$0xff] %vm258_vm0, %v252_v43  ;;  %v253_v46 = vadd.f32 %v247_v40, %v227_v44  ;;  %v320_v47 = vpop.f32.mrb[4].mxu1 }
  0xfe   :  { %v321_v48 = vpop.f32.mrb[5].mxu1 }
  0xff   :  { %262 = vst.msk [vmem:[%s507_s4 + $0x18] sm:$0xff] %vm258_vm0, %v255_v45  ;;  %260 = vst.msk [vmem:[%s507_s4 + $0x8] sm:$0xff] %vm258_vm0, %v253_v46  ;;  %v322_v49 = vadd.f32 %v321_v48, %v320_v47  ;;  %v323_v50 = vpop.f32.mrb[6].mxu1 }
 0x100   :  { %v324_v52 = vpop.f32.mrb[7].mxu1 }
 0x101   :  { %v240_v53 = vadd.f32 %v322_v49, %v269_v24  ;;  %v325_v54 = vadd.f32 %v324_v52, %v323_v50 }
 0x103   :  { %v256_v56 = vadd.f32 %v250_v51, %v240_v53  ;;  %v243_v57 = vadd.f32 %v325_v54, %v269_v24 }
 0x105   :  { %263 = vst.msk [vmem:[%s507_s4 + $0x20] sm:$0xff] %vm258_vm0, %v256_v56  ;;  %v257_v58 = vadd.f32 %v251_v55, %v243_v57 }
 0x107   :  { %264 = vst.msk [vmem:[%s507_s4 + $0x28] sm:$0xff] %vm258_vm0, %v257_v58 }

// kernel: custom_clip_forward.40
= control target key start
LH: loop header
LB: loop body
LE: loop exit
PB: predicated region body
PF: predicated region fallthrough
CT: control target
= control target key end

     0   :  { %vm19_vm0 = vcmask 518144   ;;  %v164_v8 = vmov 0.0   ;;  %vm165_vm1 = vmmov 0   ;;  %vm83_vm2 = vcmask 523264   ;;  %s218_s0 = inlined_call_operand.vmem [shape: f32[3,64], index: 0, kind: input, shape index: {}]   ;;  %s219_s1 = inlined_call_operand.vmem [shape: bf16[64,64], index: 1, kind: input, shape index: {}]   ;;  %s220_s2 = inlined_call_operand.vmem [shape: f32[1,64], index: 2, kind: input, shape index: {}]   ;;  %s221_s3 = inlined_call_operand.vmem [shape: f32[1,64], index: 3, kind: input, shape index: {}]   ;;  %s222_s4 = inlined_call_operand.vmem [shape: f32[3,64], index: 4, kind: output, shape index: {}]  }
   0x1   :  { %v18_v0 = vld [vmem:[%s218_s0] sm:$0x7]  ;;  %144 = vmatprep.subr.bf16.mxu0 %v164_v8  ;;  %v159_v9 = vld [vmem:[%s219_s1 + $0x8] sm:$0xff]   ;;  %v160_v10 = vld [vmem:[%s219_s1 + $0x10] sm:$0xff]   ;;  %152 = vmatprep.mubr.msk.bf16.mxu0 %vm165_vm1, %v164_v8 }
   0x2   :  { %v20_v1 = vsel %vm19_vm0, %v18_v0, 0.0  ;;  %v158_v7 = vld [vmem:[%s219_s1] sm:$0xff]   ;;  %v161_v11 = vld [vmem:[%s219_s1 + $0x18] sm:$0xff]  }
   0x3   :  { %21 = vadd.xlane.f32.xlu0 %v20_v1  ;;  %145 = vmatpush3.bf16.msra.mxu0 %v158_v7  ;;  %v132_v16 = vld [vmem:[%s220_s2] ss:$0 sm:$0xff] }
   0x4   :  { %146 = vmatprep.subr.bf16.mxu0 %v164_v8  ;;  %v133_v18 = vld [vmem:[%s221_s3] ss:$0 sm:$0xff] }
   0x7   :  { %147 = vmatpush3.bf16.msra.mxu0 %v159_v9 }
   0x8   :  { %148 = vmatprep.subr.bf16.mxu0 %v164_v8 }
   0xb   :  { %149 = vmatpush3.bf16.msra.mxu0 %v160_v10 }
   0xc   :  { %150 = vmatprep.subr.bf16.mxu0 %v164_v8 }
   0xf   :  { %151 = vmatpush3.bf16.msra.mxu0 %v161_v11 }
  0x90   :  { %v22_v2 = vpop.xlane.xlu0 %21 }
  0x91   :  { %v24_v3 = vmul.f32 0.015625, %v22_v2 }
  0x93   :  { %v25_v4 = vsub.f32 %v18_v0, %v24_v3 }
  0x95   :  { %v26_v5 = vmul.f32 %v25_v4, %v25_v4 }
  0x97   :  { %v27_v6 = vsel %vm19_vm0, %v26_v5, 0.0 }
  0x98   :  { %28 = vadd.xlane.f32.xlu0 %v27_v6 }
 0x125   :  { %v29_v12 = vpop.xlane.xlu0 %28 }
 0x126   :  { %v30_v13 = vmul.f32 0.015625, %v29_v12 }
 0x128   :  { %v31_v14 = vadd.f32 1e-05, %v30_v13 }
 0x12a   :  { %162 = vrsqrt.f32 %v31_v14 }
 0x134   :  { %v163_v15 = vpop.eup %162 }
 0x135   :  { %v33_v17 = vmul.f32 %v163_v15, %v25_v4 }
 0x137   :  { %v41_v19 = vmul.f32 %v132_v16, %v33_v17 }
 0x139   :  { %v49_v20 = vadd.f32 %v133_v18, %v41_v19 }
 0x13b   :  { %v50_v21 = vpack.c.bf16 %v49_v20, %v49_v20 }
 0x13d   :  { %153 = vmatmul.mubr.msk.bf16.vlgmr.msra.gmra.mrb[0].mxu0 %vm83_vm2, %v50_v21 }
 0x210   :  { %v121_v22 = vpop.f32.mrb[0].mxu0 }
 0x211   :  { %127 = vst.msk [vmem:[%s222_s4] sm:$0x7] %vm19_vm0, %v121_v22  ;;  %v154_v23 = vpop.f32.mrb[1].mxu0 }
 0x212   :  { %v124_v24 = vpop.f32.mrb[2].mxu0 }
 0x213   :  { %v155_v25 = vpop.f32.mrb[3].mxu0 }

// kernel: custom_clip_forward.41
= control target key start
LH: loop header
LB: loop body
LE: loop exit
PB: predicated region body
PF: predicated region fallthrough
CT: control target
= control target key end

     0   :  { %vm28_vm0 = vcmask 518144   ;;  %s195_s0 = inlined_call_operand.vmem [shape: f32[2,64], index: 0, kind: input, shape index: {}]   ;;  %s196_s1 = inlined_call_operand.vmem [shape: f32[3,64], index: 1, kind: input, shape index: {}]   ;;  %s197_s2 = inlined_call_operand.<no memory space> [shape: f32[1], index: 2, kind: input, shape index: {}]   ;;  %s198_s3 = inlined_call_operand.hbm [shape: f32[2,3], index: 3, kind: output, shape index: {}]  }
   0x1   :  { %v18_v0 = vld [vmem:[%s196_s1] sm:$0x7] }
   0x2   :  { %v17_v1 = vld [vmem:[%s195_s0] sm:$0x3]  ;;  %v27_v2 = vmul.f32 %v18_v0, %v18_v0 }
   0x3   :  { %v19_v3 = vmul.f32 %v17_v1, %v17_v1 }
   0x4   :  { %9 = vsyncpa [#allocation4], 0  ;;  %vm20_vm1 = vcmask 517120   ;;  %v29_v4 = vsel %vm28_vm0, %v27_v2, 0.0  ;;  %v151_v6 = vmov 0.0   ;;  %vm152_vm2 = vmmov 0  }
   0x5   :  { %30 = vadd.xlane.f32.xlu0 %v29_v4  ;;  %v21_v5 = vsel %vm20_vm1, %v19_v3, 0.0  ;;  %110 = vmatprep.subr.bf16.mxu0 %v151_v6  ;;  %v85_v7 = vstv %s197_s2  ;;  %vm37_vm3 = vcmask 523264   ;;  %s153_s1 = smov [#allocation3]   ;;  %vm91_vm4 = vcmask 17408  }
   0x6   :  { %112 = vmatprep.mubr.msk.bf16.mxu0 %vm152_vm2, %v151_v6  ;;  %v86_v8 = vmul.f32 1.442695, %v85_v7  ;;  %s99_s2 = sshll.u32 %s153_s1, 4  ;;  %s100_s2 = int_to_ptr.vmem [resolvable:$true] %s99_s2 }
   0x7   :  { %s127_s18 = scalar_lea.vmem %s100_s2, 32  ;;  %p132_p1 = scmp.lt.s32.totalorder %s100_s2, %s100_s2 }
   0x8   :  { %121 = vpow2.f32 %v86_v8  ;;  %p128_p0 = scmp.ne.s32.totalorder %s100_s2, %s127_s18  ;;  %p133_p2 = scmp.lt.s32.totalorder %s127_s18, %s127_s18 }
   0x9   :  { %22 = vadd.xlane.f32.xlu0 %v21_v5 }
   0xa   :  { %p134_p3 = por %p133_p2, %p132_p1 }
   0xc   :  { %p135_p4 = pnand %p134_p3, %p128_p0 }
  0x12   :  { %v122_v9 = vpop.eup %121 }
  0x13   :  { %116 = vpush %v122_v9 }
  0x44   :  { %s117_s0 = spop %116 }
  0x45   :  { %v89_v21 = vstv %s117_s0 }
  0x92   :  { %v31_v10 = vpop.xlane.xlu0 %30 }
  0x93   :  { %v32_v11 = vmax.f32 %v31_v10, 1e-12 }
  0x95   :  { %123 = vrsqrt.f32 %v32_v11 }
  0x96   :  { %v23_v12 = vpop.xlane.xlu0 %22 }
  0x97   :  { %v24_v13 = vmax.f32 %v23_v12, 1e-12 }
  0x99   :  { %125 = vrsqrt.f32 %v24_v13 }
  0x9f   :  { %v124_v14 = vpop.eup %123 }
  0xa0   :  { %v34_v15 = vmul.f32 %v124_v14, %v18_v0 }
  0xa2   :  { %v36_v16 = vpack.c.bf16 %v34_v15, %v34_v15 }
  0xa3   :  { %v126_v17 = vpop.eup %125 }
  0xa4   :  { %v42_v18 = vsel %vm37_vm3, %v36_v16, 0  ;;  %v26_v19 = vmul.f32 %v126_v17, %v17_v1 }
  0xa5   :  { %111 = vmatpush3.bf16.xpose.msra.mxu0 %v42_v18 }
  0xa6   :  { %v35_v20 = vpack.c.bf16 %v26_v19, %v26_v19 }
  0xac   :  { %113 = vmatmul.mubr.msk.bf16.vlgmr.msra.gmra.mrb[0].mxu0 %vm37_vm3, %v35_v20 }
 0x17f   :  { %v78_v22 = vpop.f32.mrb[0].mxu0 }
 0x180   :  { %v90_v23 = vmul.f32 %v89_v21, %v78_v22  ;;  %v114_v24 = vpop.f32.mrb[1].mxu0 }
 0x181   :  { %v81_v25 = vpop.f32.mrb[2].mxu0 }
 0x182   :  { %v115_v26 = vpop.f32.mrb[3].mxu0  ;;  %92 = vst.msk [vmem:[#allocation3] sm:$0x3] %vm91_vm4, %v90_v23 }
 0x183   :  { %138 = shalt.err (!%p135_p4)
}
 0x184   :  { %s139_s21 = scalar_lea.hbm %s198_s3, 32 }
 0x185   :  { %p140_p5 = scmp.ne.s32.totalorder %s198_s3, %s139_s21  ;;  %p143_p6 = scmp.lt.u32.totalorder %s139_s21, %s198_s3 }
 0x187   :  { %p145_p7 = pnand %p143_p6, %p140_p5 }
 0x189   :  { %148 = shalt.err (!%p145_p7)
}
 0x18a   :  { %102 = dma.vmem_to_hbm [thread:$0]  %s100_s2, 32, %s198_s3, [#allocation4]  }
 0x18b   :  { %149 = dma.done.wait [#allocation4], 32  }
 0x18c   :  { %150 = vsyncadd [#allocation4], 4294967264 }
 0x18d   :  { %106 = vsyncpa [#allocation4], 1 }

</bundles_post_ra>
